<compile_context>
chip_gen: v7x
topology: tpu7x:2x2x1
jax: 0.10.0
libtpu: 0.0.40
codegen_flags: <defaults>
</compile_context>

<pallas_src>
import jax
import jax.numpy as jnp
from jax.experimental import pallas as pl
from jax.experimental.pallas import tpu as pltpu


def _round_up(x, m):
    return (x + m - 1) // m * m


def _two_tensorcores_per_chip():
    """True on chips with 2 TensorCores (v7x); False on v5e/v6e (single TC)."""
    try:
        kind = jax.devices()[0].device_kind.lower()
    except Exception:
        return False
    return ("v7" in kind) or ("7x" in kind)


def _pick_tile(B):
    """Batch tile: minimize grid steps (1 step on 1-TC chips, 2 on 2-TC chips)."""
    Bp8 = _round_up(max(B, 1), 8)
    if _two_tensorcores_per_chip() and Bp8 >= 16:
        tb = min(_round_up(pl.cdiv(Bp8, 2), 8), 1024)   # exactly 2 parallel steps
    else:
        tb = min(Bp8, 512)                              # single TC: 1 step if possible
    return max(8, tb)


def prepare_params(conv_ws, conv_bs, w_hid, b_hid, w_tag, b_tag, L,
                   *, compute_dtype=jnp.bfloat16):
    """One-time (model-load) weight preparation.  Runs eagerly; returns concrete
    device arrays so none of this work sits on the per-call path.

    conv_ws[i]: (k_i, E, E) tap-major (PyTorch Conv1d weight (out,in,k) transposed
    to (k, in, out)); linear weights pre-transposed to (in, out)."""
    E = int(conv_ws[0].shape[1])
    n_convs = len(conv_ws)
    F = n_convs * E
    H = int(w_hid.shape[1])
    V = int(w_tag.shape[1])
    HP = _round_up(H, 128)
    VP = _round_up(V, 128)
    KP = _round_up(L * E, 128)
    ksizes = [int(w.shape[0]) for w in conv_ws]
    n_steps = [L - k + 1 for k in ksizes]
    total = sum(n_steps) * E

    # Block-Toeplitz conv weight: column block (kernel k, time t) holds tap j at
    # row block (t + j), so  emb2d @ m_all  yields every conv output at once.
    m_blocks, biases = [], []
    for w, b in zip(conv_ws, conv_bs):
        k = int(w.shape[0])
        cols = []
        for t in range(L - k + 1):
            col = jnp.zeros((L, E, E), jnp.float32).at[t:t + k].set(
                w.astype(jnp.float32))
            cols.append(col.reshape(L * E, E))
        m_blocks.append(jnp.concatenate(cols, axis=1))
        biases.append(b.reshape(1, E).astype(jnp.float32))
    m_all = jnp.concatenate(m_blocks, axis=1)                     # (L*E, total)
    # Pad K rows to KP=round_up(L*E,128) (zeros) -> lane/K alignment of 1st matmul.
    m_all = jnp.zeros((KP, total), compute_dtype).at[:L * E, :].set(
        m_all.astype(compute_dtype))
    cb = jnp.concatenate(biases, axis=1)                          # (1, F) f32

    # Lane-dense zero padding of hidden / tag dims to multiples of 128.
    wh_p = jnp.zeros((F, HP), compute_dtype).at[:, :H].set(w_hid.astype(compute_dtype))
    bh_p = jnp.zeros((1, HP), jnp.float32).at[:, :H].set(
        b_hid.reshape(1, H).astype(jnp.float32))
    wt_p = jnp.zeros((HP, VP), compute_dtype).at[:H, :V].set(w_tag.astype(compute_dtype))
    bt_p = jnp.zeros((1, VP), jnp.float32).at[:, :V].set(
        b_tag.reshape(1, V).astype(jnp.float32))

    params = dict(m_all=m_all, cb=cb, wh_p=wh_p, bh_p=bh_p, wt_p=wt_p, bt_p=bt_p)
    params = jax.block_until_ready(params)        # materialize once, at load time
    meta = dict(L=L, E=E, n_steps=tuple(n_steps), F=F, H=H, V=V,
                HP=HP, VP=VP, KP=KP, total=total, compute_dtype=compute_dtype)
    return params, meta


def _tree_max(slices):
    """Balanced pairwise max tree (log2 depth) over a list of equal-width slices."""
    while len(slices) > 1:
        nxt = [jnp.maximum(slices[i], slices[i + 1])
               for i in range(0, len(slices) - 1, 2)]
        if len(slices) % 2:
            nxt.append(slices[-1])
        slices = nxt
    return slices[0]


def cnn_forward(embeds, params, meta, *, tb=None):
    """Per-call forward. embeds: (B, L, E) f32 from the embedder.
    Returns (B, V) f32 tag scores (eval mode)."""
    B, L, E = embeds.shape
    assert L == meta["L"] and E == meta["E"]
    KP, total, F = meta["KP"], meta["total"], meta["F"]
    HP, VP, V = meta["HP"], meta["VP"], meta["V"]
    n_steps = meta["n_steps"]
    cdt = meta["compute_dtype"]

    tb = _pick_tile(B) if tb is None else max(8, _round_up(tb, 8))
    Bp = _round_up(B, tb)

    # Channels-last flatten (B, L, E) -> (B, L*E): semantically identical to the
    # PyTorch NCW conv since each tap is an (E_in -> E_out) matmul.  Zero-pad the
    # batch to Bp and the lane dim to KP (matching zero rows live in m_all).
    emb2d = embeds.reshape(B, L * E).astype(cdt)
    emb2d = jnp.pad(emb2d, ((0, Bp - B), (0, KP - L * E)))

    def kernel(emb_ref, m_ref, cb_ref, wh_ref, bh_ref, wt_ref, bt_ref, out_ref):
        # One fused MXU matmul = all taps of all kernel sizes for all time steps.
        conv_all = jnp.dot(emb_ref[...], m_ref[...],
                           preferred_element_type=jnp.float32)   # (tb, total) f32
        # Global max-pool over time per kernel size (balanced tree); bias + ReLU
        # applied after the max (valid: x -> relu(x + b) is monotone in x).
        pooled = []
        off = 0
        for n_t in n_steps:
            slices = [conv_all[:, off + t * E: off + (t + 1) * E]
                      for t in range(n_t)]
            pooled.append(_tree_max(slices))
            off += n_t * E
        feats = jnp.maximum(jnp.concatenate(pooled, axis=1) + cb_ref[...], 0.0)
        # TODO(synk): F.dropout (p=0.5) is stochastic in training; identity here (eval semantics).
        hid = jnp.maximum(
            jnp.dot(feats.astype(wh_ref.dtype), wh_ref[...],
                    preferred_element_type=jnp.float32) + bh_ref[...], 0.0)
        out_ref[...] = (
            jnp.dot(hid.astype(wt_ref.dtype), wt_ref[...],
                    preferred_element_type=jnp.float32) + bt_ref[...])

    def _full(shape):
        n = len(shape)
        return pl.BlockSpec(shape, lambda i, _n=n: (0,) * _n)

    itemsize = jnp.dtype(cdt).itemsize
    cost = pl.CostEstimate(
        flops=2 * Bp * (KP * total + F * HP + HP * VP),
        transcendentals=0,
        bytes_accessed=(Bp * KP + KP * total + F * HP + HP * VP) * itemsize
        + (F + HP + VP) * 4 + Bp * VP * 4,
    )

    m_all, cb = params["m_all"], params["cb"]
    wh_p, bh_p = params["wh_p"], params["bh_p"]
    wt_p, bt_p = params["wt_p"], params["bt_p"]

    out = pl.pallas_call(
        kernel,
        out_shape=jax.ShapeDtypeStruct((Bp, VP), jnp.float32),
        grid=(Bp // tb,),
        in_specs=[pl.BlockSpec((tb, KP), lambda i: (i, 0)),
                  _full(m_all.shape), _full(cb.shape),
                  _full(wh_p.shape), _full(bh_p.shape),
                  _full(wt_p.shape), _full(bt_p.shape)],
        out_specs=pl.BlockSpec((tb, VP), lambda i: (i, 0)),
        compiler_params=pltpu.CompilerParams(
            dimension_semantics=("parallel",)),
        cost_estimate=cost,
    )(emb2d, m_all, cb, wh_p, bh_p, wt_p, bt_p)
    return out[:B, :V]


def ref_forward(embeds, conv_ws, conv_bs, w_hid, b_hid, w_tag, b_tag):
    """Pure-JAX f32 reference mirroring CnnModel.forward (dropout = identity)."""
    B, L, _ = embeds.shape
    pooled = []
    for w, b in zip(conv_ws, conv_bs):
        k = w.shape[0]
        outs = []
        for t in range(L - k + 1):
            acc = b
            for j in range(k):
                acc = acc + embeds[:, t + j, :] @ w[j]
            outs.append(jnp.maximum(acc, 0.0))
        pooled.append(jnp.max(jnp.stack(outs, axis=1), axis=1))
    feats = jnp.concatenate(pooled, axis=1)
    hid = jnp.maximum(feats @ w_hid + b_hid, 0.0)
    return hid @ w_tag + b_tag


if __name__ == "__main__":
    key = jax.random.PRNGKey(0)

    # Config consistent with CnnModel.__init__:
    B = 256                     # batch
    window = 3                  # cfg.window
    L = 2 * window + 1          # context length = 7
    E = 32                      # cfg.embed_dim
    V_out = 20                  # len(rsc.vocab_out)
    V_in = 100                  # character vocab for the embedder
    ngram = min(5, window * 2 + 1)          # -> 5
    ksizes = list(range(2, ngram + 1))      # Conv1d kernel sizes 2,3,4,5
    n_convs = len(ksizes)
    H = (E * n_convs + V_out) // 2          # cfg.hidden_dim = 74

    ks = jax.random.split(key, 4 + 2 * n_convs + 4)
    ki = iter(ks)

    # Embedder (glue): plain embedding lookup contexts -> (B, L, E)
    contexts = jax.random.randint(next(ki), (B, L), 0, V_in, dtype=jnp.int32)
    emb_table = jax.random.normal(next(ki), (V_in, E), jnp.float32) * 0.1

    # Conv1d params: PyTorch weight (out=E, in=E, k) stored tap-major (k, in, out)
    conv_ws, conv_bs = [], []
    for k in ksizes:
        conv_ws.append(jax.random.normal(next(ki), (k, E, E), jnp.float32) * 0.1)
        conv_bs.append(jax.random.normal(next(ki), (1, E), jnp.float32) * 0.1)

    # Linear params, pre-transposed to (in, out)
    w_hid = jax.random.normal(next(ki), (E * n_convs, H), jnp.float32) * 0.1
    b_hid = jax.random.normal(next(ki), (1, H), jnp.float32) * 0.1
    w_tag = jax.random.normal(next(ki), (H, V_out), jnp.float32) * 0.1
    b_tag = jax.random.normal(next(ki), (1, V_out), jnp.float32) * 0.1

    # --- one-time (model-load) weight prep: off the per-call path ---
    params, meta = prepare_params(conv_ws, conv_bs, w_hid, b_hid, w_tag, b_tag, L)

    # --- per-call path: embedding gather + flatten/pad/cast + pallas_call,
    #     all fused under a single jit.  params flow in as ready-made arrays. ---
    @jax.jit
    def forward(contexts, emb_table, params):
        embeds = emb_table[contexts]                # (B, L, E) f32
        return cnn_forward(embeds, params, meta)

    out = forward(contexts, emb_table, params)
    out = jax.block_until_ready(out)

    embeds = emb_table[contexts]
    ref = ref_forward(embeds, conv_ws, conv_bs, w_hid, b_hid, w_tag, b_tag)
    assert out.shape == (B, V_out)
    # bf16 matmul operands with f32 accumulation -> loosened tolerance vs f32 ref
    assert jnp.allclose(out, ref, rtol=2e-2, atol=2e-2), "mismatch vs reference"

    print("KERNEL_OK")
</pallas_src>

<mosaic_0001>
module attributes {stable_mosaic.version = 11 : i64} {
  func.func @kernel(%arg0: i32, %arg1: memref<256x256xbf16, #tpu.memory_space<vmem>>, %arg2: memref<256x576xbf16, #tpu.memory_space<vmem>>, %arg3: memref<1x128xf32, #tpu.memory_space<vmem>>, %arg4: memref<128x128xbf16, #tpu.memory_space<vmem>>, %arg5: memref<1x128xf32, #tpu.memory_space<vmem>>, %arg6: memref<128x128xbf16, #tpu.memory_space<vmem>>, %arg7: memref<1x128xf32, #tpu.memory_space<vmem>>, %arg8: memref<256x128xf32, #tpu.memory_space<vmem>>) attributes {dimension_semantics = [#tpu.dimension_semantics<parallel>], iteration_bounds = array<i64: 1>, scalar_prefetch = 0 : i64, scratch_operands = 0 : i64, tpu.core_type = #tpu.core_type<tc>, window_params = [{transform_indices = @transform_0, window_bounds = array<i64: 256, 256>}, {pipeline_mode = #tpu.pipeline_mode<synchronous>, transform_indices = @transform_1, window_bounds = array<i64: 256, 576>}, {pipeline_mode = #tpu.pipeline_mode<synchronous>, transform_indices = @transform_2, window_bounds = array<i64: 1, 128>}, {pipeline_mode = #tpu.pipeline_mode<synchronous>, transform_indices = @transform_3, window_bounds = array<i64: 128, 128>}, {pipeline_mode = #tpu.pipeline_mode<synchronous>, transform_indices = @transform_4, window_bounds = array<i64: 1, 128>}, {pipeline_mode = #tpu.pipeline_mode<synchronous>, transform_indices = @transform_5, window_bounds = array<i64: 128, 128>}, {pipeline_mode = #tpu.pipeline_mode<synchronous>, transform_indices = @transform_6, window_bounds = array<i64: 1, 128>}, {transform_indices = @transform_7, window_bounds = array<i64: 256, 128>}]} {
    %c0 = arith.constant 0 : index
    %c0_0 = arith.constant 0 : index
    %0 = vector.load %arg1[%c0, %c0_0] : memref<256x256xbf16, #tpu.memory_space<vmem>>, vector<256x256xbf16>
    %c0_1 = arith.constant 0 : index
    %c0_2 = arith.constant 0 : index
    %1 = vector.load %arg2[%c0_1, %c0_2] : memref<256x576xbf16, #tpu.memory_space<vmem>>, vector<256x576xbf16>
    %cst = arith.constant dense<0.000000e+00> : vector<256x576xf32>
    %2 = tpu.matmul %0, %1, %cst {dimension_numbers = #tpu.dot_dimension_numbers<[1], [0], [0], [1], [0, 0, 1, 1], [], []>} : vector<256x256xbf16>, vector<256x576xbf16>, vector<256x576xf32> -> vector<256x576xf32>
    %3 = vector.extract_strided_slice %2 {offsets = [0, 0], sizes = [256, 32], strides = [1, 1]} : vector<256x576xf32> to vector<256x32xf32>
    %4 = vector.extract_strided_slice %2 {offsets = [0, 32], sizes = [256, 32], strides = [1, 1]} : vector<256x576xf32> to vector<256x32xf32>
    %5 = vector.extract_strided_slice %2 {offsets = [0, 64], sizes = [256, 32], strides = [1, 1]} : vector<256x576xf32> to vector<256x32xf32>
    %6 = vector.extract_strided_slice %2 {offsets = [0, 96], sizes = [256, 32], strides = [1, 1]} : vector<256x576xf32> to vector<256x32xf32>
    %7 = vector.extract_strided_slice %2 {offsets = [0, 128], sizes = [256, 32], strides = [1, 1]} : vector<256x576xf32> to vector<256x32xf32>
    %8 = vector.extract_strided_slice %2 {offsets = [0, 160], sizes = [256, 32], strides = [1, 1]} : vector<256x576xf32> to vector<256x32xf32>
    %9 = arith.maximumf %3, %4 : vector<256x32xf32>
    %10 = arith.maximumf %5, %6 : vector<256x32xf32>
    %11 = arith.maximumf %7, %8 : vector<256x32xf32>
    %12 = arith.maximumf %9, %10 : vector<256x32xf32>
    %13 = arith.maximumf %12, %11 : vector<256x32xf32>
    %14 = vector.extract_strided_slice %2 {offsets = [0, 192], sizes = [256, 32], strides = [1, 1]} : vector<256x576xf32> to vector<256x32xf32>
    %15 = vector.extract_strided_slice %2 {offsets = [0, 224], sizes = [256, 32], strides = [1, 1]} : vector<256x576xf32> to vector<256x32xf32>
    %16 = vector.extract_strided_slice %2 {offsets = [0, 256], sizes = [256, 32], strides = [1, 1]} : vector<256x576xf32> to vector<256x32xf32>
    %17 = vector.extract_strided_slice %2 {offsets = [0, 288], sizes = [256, 32], strides = [1, 1]} : vector<256x576xf32> to vector<256x32xf32>
    %18 = vector.extract_strided_slice %2 {offsets = [0, 320], sizes = [256, 32], strides = [1, 1]} : vector<256x576xf32> to vector<256x32xf32>
    %19 = arith.maximumf %14, %15 : vector<256x32xf32>
    %20 = arith.maximumf %16, %17 : vector<256x32xf32>
    %21 = arith.maximumf %19, %20 : vector<256x32xf32>
    %22 = arith.maximumf %21, %18 : vector<256x32xf32>
    %23 = vector.extract_strided_slice %2 {offsets = [0, 352], sizes = [256, 32], strides = [1, 1]} : vector<256x576xf32> to vector<256x32xf32>
    %24 = vector.extract_strided_slice %2 {offsets = [0, 384], sizes = [256, 32], strides = [1, 1]} : vector<256x576xf32> to vector<256x32xf32>
    %25 = vector.extract_strided_slice %2 {offsets = [0, 416], sizes = [256, 32], strides = [1, 1]} : vector<256x576xf32> to vector<256x32xf32>
    %26 = vector.extract_strided_slice %2 {offsets = [0, 448], sizes = [256, 32], strides = [1, 1]} : vector<256x576xf32> to vector<256x32xf32>
    %27 = arith.maximumf %23, %24 : vector<256x32xf32>
    %28 = arith.maximumf %25, %26 : vector<256x32xf32>
    %29 = arith.maximumf %27, %28 : vector<256x32xf32>
    %30 = vector.extract_strided_slice %2 {offsets = [0, 480], sizes = [256, 32], strides = [1, 1]} : vector<256x576xf32> to vector<256x32xf32>
    %31 = vector.extract_strided_slice %2 {offsets = [0, 512], sizes = [256, 32], strides = [1, 1]} : vector<256x576xf32> to vector<256x32xf32>
    %32 = vector.extract_strided_slice %2 {offsets = [0, 544], sizes = [256, 32], strides = [1, 1]} : vector<256x576xf32> to vector<256x32xf32>
    %33 = arith.maximumf %30, %31 : vector<256x32xf32>
    %34 = arith.maximumf %33, %32 : vector<256x32xf32>
    %35 = tpu.concatenate %13, %22, %29, %34 in 1 : vector<256x32xf32>, vector<256x32xf32>, vector<256x32xf32>, vector<256x32xf32> -> vector<256x128xf32>
    %c0_3 = arith.constant 0 : index
    %c0_4 = arith.constant 0 : index
    %36 = vector.load %arg3[%c0_3, %c0_4] : memref<1x128xf32, #tpu.memory_space<vmem>>, vector<1x128xf32>
    %37 = vector.broadcast %36 : vector<1x128xf32> to vector<256x128xf32>
    %38 = arith.addf %35, %37 : vector<256x128xf32>
    %cst_5 = arith.constant 0.000000e+00 : f32
    %39 = vector.broadcast %cst_5 : f32 to vector<256x128xf32>
    %40 = arith.maximumf %38, %39 : vector<256x128xf32>
    %41 = arith.truncf %40 : vector<256x128xf32> to vector<256x128xbf16>
    %c0_6 = arith.constant 0 : index
    %c0_7 = arith.constant 0 : index
    %42 = vector.load %arg4[%c0_6, %c0_7] : memref<128x128xbf16, #tpu.memory_space<vmem>>, vector<128x128xbf16>
    %cst_8 = arith.constant dense<0.000000e+00> : vector<256x128xf32>
    %43 = tpu.matmul %41, %42, %cst_8 {dimension_numbers = #tpu.dot_dimension_numbers<[1], [0], [0], [1], [0, 0, 1, 1], [], []>} : vector<256x128xbf16>, vector<128x128xbf16>, vector<256x128xf32> -> vector<256x128xf32>
    %c0_9 = arith.constant 0 : index
    %c0_10 = arith.constant 0 : index
    %44 = vector.load %arg5[%c0_9, %c0_10] : memref<1x128xf32, #tpu.memory_space<vmem>>, vector<1x128xf32>
    %45 = vector.broadcast %44 : vector<1x128xf32> to vector<256x128xf32>
    %46 = arith.addf %43, %45 : vector<256x128xf32>
    %cst_11 = arith.constant 0.000000e+00 : f32
    %47 = vector.broadcast %cst_11 : f32 to vector<256x128xf32>
    %48 = arith.maximumf %46, %47 : vector<256x128xf32>
    %49 = arith.truncf %48 : vector<256x128xf32> to vector<256x128xbf16>
    %c0_12 = arith.constant 0 : index
    %c0_13 = arith.constant 0 : index
    %50 = vector.load %arg6[%c0_12, %c0_13] : memref<128x128xbf16, #tpu.memory_space<vmem>>, vector<128x128xbf16>
    %cst_14 = arith.constant dense<0.000000e+00> : vector<256x128xf32>
    %51 = tpu.matmul %49, %50, %cst_14 {dimension_numbers = #tpu.dot_dimension_numbers<[1], [0], [0], [1], [0, 0, 1, 1], [], []>} : vector<256x128xbf16>, vector<128x128xbf16>, vector<256x128xf32> -> vector<256x128xf32>
    %c0_15 = arith.constant 0 : index
    %c0_16 = arith.constant 0 : index
    %52 = vector.load %arg7[%c0_15, %c0_16] : memref<1x128xf32, #tpu.memory_space<vmem>>, vector<1x128xf32>
    %53 = vector.broadcast %52 : vector<1x128xf32> to vector<256x128xf32>
    %54 = arith.addf %51, %53 : vector<256x128xf32>
    %c0_17 = arith.constant 0 : index
    %c0_18 = arith.constant 0 : index
    %55 = vector.load %arg8[%c0_17, %c0_18] : memref<256x128xf32, #tpu.memory_space<vmem>>, vector<256x128xf32>
    tpu.vector_store %arg8[%c0_17, %c0_18], %54 {strides = array<i32>} : memref<256x128xf32, #tpu.memory_space<vmem>>, vector<256x128xf32>,
    return
  }
  func.func @transform_0(%arg0: i32) -> (i32, i32) {
    %c0_i32 = arith.constant 0 : i32
    %c0_i32_0 = arith.constant 0 : i32
    return %arg0, %c0_i32 : i32, i32
  }
  func.func @transform_1(%arg0: i32) -> (i32, i32) {
    %c0_i32 = arith.constant 0 : i32
    %c0_i32_0 = arith.constant 0 : i32
    %c0_i32_1 = arith.constant 0 : i32
    return %c0_i32, %c0_i32_0 : i32, i32
  }
  func.func @transform_2(%arg0: i32) -> (i32, i32) {
    %c0_i32 = arith.constant 0 : i32
    %c0_i32_0 = arith.constant 0 : i32
    %c0_i32_1 = arith.constant 0 : i32
    return %c0_i32, %c0_i32_0 : i32, i32
  }
  func.func @transform_3(%arg0: i32) -> (i32, i32) {
    %c0_i32 = arith.constant 0 : i32
    %c0_i32_0 = arith.constant 0 : i32
    %c0_i32_1 = arith.constant 0 : i32
    return %c0_i32, %c0_i32_0 : i32, i32
  }
  func.func @transform_4(%arg0: i32) -> (i32, i32) {
    %c0_i32 = arith.constant 0 : i32
    %c0_i32_0 = arith.constant 0 : i32
    %c0_i32_1 = arith.constant 0 : i32
    return %c0_i32, %c0_i32_0 : i32, i32
  }
  func.func @transform_5(%arg0: i32) -> (i32, i32) {
    %c0_i32 = arith.constant 0 : i32
    %c0_i32_0 = arith.constant 0 : i32
    %c0_i32_1 = arith.constant 0 : i32
    return %c0_i32, %c0_i32_0 : i32, i32
  }
  func.func @transform_6(%arg0: i32) -> (i32, i32) {
    %c0_i32 = arith.constant 0 : i32
    %c0_i32_0 = arith.constant 0 : i32
    %c0_i32_1 = arith.constant 0 : i32
    return %c0_i32, %c0_i32_0 : i32, i32
  }
  func.func @transform_7(%arg0: i32) -> (i32, i32) {
    %c0_i32 = arith.constant 0 : i32
    %c0_i32_0 = arith.constant 0 : i32
    return %arg0, %c0_i32 : i32, i32
  }
}

</mosaic_0001>

<bundles_post_ra>
// kernel: forward.1
= control target key start
LH: loop header
LB: loop body
LE: loop exit
PB: predicated region body
PF: predicated region fallthrough
CT: control target
= control target key end

     0   :  { %vm3038_vm0 = vcmask 261120   ;;  %vm3071_vm1 = vcmask 523264   ;;  %vm3104_vm2 = vcmask 785408   ;;  %s7340_s1 = inlined_call_operand.vmem [shape: bf16[256,576], index: 1, kind: input, shape index: {}]   ;;  %s7341_s0 = inlined_call_operand.vmem [shape: bf16[256,256], index: 0, kind: input, shape index: {}]   ;;  %s7342_s3 = inlined_call_operand.vmem [shape: bf16[128,128], index: 3, kind: input, shape index: {}]   ;;  %s7343_s2 = inlined_call_operand.vmem [shape: f32[1,128], index: 2, kind: input, shape index: {}]   ;;  %s7344_s5 = inlined_call_operand.vmem [shape: bf16[128,128], index: 5, kind: input, shape index: {}]   ;;  %s7345_s4 = inlined_call_operand.vmem [shape: f32[1,128], index: 4, kind: input, shape index: {}]   ;;  %s7346_s6 = inlined_call_operand.vmem [shape: f32[1,128], index: 6, kind: input, shape index: {}]   ;;  %s7347_s7 = inlined_call_operand.vmem [shape: f32[256,128], index: 7, kind: output, shape index: {}]  }
   0x1   :  { %v4161_v0 = vld [vmem:[%s7340_s1 + $0x4] ss:$20 sps:$4 sm:$0xff]   ;;  %v4163_v1 = vld [vmem:[%s7340_s1 + $0xc] ss:$20 sps:$4 sm:$0xff]   ;;  %v4166_v3 = vld [vmem:[%s7340_s1 + $0x8] ss:$20 sps:$4 sm:$0xff]  }
   0x2   :  { %731 = vmatprep.subr.bf16.mxu0 %v4161_v0  ;;  %v4165_v2 = vld [vmem:[%s7340_s1] ss:$20 sps:$4 sm:$0xff]   ;;  %924 = vmatprep.subr.bf16.mxu1 %v4163_v1  ;;  %v4171_v6 = vld [vmem:[%s7340_s1 + $0x28] ss:$20 sps:$4 sm:$0xff]   ;;  %v4172_v7 = vld [vmem:[%s7340_s1 + $0x30] ss:$20 sps:$4 sm:$0xff]  }
   0x3   :  { %v4167_v4 = vld [vmem:[%s7340_s1 + $0x2c] ss:$20 sps:$4 sm:$0xff]   ;;  %732 = vmatpush1.bf16.msra.mxu0 %v4165_v2  ;;  %925 = vmatpush1.bf16.msra.mxu1 %v4166_v3  ;;  %v4169_v5 = vld [vmem:[%s7340_s1 + $0x34] ss:$20 sps:$4 sm:$0xff]   ;;  %v4175_v9 = vld [vmem:[%s7340_s1 + $0x5c] ss:$20 sps:$4 sm:$0xff]  }
   0x4   :  { %733 = vmatprep.subr.bf16.mxu0 %v4167_v4  ;;  %926 = vmatprep.subr.bf16.mxu1 %v4169_v5  ;;  %v4173_v8 = vld [vmem:[%s7340_s1 + $0x54] ss:$20 sps:$4 sm:$0xff]   ;;  %v4177_v10 = vld [vmem:[%s7340_s1 + $0x50] ss:$20 sps:$4 sm:$0xff]   ;;  %v4178_v11 = vld [vmem:[%s7340_s1 + $0x58] ss:$20 sps:$4 sm:$0xff]  }
   0x5   :  { %v4179_v12 = vld [vmem:[%s7340_s1 + $0x7c] ss:$20 sps:$4 sm:$0xff]   ;;  %v4181_v13 = vld [vmem:[%s7340_s1 + $0x84] ss:$20 sps:$4 sm:$0xff]   ;;  %v4184_v15 = vld [vmem:[%s7340_s1 + $0x80] ss:$20 sps:$4 sm:$0xff]  }
   0x6   :  { %v4183_v14 = vld [vmem:[%s7340_s1 + $0x78] ss:$20 sps:$4 sm:$0xff]   ;;  %v4189_v18 = vld [vmem:[%s7340_s1 + $0xa0] ss:$20 sps:$4 sm:$0xff]   ;;  %v4190_v19 = vld [vmem:[%s7340_s1 + $0xa8] ss:$20 sps:$4 sm:$0xff]  }
   0x7   :  { %734 = vmatpush1.bf16.msra.mxu0 %v4171_v6  ;;  %927 = vmatpush1.bf16.msra.mxu1 %v4172_v7  ;;  %v4185_v16 = vld [vmem:[%s7340_s1 + $0xa4] ss:$20 sps:$4 sm:$0xff]   ;;  %v4187_v17 = vld [vmem:[%s7340_s1 + $0xac] ss:$20 sps:$4 sm:$0xff]   ;;  %v4193_v21 = vld [vmem:[%s7340_s1 + $0xd4] ss:$20 sps:$4 sm:$0xff]  }
   0x8   :  { %735 = vmatprep.subr.bf16.mxu0 %v4173_v8  ;;  %928 = vmatprep.subr.bf16.mxu1 %v4175_v9  ;;  %v4191_v20 = vld [vmem:[%s7340_s1 + $0xcc] ss:$20 sps:$4 sm:$0xff]   ;;  %v4195_v22 = vld [vmem:[%s7340_s1 + $0xc8] ss:$20 sps:$4 sm:$0xff]   ;;  %v4196_v23 = vld [vmem:[%s7340_s1 + $0xd0] ss:$20 sps:$4 sm:$0xff]  }
   0x9   :  { %v4197_v24 = vld [vmem:[%s7340_s1 + $0xf4] ss:$20 sps:$4 sm:$0xff]   ;;  %v4199_v25 = vld [vmem:[%s7340_s1 + $0xfc] ss:$20 sps:$4 sm:$0xff]   ;;  %v4202_v27 = vld [vmem:[%s7340_s1 + $0xf8] ss:$20 sps:$4 sm:$0xff]  }
   0xa   :  { %v4201_v26 = vld [vmem:[%s7340_s1 + $0xf0] ss:$20 sps:$4 sm:$0xff]   ;;  %v4207_v30 = vld [vmem:[%s7340_s1 + $0x118] ss:$20 sps:$4 sm:$0xff]   ;;  %v4208_v31 = vld [vmem:[%s7340_s1 + $0x120] ss:$20 sps:$4 sm:$0xff]  }
   0xb   :  { %736 = vmatpush1.bf16.msra.mxu0 %v4177_v10  ;;  %929 = vmatpush1.bf16.msra.mxu1 %v4178_v11  ;;  %v4203_v28 = vld [vmem:[%s7340_s1 + $0x11c] ss:$20 sps:$4 sm:$0xff]   ;;  %v4205_v29 = vld [vmem:[%s7340_s1 + $0x124] ss:$20 sps:$4 sm:$0xff]   ;;  %v4211_v33 = vld [vmem:[%s7340_s1 + $0x14c] ss:$20 sps:$4 sm:$0xff]  }
   0xc   :  { %737 = vmatprep.subr.bf16.mxu0 %v4179_v12  ;;  %930 = vmatprep.subr.bf16.mxu1 %v4181_v13  ;;  %v4209_v32 = vld [vmem:[%s7340_s1 + $0x144] ss:$20 sps:$4 sm:$0xff]   ;;  %v4213_v34 = vld [vmem:[%s7340_s1 + $0x140] ss:$20 sps:$4 sm:$0xff]   ;;  %v4214_v35 = vld [vmem:[%s7340_s1 + $0x148] ss:$20 sps:$4 sm:$0xff]  }
   0xd   :  { %v4215_v36 = vld [vmem:[%s7340_s1 + $0x16c] ss:$20 sps:$4 sm:$0xff]   ;;  %v4217_v37 = vld [vmem:[%s7340_s1 + $0x174] ss:$20 sps:$4 sm:$0xff]   ;;  %v4220_v39 = vld [vmem:[%s7340_s1 + $0x170] ss:$20 sps:$4 sm:$0xff]  }
   0xe   :  { %v4219_v38 = vld [vmem:[%s7340_s1 + $0x168] ss:$20 sps:$4 sm:$0xff]   ;;  %v4225_v42 = vld [vmem:[%s7340_s1 + $0x190] ss:$20 sps:$4 sm:$0xff]   ;;  %v4226_v43 = vld [vmem:[%s7340_s1 + $0x198] ss:$20 sps:$4 sm:$0xff]  }
   0xf   :  { %738 = vmatpush1.bf16.msra.mxu0 %v4183_v14  ;;  %931 = vmatpush1.bf16.msra.mxu1 %v4184_v15  ;;  %v4221_v40 = vld [vmem:[%s7340_s1 + $0x194] ss:$20 sps:$4 sm:$0xff]   ;;  %v4223_v41 = vld [vmem:[%s7340_s1 + $0x19c] ss:$20 sps:$4 sm:$0xff]   ;;  %v4229_v45 = vld [vmem:[%s7340_s1 + $0x1c4] ss:$20 sps:$4 sm:$0xff]  }
  0x10   :  { %739 = vmatprep.subr.bf16.mxu0 %v4185_v16  ;;  %932 = vmatprep.subr.bf16.mxu1 %v4187_v17  ;;  %v4227_v44 = vld [vmem:[%s7340_s1 + $0x1bc] ss:$20 sps:$4 sm:$0xff]   ;;  %v4231_v46 = vld [vmem:[%s7340_s1 + $0x1b8] ss:$20 sps:$4 sm:$0xff]   ;;  %v4232_v47 = vld [vmem:[%s7340_s1 + $0x1c0] ss:$20 sps:$4 sm:$0xff]  }
  0x11   :  { %v4527_v48 = vld [vmem:[%s7341_s0 + $0x4] ss:$8 sps:$4 sm:$0xff]   ;;  %v4237_v51 = vld [vmem:[%s7340_s1 + $0x1e0] ss:$20 sps:$4 sm:$0xff]   ;;  %v4238_v52 = vld [vmem:[%s7340_s1 + $0x1e8] ss:$20 sps:$4 sm:$0xff]  }
  0x12   :  { %v4233_v49 = vld [vmem:[%s7340_s1 + $0x1e4] ss:$20 sps:$4 sm:$0xff]   ;;  %v4235_v50 = vld [vmem:[%s7340_s1 + $0x1ec] ss:$20 sps:$4 sm:$0xff]   ;;  %763 = vmatprep.mubr.bf16.mxu0 %v4527_v48  ;;  %956 = vmatprep.mubr.bf16.mxu1 %v4527_v48  ;;  %v4241_v54 = vld [vmem:[%s7340_s1 + $0x214] ss:$20 sps:$4 sm:$0xff]  }
  0x13   :  { %740 = vmatpush1.bf16.msra.mxu0 %v4189_v18  ;;  %933 = vmatpush1.bf16.msra.mxu1 %v4190_v19  ;;  %v4239_v53 = vld [vmem:[%s7340_s1 + $0x20c] ss:$20 sps:$4 sm:$0xff]   ;;  %v4243_v55 = vld [vmem:[%s7340_s1 + $0x208] ss:$20 sps:$4 sm:$0xff]   ;;  %v4244_v56 = vld [vmem:[%s7340_s1 + $0x210] ss:$20 sps:$4 sm:$0xff]  }
  0x14   :  { %741 = vmatprep.subr.bf16.mxu0 %v4191_v20  ;;  %934 = vmatprep.subr.bf16.mxu1 %v4193_v21  ;;  %v4245_v57 = vld [vmem:[%s7340_s1 + $0x234] ss:$20 sps:$4 sm:$0xff]   ;;  %v4247_v58 = vld [vmem:[%s7340_s1 + $0x23c] ss:$20 sps:$4 sm:$0xff]   ;;  %v4250_v60 = vld [vmem:[%s7340_s1 + $0x238] ss:$20 sps:$4 sm:$0xff]  }
  0x15   :  { %v4249_v59 = vld [vmem:[%s7340_s1 + $0x230] ss:$20 sps:$4 sm:$0xff]   ;;  %v4255_v63 = vld [vmem:[%s7340_s1 + $0x258] ss:$20 sps:$4 sm:$0xff]   ;;  %v4256_v0 = vld [vmem:[%s7340_s1 + $0x260] ss:$20 sps:$4 sm:$0xff]  }
  0x16   :  { %v4251_v61 = vld [vmem:[%s7340_s1 + $0x25c] ss:$20 sps:$4 sm:$0xff]   ;;  %v4253_v62 = vld [vmem:[%s7340_s1 + $0x264] ss:$20 sps:$4 sm:$0xff]   ;;  %v4585_v2 = vld [vmem:[%s7341_s0] ss:$8 sps:$4 sm:$0xff]  }
  0x17   :  { %742 = vmatpush1.bf16.msra.mxu0 %v4195_v22  ;;  %935 = vmatpush1.bf16.msra.mxu1 %v4196_v23  ;;  %v4287_v1 = vld [vmem:[%s7340_s1 + $0x150] ss:$20 sps:$4 sm:$0xff]   ;;  %v4590_v3 = vld [vmem:[%s7341_s0 + $0x14] ss:$8 sps:$4 sm:$0xff]   ;;  %v4292_v5 = vld [vmem:[%s7340_s1 + $0x178] ss:$20 sps:$4 sm:$0xff]  }
  0x18   :  { %743 = vmatprep.subr.bf16.mxu0 %v4197_v24  ;;  %936 = vmatprep.subr.bf16.mxu1 %v4199_v25  ;;  %v4288_v4 = vld [vmem:[%s7340_s1 + $0x10] ss:$20 sps:$4 sm:$0xff]   ;;  %v4293_v6 = vld [vmem:[%s7340_s1 + $0x38] ss:$20 sps:$4 sm:$0xff]   ;;  %v4297_v8 = vld [vmem:[%s7340_s1 + $0x1a0] ss:$20 sps:$4 sm:$0xff]  }
  0x19   :  { %v4608_v7 = vld [vmem:[%s7341_s0 + $0x10] ss:$8 sps:$4 sm:$0xff]   ;;  %v4616_v9 = vld [vmem:[%s7341_s0 + $0x24] ss:$8 sps:$4 sm:$0xff]   ;;  %v4298_v10 = vld [vmem:[%s7340_s1 + $0x60] ss:$20 sps:$4 sm:$0xff]  }
  0x1a   :  { %v4302_v11 = vld [vmem:[%s7340_s1 + $0x1c8] ss:$20 sps:$4 sm:$0xff]   ;;  %v4648_v15 = vld [vmem:[%s7341_s0 + $0x30] ss:$8 sps:$4 sm:$0xff]   ;;  %v4653_v16 = vld [vmem:[%s7341_s0 + $0x44] ss:$8 sps:$4 sm:$0xff]  }
  0x1b   :  { %744 = vmatpush1.bf16.msra.mxu0 %v4201_v26  ;;  %937 = vmatpush1.bf16.msra.mxu1 %v4202_v27  ;;  %v4303_v12 = vld [vmem:[%s7340_s1 + $0x88] ss:$20 sps:$4 sm:$0xff]   ;;  %v4676_v19 = vld [vmem:[%s7341_s0 + $0x50] ss:$8 sps:$4 sm:$0xff]   ;;  %v4681_v20 = vld [vmem:[%s7341_s0 + $0x64] ss:$8 sps:$4 sm:$0xff]  }
  0x1c   :  { %745 = vmatprep.subr.bf16.mxu0 %v4203_v28  ;;  %938 = vmatprep.subr.bf16.mxu1 %v4205_v29  ;;  %v4634_v13 = vld [vmem:[%s7341_s0 + $0x20] ss:$8 sps:$4 sm:$0xff]   ;;  %v4639_v14 = vld [vmem:[%s7341_s0 + $0x34] ss:$8 sps:$4 sm:$0xff]   ;;  %v4704_v23 = vld [vmem:[%s7341_s0 + $0x70] ss:$8 sps:$4 sm:$0xff]  }
  0x1d   :  { %v4662_v17 = vld [vmem:[%s7341_s0 + $0x40] ss:$8 sps:$4 sm:$0xff]   ;;  %v4667_v18 = vld [vmem:[%s7341_s0 + $0x54] ss:$8 sps:$4 sm:$0xff]   ;;  %v4709_v24 = vld [vmem:[%s7341_s0 + $0x84] ss:$8 sps:$4 sm:$0xff]  }
  0x1e   :  { %v4690_v21 = vld [vmem:[%s7341_s0 + $0x60] ss:$8 sps:$4 sm:$0xff]   ;;  %v4695_v22 = vld [vmem:[%s7341_s0 + $0x74] ss:$8 sps:$4 sm:$0xff]   ;;  %v4732_v27 = vld [vmem:[%s7341_s0 + $0x90] ss:$8 sps:$4 sm:$0xff]  }
  0x1f   :  { %746 = vmatpush1.bf16.msra.mxu0 %v4207_v30  ;;  %939 = vmatpush1.bf16.msra.mxu1 %v4208_v31  ;;  %v4718_v25 = vld [vmem:[%s7341_s0 + $0x80] ss:$8 sps:$4 sm:$0xff]   ;;  %v4723_v26 = vld [vmem:[%s7341_s0 + $0x94] ss:$8 sps:$4 sm:$0xff]   ;;  %v4737_v28 = vld [vmem:[%s7341_s0 + $0xa4] ss:$8 sps:$4 sm:$0xff]  }
  0x20   :  { %747 = vmatprep.subr.bf16.mxu0 %v4209_v32  ;;  %940 = vmatprep.subr.bf16.mxu1 %v4211_v33  ;;  %v4746_v29 = vld [vmem:[%s7341_s0 + $0xa0] ss:$8 sps:$4 sm:$0xff]   ;;  %v4751_v30 = vld [vmem:[%s7341_s0 + $0xb4] ss:$8 sps:$4 sm:$0xff]   ;;  %v4760_v31 = vld [vmem:[%s7341_s0 + $0xb0] ss:$8 sps:$4 sm:$0xff]  }
  0x21   :  { %v4307_v32 = vld [vmem:[%s7340_s1 + $0x1f0] ss:$20 sps:$4 sm:$0xff]  }
  0x22   :  { %v4768_v33 = vld [vmem:[%s7341_s0 + $0xc4] ss:$8 sps:$4 sm:$0xff]  }
  0x23   :  { %748 = vmatpush1.bf16.msra.mxu0 %v4213_v34  ;;  %941 = vmatpush1.bf16.msra.mxu1 %v4214_v35  ;;  %v4308_v34 = vld [vmem:[%s7340_s1 + $0xb0] ss:$20 sps:$4 sm:$0xff]   ;;  %v4780_v35 = vld [vmem:[%s7341_s0 + $0xc0] ss:$8 sps:$4 sm:$0xff]  }
  0x24   :  { %749 = vmatprep.subr.bf16.mxu0 %v4215_v36  ;;  %942 = vmatprep.subr.bf16.mxu1 %v4217_v37  ;;  %v4785_v36 = vld [vmem:[%s7341_s0 + $0xd4] ss:$8 sps:$4 sm:$0xff]   ;;  %v4312_v37 = vld [vmem:[%s7340_s1 + $0x218] ss:$20 sps:$4 sm:$0xff]  }
  0x27   :  { %750 = vmatpush1.bf16.msra.mxu0 %v4219_v38  ;;  %943 = vmatpush1.bf16.msra.mxu1 %v4220_v39  ;;  %v4797_v38 = vld [vmem:[%s7341_s0 + $0xd0] ss:$8 sps:$4 sm:$0xff]  }
  0x28   :  { %751 = vmatprep.subr.bf16.mxu0 %v4221_v40  ;;  %944 = vmatprep.subr.bf16.mxu1 %v4223_v41  ;;  %v4313_v39 = vld [vmem:[%s7340_s1 + $0xd8] ss:$20 sps:$4 sm:$0xff]   ;;  %v4814_v41 = vld [vmem:[%s7341_s0 + $0xe0] ss:$8 sps:$4 sm:$0xff]  }
  0x29   :  { %v4805_v40 = vld [vmem:[%s7341_s0 + $0xe4] ss:$8 sps:$4 sm:$0xff]  }
  0x2b   :  { %752 = vmatpush1.bf16.msra.mxu0 %v4225_v42  ;;  %945 = vmatpush1.bf16.msra.mxu1 %v4226_v43  ;;  %v4314_v42 = vld [vmem:[%s7340_s1 + $0x240] ss:$20 sps:$4 sm:$0xff]  }
  0x2c   :  { %753 = vmatprep.subr.bf16.mxu0 %v4227_v44  ;;  %946 = vmatprep.subr.bf16.mxu1 %v4229_v45  ;;  %v4315_v43 = vld [vmem:[%s7340_s1 + $0x100] ss:$20 sps:$4 sm:$0xff]   ;;  %v4832_v45 = vld [vmem:[%s7341_s0 + $0xf0] ss:$8 sps:$4 sm:$0xff]  }
  0x2d   :  { %v4827_v44 = vld [vmem:[%s7341_s0 + $0xf4] ss:$8 sps:$4 sm:$0xff]   ;;  %s4338_s0 = smov 96  }
  0x2f   :  { %754 = vmatpush1.bf16.msra.mxu0 %v4231_v46  ;;  %947 = vmatpush1.bf16.msra.mxu1 %v4232_v47  ;;  %v4319_v46 = vld [vmem:[%s7340_s1 + $0x268] ss:$20 sps:$4 sm:$0xff]  }
  0x30   :  { %755 = vmatprep.subr.bf16.mxu0 %v4233_v49  ;;  %948 = vmatprep.subr.bf16.mxu1 %v4235_v50  ;;  %v4320_v47 = vld [vmem:[%s7340_s1 + $0x128] ss:$20 sps:$4 sm:$0xff]   ;;  %s4339_s1 = smov 64  }
  0x33   :  { %756 = vmatpush1.bf16.msra.mxu0 %v4237_v51  ;;  %949 = vmatpush1.bf16.msra.mxu1 %v4238_v52 }
  0x34   :  { %757 = vmatprep.subr.bf16.mxu0 %v4239_v53  ;;  %950 = vmatprep.subr.bf16.mxu1 %v4241_v54 }
  0x37   :  { %758 = vmatpush1.bf16.msra.mxu0 %v4243_v55  ;;  %951 = vmatpush1.bf16.msra.mxu1 %v4244_v56 }
  0x38   :  { %759 = vmatprep.subr.bf16.mxu0 %v4245_v57  ;;  %952 = vmatprep.subr.bf16.mxu1 %v4247_v58 }
  0x3b   :  { %760 = vmatpush1.bf16.msra.mxu0 %v4249_v59  ;;  %953 = vmatpush1.bf16.msra.mxu1 %v4250_v60 }
  0x3c   :  { %761 = vmatprep.subr.bf16.mxu0 %v4251_v61  ;;  %954 = vmatprep.subr.bf16.mxu1 %v4253_v62 }
  0x3f   :  { %762 = vmatpush1.bf16.msra.mxu0 %v4255_v63  ;;  %955 = vmatpush1.bf16.msra.mxu1 %v4256_v0 }
  0x40   :  { %3903 = vmatprep.subr.bf16.mxu0 %v4287_v1 }
  0x42   :  { %764 = vmatmul.mubr.bf16.vlgmr.msra.gmra.mrb[0].mxu0 %v4585_v2  ;;  %957 = vmatmul.mubr.bf16.vlgmr.msra.gmra.mrb[0].mxu1 %v4585_v2 }
  0x43   :  { %773 = vmatprep.mubr.bf16.mxu0 %v4590_v3  ;;  %966 = vmatprep.mubr.bf16.mxu1 %v4590_v3 }
  0x44   :  { %3904 = vmatpush3.bf16.msra.mxu0 %v4288_v4 }
  0x45   :  { %3905 = vmatprep.subr.bf16.mxu0 %v4292_v5 }
  0x48   :  { %3906 = vmatpush3.bf16.msra.mxu0 %v4293_v6 }
  0x49   :  { %3907 = vmatprep.subr.bf16.mxu0 %v4297_v8 }
  0x4a   :  { %774 = vmatmul.mubr.bf16.gmra.mrb[4].mxu0 %v4608_v7  ;;  %967 = vmatmul.mubr.bf16.gmra.mrb[4].mxu1 %v4608_v7 }
  0x4b   :  { %783 = vmatprep.mubr.bf16.mxu0 %v4616_v9  ;;  %976 = vmatprep.mubr.bf16.mxu1 %v4616_v9 }
  0x4c   :  { %3908 = vmatpush3.bf16.msra.mxu0 %v4298_v10 }
  0x4d   :  { %3909 = vmatprep.subr.bf16.mxu0 %v4302_v11 }
  0x50   :  { %3910 = vmatpush3.bf16.msra.mxu0 %v4303_v12 }
  0x51   :  { %3911 = vmatprep.subr.bf16.mxu0 %v4307_v32 }
  0x52   :  { %784 = vmatmul.mubr.bf16.gmra.mrb[8].mxu0 %v4634_v13  ;;  %977 = vmatmul.mubr.bf16.gmra.mrb[8].mxu1 %v4634_v13 }
  0x53   :  { %793 = vmatprep.mubr.bf16.mxu0 %v4639_v14  ;;  %986 = vmatprep.mubr.bf16.mxu1 %v4639_v14 }
  0x54   :  { %3912 = vmatpush3.bf16.msra.mxu0 %v4308_v34 }
  0x55   :  { %3913 = vmatprep.subr.bf16.mxu0 %v4312_v37 }
  0x58   :  { %3914 = vmatpush3.bf16.msra.mxu0 %v4313_v39 }
  0x59   :  { %3915 = vmatprep.subr.bf16.mxu0 %v4314_v42 }
  0x5a   :  { %794 = vmatmul.mubr.bf16.gmra.mrb[12].mxu0 %v4648_v15  ;;  %987 = vmatmul.mubr.bf16.gmra.mrb[12].mxu1 %v4648_v15 }
  0x5b   :  { %803 = vmatprep.mubr.bf16.mxu0 %v4653_v16  ;;  %996 = vmatprep.mubr.bf16.mxu1 %v4653_v16 }
  0x5c   :  { %3916 = vmatpush3.bf16.msra.mxu0 %v4315_v43 }
  0x5d   :  { %3917 = vmatprep.subr.bf16.mxu0 %v4319_v46 }
  0x60   :  { %3918 = vmatpush3.bf16.msra.mxu0 %v4320_v47 }
  0x62   :  { %804 = vmatmul.mubr.bf16.gmra.mrb[16].mxu0 %v4662_v17  ;;  %997 = vmatmul.mubr.bf16.gmra.mrb[16].mxu1 %v4662_v17 }
  0x63   :  { %1006 = vmatprep.mubr.bf16.mxu1 %v4667_v18  ;;  %813 = vmatprep.mubr.bf16.mxu0 %v4667_v18 }
  0x6a   :  { %1007 = vmatmul.mubr.bf16.gmra.mrb[20].mxu1 %v4676_v19  ;;  %814 = vmatmul.mubr.bf16.gmra.mrb[20].mxu0 %v4676_v19 }
  0x6b   :  { %1016 = vmatprep.mubr.bf16.mxu1 %v4681_v20  ;;  %823 = vmatprep.mubr.bf16.mxu0 %v4681_v20 }
  0x72   :  { %1017 = vmatmul.mubr.bf16.gmra.mrb[24].mxu1 %v4690_v21  ;;  %824 = vmatmul.mubr.bf16.gmra.mrb[24].mxu0 %v4690_v21 }
  0x73   :  { %1026 = vmatprep.mubr.bf16.mxu1 %v4695_v22  ;;  %833 = vmatprep.mubr.bf16.mxu0 %v4695_v22 }
  0x7a   :  { %1027 = vmatmul.mubr.bf16.gmra.mrb[28].mxu1 %v4704_v23  ;;  %834 = vmatmul.mubr.bf16.gmra.mrb[28].mxu0 %v4704_v23 }
  0x7b   :  { %1036 = vmatprep.mubr.bf16.mxu1 %v4709_v24  ;;  %843 = vmatprep.mubr.bf16.mxu0 %v4709_v24 }
  0x82   :  { %1037 = vmatmul.mubr.bf16.gmra.mrb[32].mxu1 %v4718_v25  ;;  %844 = vmatmul.mubr.bf16.gmra.mrb[32].mxu0 %v4718_v25 }
  0x83   :  { %1046 = vmatprep.mubr.bf16.mxu1 %v4723_v26  ;;  %853 = vmatprep.mubr.bf16.mxu0 %v4723_v26 }
  0x8a   :  { %1047 = vmatmul.mubr.bf16.gmra.mrb[36].mxu1 %v4732_v27  ;;  %854 = vmatmul.mubr.bf16.gmra.mrb[36].mxu0 %v4732_v27 }
  0x8b   :  { %1056 = vmatprep.mubr.bf16.mxu1 %v4737_v28  ;;  %863 = vmatprep.mubr.bf16.mxu0 %v4737_v28 }
  0x92   :  { %1057 = vmatmul.mubr.bf16.gmra.mrb[40].mxu1 %v4746_v29  ;;  %864 = vmatmul.mubr.bf16.gmra.mrb[40].mxu0 %v4746_v29 }
  0x93   :  { %1066 = vmatprep.mubr.bf16.mxu1 %v4751_v30  ;;  %873 = vmatprep.mubr.bf16.mxu0 %v4751_v30 }
  0x9a   :  { %1067 = vmatmul.mubr.bf16.gmra.mrb[44].mxu1 %v4760_v31  ;;  %874 = vmatmul.mubr.bf16.gmra.mrb[44].mxu0 %v4760_v31 }
  0x9b   :  { %1076 = vmatprep.mubr.bf16.mxu1 %v4768_v33  ;;  %883 = vmatprep.mubr.bf16.mxu0 %v4768_v33 }
  0xa2   :  { %1077 = vmatmul.mubr.bf16.gmra.mrb[48].mxu1 %v4780_v35  ;;  %884 = vmatmul.mubr.bf16.gmra.mrb[48].mxu0 %v4780_v35 }
  0xa3   :  { %1086 = vmatprep.mubr.bf16.mxu1 %v4785_v36  ;;  %893 = vmatprep.mubr.bf16.mxu0 %v4785_v36 }
  0xaa   :  { %1087 = vmatmul.mubr.bf16.gmra.mrb[52].mxu1 %v4797_v38  ;;  %894 = vmatmul.mubr.bf16.gmra.mrb[52].mxu0 %v4797_v38 }
  0xab   :  { %1096 = vmatprep.mubr.bf16.mxu1 %v4805_v40  ;;  %903 = vmatprep.mubr.bf16.mxu0 %v4805_v40 }
  0xb2   :  { %1097 = vmatmul.mubr.bf16.gmra.mrb[56].mxu1 %v4814_v41  ;;  %904 = vmatmul.mubr.bf16.gmra.mrb[56].mxu0 %v4814_v41 }
  0xb3   :  { %1106 = vmatprep.mubr.bf16.mxu1 %v4827_v44  ;;  %913 = vmatprep.mubr.bf16.mxu0 %v4827_v44 }
  0xba   :  { %1107 = vmatmul.mubr.bf16.gmra.mrb[60].mxu1 %v4832_v45  ;;  %914 = vmatmul.mubr.bf16.gmra.mrb[60].mxu0 %v4832_v45 }
  0xbb   :  { %1149 = vmatprep.mubr.bf16.mxu0 %v4527_v48 }
  0xc2   :  { %1150 = vmatmul.mubr.bf16.vlgmr.msra.gmra.mrb[64].mxu0 %v4585_v2 }
  0xc3   :  { %1157 = vmatprep.mubr.bf16.mxu0 %v4590_v3 }
  0xca   :  { %1158 = vmatmul.mubr.bf16.gmra.mrb[68].mxu0 %v4608_v7 }
  0xcb   :  { %1165 = vmatprep.mubr.bf16.mxu0 %v4616_v9 }
  0xd2   :  { %1166 = vmatmul.mubr.bf16.gmra.mrb[72].mxu0 %v4634_v13 }
  0xd3   :  { %1173 = vmatprep.mubr.bf16.mxu0 %v4639_v14 }
  0xda   :  { %1174 = vmatmul.mubr.bf16.gmra.mrb[76].mxu0 %v4648_v15 }
  0xdb   :  { %1181 = vmatprep.mubr.bf16.mxu0 %v4653_v16 }
  0xe2   :  { %1182 = vmatmul.mubr.bf16.gmra.mrb[80].mxu0 %v4662_v17 }
  0xe3   :  { %1189 = vmatprep.mubr.bf16.mxu0 %v4667_v18 }
  0xea   :  { %1190 = vmatmul.mubr.bf16.gmra.mrb[84].mxu0 %v4676_v19 }
  0xeb   :  { %1197 = vmatprep.mubr.bf16.mxu0 %v4681_v20 }
  0xf2   :  { %1198 = vmatmul.mubr.bf16.gmra.mrb[88].mxu0 %v4690_v21 }
  0xf3   :  { %1205 = vmatprep.mubr.bf16.mxu0 %v4695_v22 }
  0xfa   :  { %1206 = vmatmul.mubr.bf16.gmra.mrb[92].mxu0 %v4704_v23 }
  0xfb   :  { %1213 = vmatprep.mubr.bf16.mxu0 %v4709_v24 }
 0x102   :  { %1214 = vmatmul.mubr.bf16.gmra.mrb[96].mxu0 %v4718_v25 }
 0x103   :  { %1221 = vmatprep.mubr.bf16.mxu0 %v4723_v26 }
 0x10a   :  { %1222 = vmatmul.mubr.bf16.gmra.mrb[100].mxu0 %v4732_v27 }
 0x10b   :  { %1229 = vmatprep.mubr.bf16.mxu0 %v4737_v28 }
 0x112   :  { %1230 = vmatmul.mubr.bf16.gmra.mrb[104].mxu0 %v4746_v29 }
 0x113   :  { %1237 = vmatprep.mubr.bf16.mxu0 %v4751_v30 }
 0x115   :  { %v4865_v48 = vpop.f32.mrb[0].mxu0  ;;  %v4867_v49 = vpop.f32.mrb[0].mxu1 }
 0x116   :  { %7622 = vst [vmem:[#allocation2_spill] sm:$0xff] %v4865_v48  ;;  %7623 = vst [vmem:[#allocation3_spill] sm:$0xff] %v4867_v49  ;;  %v4869_v50 = vpop.f32.mrb[1].mxu1  ;;  %1310 = vrot.lane.b32.xlu0 %v4865_v48, %s4338_s0  ;;  %v4873_v51 = vpop.f32.mrb[1].mxu0 }
 0x117   :  { %7624 = vst [vmem:[#allocation4_spill] sm:$0xff] %v4869_v50  ;;  %7625 = vst [vmem:[#allocation5_spill] sm:$0xff] %v4873_v51  ;;  %v4875_v52 = vpop.f32.mrb[2].mxu0  ;;  %v4877_v53 = vpop.f32.mrb[2].mxu1 }
 0x118   :  { %7626 = vst [vmem:[#allocation6_spill] sm:$0xff] %v4875_v52  ;;  %7627 = vst [vmem:[#allocation7_spill] sm:$0xff] %v4877_v53  ;;  %1824 = vrot.lane.b32.xlu1 %v4877_v53, %s4338_s0  ;;  %v4881_v54 = vpop.f32.mrb[3].mxu0  ;;  %v4883_v55 = vpop.f32.mrb[3].mxu1 }
 0x119   :  { %7628 = vst [vmem:[#allocation8_spill] sm:$0xff] %v4881_v54  ;;  %7629 = vst [vmem:[#allocation9_spill] sm:$0xff] %v4883_v55 }
 0x11a   :  { %1822 = vrot.lane.b32.xlu0 %v4867_v49, %s4338_s0  ;;  %1238 = vmatmul.mubr.bf16.gmra.mrb[108].mxu0 %v4760_v31 }
 0x11b   :  { %1245 = vmatprep.mubr.bf16.mxu0 %v4768_v33 }
 0x11c   :  { %2176 = vrot.lane.b32.xlu1 %v4883_v55, %s4338_s0 }
 0x11d   :  { %v4891_v56 = vpop.f32.mrb[4].mxu0  ;;  %v4893_v57 = vpop.f32.mrb[4].mxu1 }
 0x11e   :  { %7630 = vst [vmem:[#allocation10_spill] sm:$0xff] %v4891_v56  ;;  %7631 = vst [vmem:[#allocation11_spill] sm:$0xff] %v4893_v57  ;;  %2174 = vrot.lane.b32.xlu0 %v4869_v50, %s4338_s0  ;;  %v4897_v58 = vpop.f32.mrb[5].mxu0  ;;  %v4899_v59 = vpop.f32.mrb[5].mxu1 }
 0x11f   :  { %7632 = vst [vmem:[#allocation12_spill] sm:$0xff] %v4897_v58  ;;  %7633 = vst [vmem:[#allocation13_spill] sm:$0xff] %v4899_v59  ;;  %v4901_v60 = vpop.f32.mrb[6].mxu0  ;;  %v4903_v61 = vpop.f32.mrb[6].mxu1 }
 0x120   :  { %7634 = vst [vmem:[#allocation14_spill] sm:$0xff] %v4901_v60  ;;  %7635 = vst [vmem:[#allocation15_spill] sm:$0xff] %v4903_v61  ;;  %1472 = vrot.lane.b32.xlu1 %v4881_v54, %s4338_s0  ;;  %v4907_v62 = vpop.f32.mrb[7].mxu0  ;;  %v4909_v63 = vpop.f32.mrb[7].mxu1 }
 0x121   :  { %7636 = vst [vmem:[#allocation16_spill] sm:$0xff] %v4907_v62  ;;  %7637 = vst [vmem:[#allocation17_spill] sm:$0xff] %v4909_v63 }
 0x122   :  { %1470 = vrot.lane.b32.xlu0 %v4873_v51, %s4338_s0  ;;  %1246 = vmatmul.mubr.bf16.gmra.mrb[112].mxu0 %v4780_v35 }
 0x123   :  { %1253 = vmatprep.mubr.bf16.mxu0 %v4785_v36 }
 0x124   :  { %1314 = vrot.lane.b32.xlu1 %v4891_v56, %s4338_s0 }
 0x125   :  { %v4917_v0 = vpop.f32.mrb[8].mxu0  ;;  %v4919_v1 = vpop.f32.mrb[8].mxu1 }
 0x126   :  { %7638 = vst [vmem:[#allocation18_spill] sm:$0xff] %v4917_v0  ;;  %7639 = vst [vmem:[#allocation19_spill] sm:$0xff] %v4919_v1  ;;  %1312 = vrot.lane.b32.xlu0 %v4875_v52, %s4338_s0  ;;  %v4923_v2 = vpop.f32.mrb[9].mxu0  ;;  %v4925_v3 = vpop.f32.mrb[9].mxu1 }
 0x127   :  { %7640 = vst [vmem:[#allocation20_spill] sm:$0xff] %v4923_v2  ;;  %7641 = vst [vmem:[#allocation21_spill] sm:$0xff] %v4925_v3  ;;  %v4927_v4 = vpop.f32.mrb[10].mxu0  ;;  %v4929_v5 = vpop.f32.mrb[10].mxu1 }
 0x128   :  { %7642 = vst [vmem:[#allocation22_spill] sm:$0xff] %v4927_v4  ;;  %7643 = vst [vmem:[#allocation23_spill] sm:$0xff] %v4929_v5  ;;  %1316 = vrot.lane.b32.xlu1 %v4901_v60, %s4338_s0  ;;  %v4933_v6 = vpop.f32.mrb[11].mxu0  ;;  %v4935_v7 = vpop.f32.mrb[11].mxu1 }
 0x129   :  { %7644 = vst [vmem:[#allocation24_spill] sm:$0xff] %v4933_v6  ;;  %7645 = vst [vmem:[#allocation25_spill] sm:$0xff] %v4935_v7 }
 0x12a   :  { %1826 = vrot.lane.b32.xlu0 %v4893_v57, %s4338_s0  ;;  %1254 = vmatmul.mubr.bf16.gmra.mrb[116].mxu0 %v4797_v38 }
 0x12b   :  { %1261 = vmatprep.mubr.bf16.mxu0 %v4805_v40 }
 0x12c   :  { %1828 = vrot.lane.b32.xlu1 %v4903_v61, %s4338_s0 }
 0x12d   :  { %v4943_v8 = vpop.f32.mrb[12].mxu0  ;;  %v4945_v9 = vpop.f32.mrb[12].mxu1 }
 0x12e   :  { %7646 = vst [vmem:[#allocation26_spill] sm:$0xff] %v4943_v8  ;;  %7647 = vst [vmem:[#allocation27_spill] sm:$0xff] %v4945_v9  ;;  %2178 = vrot.lane.b32.xlu0 %v4899_v59, %s4338_s0  ;;  %v4949_v10 = vpop.f32.mrb[13].mxu0  ;;  %v4951_v11 = vpop.f32.mrb[13].mxu1 }
 0x12f   :  { %7648 = vst [vmem:[#allocation28_spill] sm:$0xff] %v4949_v10  ;;  %7649 = vst [vmem:[#allocation29_spill] sm:$0xff] %v4951_v11  ;;  %v4953_v12 = vpop.f32.mrb[14].mxu0  ;;  %v4955_v13 = vpop.f32.mrb[14].mxu1 }
 0x130   :  { %7650 = vst [vmem:[#allocation30_spill] sm:$0xff] %v4953_v12  ;;  %7651 = vst [vmem:[#allocation31_spill] sm:$0xff] %v4955_v13  ;;  %2180 = vrot.lane.b32.xlu1 %v4909_v63, %s4338_s0  ;;  %v4959_v14 = vpop.f32.mrb[15].mxu0  ;;  %v4961_v15 = vpop.f32.mrb[15].mxu1 }
 0x131   :  { %7652 = vst [vmem:[#allocation32_spill] sm:$0xff] %v4959_v14  ;;  %7653 = vst [vmem:[#allocation33_spill] sm:$0xff] %v4961_v15 }
 0x132   :  { %1474 = vrot.lane.b32.xlu0 %v4897_v58, %s4338_s0  ;;  %1262 = vmatmul.mubr.bf16.gmra.mrb[120].mxu0 %v4814_v41 }
 0x133   :  { %1269 = vmatprep.mubr.bf16.mxu0 %v4827_v44 }
 0x134   :  { %1476 = vrot.lane.b32.xlu1 %v4907_v62, %s4338_s0 }
 0x135   :  { %v4969_v16 = vpop.f32.mrb[16].mxu0  ;;  %v4971_v17 = vpop.f32.mrb[16].mxu1 }
 0x136   :  { %7654 = vst [vmem:[#allocation34_spill] sm:$0xff] %v4969_v16  ;;  %7655 = vst [vmem:[#allocation35_spill] sm:$0xff] %v4971_v17  ;;  %1318 = vrot.lane.b32.xlu0 %v4917_v0, %s4338_s0  ;;  %v4975_v18 = vpop.f32.mrb[17].mxu0  ;;  %v4977_v19 = vpop.f32.mrb[17].mxu1 }
 0x137   :  { %7656 = vst [vmem:[#allocation36_spill] sm:$0xff] %v4975_v18  ;;  %7657 = vst [vmem:[#allocation37_spill] sm:$0xff] %v4977_v19  ;;  %v4979_v20 = vpop.f32.mrb[18].mxu0  ;;  %v4981_v21 = vpop.f32.mrb[18].mxu1 }
 0x138   :  { %7658 = vst [vmem:[#allocation38_spill] sm:$0xff] %v4979_v20  ;;  %7659 = vst [vmem:[#allocation39_spill] sm:$0xff] %v4981_v21  ;;  %1320 = vrot.lane.b32.xlu1 %v4927_v4, %s4338_s0  ;;  %v4985_v22 = vpop.f32.mrb[19].mxu0  ;;  %v4987_v23 = vpop.f32.mrb[19].mxu1 }
 0x139   :  { %7660 = vst [vmem:[#allocation40_spill] sm:$0xff] %v4985_v22  ;;  %7661 = vst [vmem:[#allocation41_spill] sm:$0xff] %v4987_v23 }
 0x13a   :  { %1830 = vrot.lane.b32.xlu0 %v4919_v1, %s4338_s0  ;;  %1270 = vmatmul.mubr.bf16.gmra.mrb[124].mxu0 %v4832_v45 }
 0x13c   :  { %1832 = vrot.lane.b32.xlu1 %v4929_v5, %s4338_s0 }
 0x13d   :  { %v4995_v24 = vpop.f32.mrb[20].mxu1  ;;  %v4997_v25 = vpop.f32.mrb[20].mxu0 }
 0x13e   :  { %7662 = vst [vmem:[#allocation42_spill] sm:$0xff] %v4995_v24  ;;  %7663 = vst [vmem:[#allocation43_spill] sm:$0xff] %v4997_v25  ;;  %2182 = vrot.lane.b32.xlu0 %v4925_v3, %s4338_s0  ;;  %v5001_v26 = vpop.f32.mrb[21].mxu1  ;;  %v5003_v27 = vpop.f32.mrb[21].mxu0 }
 0x13f   :  { %7664 = vst [vmem:[#allocation44_spill] sm:$0xff] %v5001_v26  ;;  %7665 = vst [vmem:[#allocation45_spill] sm:$0xff] %v5003_v27  ;;  %v5005_v28 = vpop.f32.mrb[22].mxu1  ;;  %v5007_v29 = vpop.f32.mrb[22].mxu0 }
 0x140   :  { %7666 = vst [vmem:[#allocation46_spill] sm:$0xff] %v5005_v28  ;;  %7667 = vst [vmem:[#allocation47_spill] sm:$0xff] %v5007_v29  ;;  %2184 = vrot.lane.b32.xlu1 %v4935_v7, %s4338_s0  ;;  %v5011_v30 = vpop.f32.mrb[23].mxu1  ;;  %v5013_v31 = vpop.f32.mrb[23].mxu0 }
 0x141   :  { %7668 = vst [vmem:[#allocation48_spill] sm:$0xff] %v5011_v30  ;;  %7669 = vst [vmem:[#allocation49_spill] sm:$0xff] %v5013_v31 }
 0x142   :  { %1478 = vrot.lane.b32.xlu0 %v4923_v2, %s4338_s0 }
 0x144   :  { %1480 = vrot.lane.b32.xlu1 %v4933_v6, %s4338_s0 }
 0x145   :  { %v5020_v32 = vpop.f32.mrb[24].mxu1  ;;  %v5022_v33 = vpop.f32.mrb[24].mxu0 }
 0x146   :  { %7670 = vst [vmem:[#allocation50_spill] sm:$0xff] %v5020_v32  ;;  %7671 = vst [vmem:[#allocation51_spill] sm:$0xff] %v5022_v33  ;;  %1322 = vrot.lane.b32.xlu0 %v4943_v8, %s4338_s0  ;;  %v5026_v34 = vpop.f32.mrb[25].mxu1  ;;  %v5028_v35 = vpop.f32.mrb[25].mxu0 }
 0x147   :  { %7672 = vst [vmem:[#allocation52_spill] sm:$0xff] %v5026_v34  ;;  %7673 = vst [vmem:[#allocation53_spill] sm:$0xff] %v5028_v35  ;;  %v5030_v36 = vpop.f32.mrb[26].mxu1  ;;  %v5032_v37 = vpop.f32.mrb[26].mxu0 }
 0x148   :  { %7674 = vst [vmem:[#allocation54_spill] sm:$0xff] %v5030_v36  ;;  %7675 = vst [vmem:[#allocation55_spill] sm:$0xff] %v5032_v37  ;;  %1324 = vrot.lane.b32.xlu1 %v4953_v12, %s4338_s0  ;;  %v5036_v38 = vpop.f32.mrb[27].mxu1  ;;  %v5038_v39 = vpop.f32.mrb[27].mxu0 }
 0x149   :  { %7676 = vst [vmem:[#allocation56_spill] sm:$0xff] %v5036_v38  ;;  %7677 = vst [vmem:[#allocation57_spill] sm:$0xff] %v5038_v39 }
 0x14a   :  { %1834 = vrot.lane.b32.xlu0 %v4945_v9, %s4338_s0 }
 0x14c   :  { %1836 = vrot.lane.b32.xlu1 %v4955_v13, %s4338_s0 }
 0x14d   :  { %v5044_v40 = vpop.f32.mrb[28].mxu1  ;;  %v5046_v41 = vpop.f32.mrb[28].mxu0 }
 0x14e   :  { %7678 = vst [vmem:[#allocation58_spill] sm:$0xff] %v5044_v40  ;;  %7679 = vst [vmem:[#allocation59_spill] sm:$0xff] %v5046_v41  ;;  %2186 = vrot.lane.b32.xlu0 %v4951_v11, %s4338_s0  ;;  %v5050_v42 = vpop.f32.mrb[29].mxu1  ;;  %v5052_v43 = vpop.f32.mrb[29].mxu0 }
 0x14f   :  { %7680 = vst [vmem:[#allocation60_spill] sm:$0xff] %v5050_v42  ;;  %7681 = vst [vmem:[#allocation61_spill] sm:$0xff] %v5052_v43  ;;  %v5054_v44 = vpop.f32.mrb[30].mxu1  ;;  %v5056_v45 = vpop.f32.mrb[30].mxu0 }
 0x150   :  { %7682 = vst [vmem:[#allocation62_spill] sm:$0xff] %v5054_v44  ;;  %7683 = vst [vmem:[#allocation63_spill] sm:$0xff] %v5056_v45  ;;  %2188 = vrot.lane.b32.xlu1 %v4961_v15, %s4338_s0  ;;  %v5060_v46 = vpop.f32.mrb[31].mxu1  ;;  %v5062_v47 = vpop.f32.mrb[31].mxu0 }
 0x151   :  { %7684 = vst [vmem:[#allocation64_spill] sm:$0xff] %v5060_v46  ;;  %7685 = vst [vmem:[#allocation65_spill] sm:$0xff] %v5062_v47 }
 0x152   :  { %1482 = vrot.lane.b32.xlu0 %v4949_v10, %s4338_s0 }
 0x154   :  { %1484 = vrot.lane.b32.xlu1 %v4959_v14, %s4338_s0 }
 0x155   :  { %v5068_v6 = vpop.f32.mrb[32].mxu1  ;;  %v5070_v2 = vpop.f32.mrb[32].mxu0 }
 0x156   :  { %7686 = vst [vmem:[#allocation66_spill] sm:$0xff] %v5068_v6  ;;  %7687 = vst [vmem:[#allocation67_spill] sm:$0xff] %v5070_v2  ;;  %1326 = vrot.lane.b32.xlu0 %v4969_v16, %s4338_s0  ;;  %v5074_v62 = vpop.f32.mrb[33].mxu1  ;;  %v5076_v58 = vpop.f32.mrb[33].mxu0 }
 0x157   :  { %7688 = vst [vmem:[#allocation68_spill] sm:$0xff] %v5074_v62  ;;  %7689 = vst [vmem:[#allocation69_spill] sm:$0xff] %v5076_v58  ;;  %v5078_v54 = vpop.f32.mrb[34].mxu1  ;;  %v5080_v51 = vpop.f32.mrb[34].mxu0 }
 0x158   :  { %7690 = vst [vmem:[#allocation70_spill] sm:$0xff] %v5078_v54  ;;  %7691 = vst [vmem:[#allocation71_spill] sm:$0xff] %v5080_v51  ;;  %1328 = vrot.lane.b32.xlu1 %v4979_v20, %s4338_s0  ;;  %v5084_v10 = vpop.f32.mrb[35].mxu1  ;;  %v5086_v14 = vpop.f32.mrb[35].mxu0 }
 0x159   :  { %7692 = vst [vmem:[#allocation72_spill] sm:$0xff] %v5084_v10  ;;  %7693 = vst [vmem:[#allocation73_spill] sm:$0xff] %v5086_v14 }
 0x15a   :  { %1838 = vrot.lane.b32.xlu0 %v4971_v17, %s4338_s0 }
 0x15c   :  { %1840 = vrot.lane.b32.xlu1 %v4981_v21, %s4338_s0 }
 0x15d   :  { %v5092_v16 = vpop.f32.mrb[36].mxu1  ;;  %v5094_v15 = vpop.f32.mrb[36].mxu0 }
 0x15e   :  { %7694 = vst [vmem:[#allocation74_spill] sm:$0xff] %v5092_v16  ;;  %7695 = vst [vmem:[#allocation75_spill] sm:$0xff] %v5094_v15  ;;  %2190 = vrot.lane.b32.xlu0 %v4977_v19, %s4338_s0  ;;  %v5098_v11 = vpop.f32.mrb[37].mxu1  ;;  %v5100_v20 = vpop.f32.mrb[37].mxu0 }
 0x15f   :  { %7696 = vst [vmem:[#allocation76_spill] sm:$0xff] %v5098_v11  ;;  %7697 = vst [vmem:[#allocation77_spill] sm:$0xff] %v5100_v20  ;;  %v5102_v12 = vpop.f32.mrb[38].mxu1  ;;  %v5104_v8 = vpop.f32.mrb[38].mxu0 }
 0x160   :  { %7698 = vst [vmem:[#allocation78_spill] sm:$0xff] %v5102_v12  ;;  %7699 = vst [vmem:[#allocation79_spill] sm:$0xff] %v5104_v8  ;;  %2192 = vrot.lane.b32.xlu1 %v4987_v23, %s4338_s0  ;;  %v5108_v17 = vpop.f32.mrb[39].mxu1  ;;  %v5110_v21 = vpop.f32.mrb[39].mxu0 }
 0x161   :  { %7700 = vst [vmem:[#allocation80_spill] sm:$0xff] %v5108_v17  ;;  %7701 = vst [vmem:[#allocation81_spill] sm:$0xff] %v5110_v21 }
 0x162   :  { %1486 = vrot.lane.b32.xlu0 %v4975_v18, %s4338_s0 }
 0x164   :  { %1488 = vrot.lane.b32.xlu1 %v4985_v22, %s4338_s0 }
 0x165   :  { %v5116_v19 = vpop.f32.mrb[40].mxu1  ;;  %v5118_v13 = vpop.f32.mrb[40].mxu0 }
 0x166   :  { %7702 = vst [vmem:[#allocation82_spill] sm:$0xff] %v5116_v19  ;;  %7703 = vst [vmem:[#allocation83_spill] sm:$0xff] %v5118_v13  ;;  %1842 = vrot.lane.b32.xlu0 %v4995_v24, %s4338_s0  ;;  %v5122_v9 = vpop.f32.mrb[41].mxu1  ;;  %v5124_v23 = vpop.f32.mrb[41].mxu0 }
 0x167   :  { %7704 = vst [vmem:[#allocation84_spill] sm:$0xff] %v5122_v9  ;;  %7705 = vst [vmem:[#allocation85_spill] sm:$0xff] %v5124_v23  ;;  %v5126_v7 = vpop.f32.mrb[42].mxu1  ;;  %v5128_v3 = vpop.f32.mrb[42].mxu0 }
 0x168   :  { %7706 = vst [vmem:[#allocation86_spill] sm:$0xff] %v5126_v7  ;;  %7707 = vst [vmem:[#allocation87_spill] sm:$0xff] %v5128_v3  ;;  %1844 = vrot.lane.b32.xlu1 %v5005_v28, %s4338_s0  ;;  %v5132_v18 = vpop.f32.mrb[43].mxu1  ;;  %v5134_v22 = vpop.f32.mrb[43].mxu0 }
 0x169   :  { %7708 = vst [vmem:[#allocation88_spill] sm:$0xff] %v5132_v18  ;;  %7709 = vst [vmem:[#allocation89_spill] sm:$0xff] %v5134_v22 }
 0x16a   :  { %1330 = vrot.lane.b32.xlu0 %v4997_v25, %s4338_s0 }
 0x16c   :  { %1332 = vrot.lane.b32.xlu1 %v5007_v29, %s4338_s0 }
 0x16d   :  { %v5140_v24 = vpop.f32.mrb[44].mxu1  ;;  %v5142_v4 = vpop.f32.mrb[44].mxu0 }
 0x16e   :  { %7710 = vst [vmem:[#allocation90_spill] sm:$0xff] %v5140_v24  ;;  %7711 = vst [vmem:[#allocation91_spill] sm:$0xff] %v5142_v4  ;;  %2194 = vrot.lane.b32.xlu0 %v5001_v26, %s4338_s0  ;;  %v5146_v0 = vpop.f32.mrb[45].mxu1  ;;  %v5148_v28 = vpop.f32.mrb[45].mxu0 }
 0x16f   :  { %7712 = vst [vmem:[#allocation92_spill] sm:$0xff] %v5146_v0  ;;  %7713 = vst [vmem:[#allocation93_spill] sm:$0xff] %v5148_v28  ;;  %v5150_v5 = vpop.f32.mrb[46].mxu1  ;;  %v5152_v1 = vpop.f32.mrb[46].mxu0 }
 0x170   :  { %7714 = vst [vmem:[#allocation94_spill] sm:$0xff] %v5150_v5  ;;  %7715 = vst [vmem:[#allocation95_spill] sm:$0xff] %v5152_v1  ;;  %2196 = vrot.lane.b32.xlu1 %v5011_v30, %s4338_s0  ;;  %v5156_v25 = vpop.f32.mrb[47].mxu1  ;;  %v5158_v29 = vpop.f32.mrb[47].mxu0 }
 0x171   :  { %7716 = vst [vmem:[#allocation96_spill] sm:$0xff] %v5156_v25  ;;  %7717 = vst [vmem:[#allocation97_spill] sm:$0xff] %v5158_v29 }
 0x172   :  { %1490 = vrot.lane.b32.xlu0 %v5003_v27, %s4338_s0 }
 0x174   :  { %1492 = vrot.lane.b32.xlu1 %v5013_v31, %s4338_s0 }
 0x175   :  { %v5164_v26 = vpop.f32.mrb[48].mxu1  ;;  %v5166_v63 = vpop.f32.mrb[48].mxu0 }
 0x176   :  { %7718 = vst [vmem:[#allocation98_spill] sm:$0xff] %v5164_v26  ;;  %7719 = vst [vmem:[#allocation99_spill] sm:$0xff] %v5166_v63  ;;  %1846 = vrot.lane.b32.xlu0 %v5020_v32, %s4338_s0  ;;  %v5170_v59 = vpop.f32.mrb[49].mxu1  ;;  %v5172_v30 = vpop.f32.mrb[49].mxu0 }
 0x177   :  { %7720 = vst [vmem:[#allocation100_spill] sm:$0xff] %v5170_v59  ;;  %7721 = vst [vmem:[#allocation101_spill] sm:$0xff] %v5172_v30  ;;  %v5174_v60 = vpop.f32.mrb[50].mxu1  ;;  %v5176_v56 = vpop.f32.mrb[50].mxu0 }
 0x178   :  { %7722 = vst [vmem:[#allocation102_spill] sm:$0xff] %v5174_v60  ;;  %7723 = vst [vmem:[#allocation103_spill] sm:$0xff] %v5176_v56  ;;  %1848 = vrot.lane.b32.xlu1 %v5030_v36, %s4338_s0  ;;  %v5180_v27 = vpop.f32.mrb[51].mxu1  ;;  %v5182_v31 = vpop.f32.mrb[51].mxu0 }
 0x179   :  { %7724 = vst [vmem:[#allocation104_spill] sm:$0xff] %v5180_v27  ;;  %7725 = vst [vmem:[#allocation105_spill] sm:$0xff] %v5182_v31 }
 0x17a   :  { %1334 = vrot.lane.b32.xlu0 %v5022_v33, %s4338_s0 }
 0x17c   :  { %1336 = vrot.lane.b32.xlu1 %v5032_v37, %s4338_s0 }
 0x17d   :  { %v5188_v32 = vpop.f32.mrb[52].mxu1  ;;  %v5190_v61 = vpop.f32.mrb[52].mxu0 }
 0x17e   :  { %7726 = vst [vmem:[#allocation106_spill] sm:$0xff] %v5188_v32  ;;  %7727 = vst [vmem:[#allocation107_spill] sm:$0xff] %v5190_v61  ;;  %2198 = vrot.lane.b32.xlu0 %v5026_v34, %s4338_s0  ;;  %v5194_v57 = vpop.f32.mrb[53].mxu1  ;;  %v5196_v36 = vpop.f32.mrb[53].mxu0 }
 0x17f   :  { %7728 = vst [vmem:[#allocation108_spill] sm:$0xff] %v5194_v57  ;;  %7729 = vst [vmem:[#allocation109_spill] sm:$0xff] %v5196_v36  ;;  %v5198_v55 = vpop.f32.mrb[54].mxu1  ;;  %v5200_v50 = vpop.f32.mrb[54].mxu0 }
 0x180   :  { %7730 = vst [vmem:[#allocation110_spill] sm:$0xff] %v5198_v55  ;;  %7731 = vst [vmem:[#allocation111_spill] sm:$0xff] %v5200_v50  ;;  %2200 = vrot.lane.b32.xlu1 %v5036_v38, %s4338_s0  ;;  %v5204_v33 = vpop.f32.mrb[55].mxu1  ;;  %v5206_v37 = vpop.f32.mrb[55].mxu0 }
 0x181   :  { %7732 = vst [vmem:[#allocation112_spill] sm:$0xff] %v5204_v33  ;;  %7733 = vst [vmem:[#allocation113_spill] sm:$0xff] %v5206_v37 }
 0x182   :  { %1494 = vrot.lane.b32.xlu0 %v5028_v35, %s4338_s0 }
 0x184   :  { %1496 = vrot.lane.b32.xlu1 %v5038_v39, %s4338_s0 }
 0x185   :  { %v5212_v34 = vpop.f32.mrb[56].mxu1  ;;  %v5214_v52 = vpop.f32.mrb[56].mxu0 }
 0x186   :  { %7734 = vst [vmem:[#allocation114_spill] sm:$0xff] %v5212_v34  ;;  %7735 = vst [vmem:[#allocation115_spill] sm:$0xff] %v5214_v52  ;;  %1850 = vrot.lane.b32.xlu0 %v5044_v40, %s4338_s0  ;;  %v5218_v48 = vpop.f32.mrb[57].mxu1  ;;  %v5220_v38 = vpop.f32.mrb[57].mxu0 }
 0x187   :  { %7736 = vst [vmem:[#allocation116_spill] sm:$0xff] %v5218_v48  ;;  %7737 = vst [vmem:[#allocation117_spill] sm:$0xff] %v5220_v38  ;;  %v5222_v53 = vpop.f32.mrb[58].mxu1  ;;  %v5224_v49 = vpop.f32.mrb[58].mxu0 }
 0x188   :  { %7738 = vst [vmem:[#allocation118_spill] sm:$0xff] %v5222_v53  ;;  %7739 = vst [vmem:[#allocation119_spill] sm:$0xff] %v5224_v49  ;;  %v5226_v37 = vpop.permute.xlu0 %1310  ;;  %1852 = vrot.lane.b32.xlu1 %v5054_v44, %s4338_s0  ;;  %v5230_v39 = vpop.f32.mrb[59].mxu1 }
 0x189   :  { %7740 = vst [vmem:[#allocation120_spill] sm:$0xff] %v5226_v37  ;;  %7741 = vst [vmem:[#allocation121_spill] sm:$0xff] %v5230_v39  ;;  %v5232_v35 = vpop.f32.mrb[59].mxu0 }
 0x18a   :  { %7742 = vst [vmem:[#allocation122_spill] sm:$0xff] %v5232_v35  ;;  %v5234_v52 = vpop.permute.xlu1 %1824  ;;  %1338 = vrot.lane.b32.xlu0 %v5046_v41, %s4338_s0 }
 0x18b   :  { %7743 = vst [vmem:[#allocation123_spill] sm:$0xff] %v5234_v52 }
 0x18c   :  { %v5238_v40 = vpop.permute.xlu0 %1822  ;;  %1340 = vrot.lane.b32.xlu1 %v5056_v45, %s4338_s0 }
 0x18d   :  { %7744 = vst [vmem:[#allocation124_spill] sm:$0xff] %v5238_v40  ;;  %v5246_v44 = vpop.f32.mrb[60].mxu1  ;;  %v5262_v45 = vpop.f32.mrb[60].mxu0 }
 0x18e   :  { %v5242_v38 = vpop.permute.xlu1 %2176  ;;  %2202 = vrot.lane.b32.xlu0 %v5050_v42, %s4338_s0  ;;  %7746 = vst [vmem:[#allocation126_spill] sm:$0xff] %v5246_v44  ;;  %v5248_v37 = vpop.f32.mrb[61].mxu1  ;;  %7752 = vst [vmem:[#allocation132_spill] sm:$0xff] %v5262_v45 }
 0x18f   :  { %7745 = vst [vmem:[#allocation125_spill] sm:$0xff] %v5242_v38  ;;  %7747 = vst [vmem:[#allocation127_spill] sm:$0xff] %v5248_v37  ;;  %v5254_v41 = vpop.f32.mrb[62].mxu1  ;;  %v5264_v42 = vpop.f32.mrb[61].mxu0 }
 0x190   :  { %v5250_v35 = vpop.permute.xlu0 %2174  ;;  %2204 = vrot.lane.b32.xlu1 %v5060_v46, %s4338_s0  ;;  %7749 = vst [vmem:[#allocation129_spill] sm:$0xff] %v5254_v41  ;;  %v5256_v52 = vpop.f32.mrb[63].mxu1  ;;  %7753 = vst [vmem:[#allocation133_spill] sm:$0xff] %v5264_v42 }
 0x191   :  { %7748 = vst [vmem:[#allocation128_spill] sm:$0xff] %v5250_v35  ;;  %7750 = vst [vmem:[#allocation130_spill] sm:$0xff] %v5256_v52  ;;  %v5270_v37 = vpop.f32.mrb[62].mxu0 }
 0x192   :  { %v5258_v40 = vpop.permute.xlu1 %1472  ;;  %1498 = vrot.lane.b32.xlu0 %v5052_v43, %s4338_s0  ;;  %7755 = vst [vmem:[#allocation135_spill] sm:$0xff] %v5270_v37  ;;  %v5272_v46 = vpop.f32.mrb[63].mxu0 }
 0x193   :  { %7751 = vst [vmem:[#allocation131_spill] sm:$0xff] %v5258_v40  ;;  %7756 = vst [vmem:[#allocation136_spill] sm:$0xff] %v5272_v46 }
 0x194   :  { %v5266_v44 = vpop.permute.xlu0 %1470  ;;  %1500 = vrot.lane.b32.xlu1 %v5062_v47, %s4338_s0 }
 0x195   :  { %7754 = vst [vmem:[#allocation134_spill] sm:$0xff] %v5266_v44 }
 0x196   :  { %v5274_v41 = vpop.permute.xlu1 %1314  ;;  %1854 = vrot.lane.b32.xlu0 %v5068_v6, %s4338_s0 }
 0x198   :  { %v5278_v40 = vpop.permute.xlu0 %1312  ;;  %1856 = vrot.lane.b32.xlu1 %v5078_v54, %s4338_s0 }
 0x19a   :  { %v5282_v43 = vpop.permute.xlu1 %1316  ;;  %1342 = vrot.lane.b32.xlu0 %v5070_v2, %s4338_s0 }
 0x19b   :  { %7757 = vst [vmem:[#allocation137_spill] sm:$0xff] %v5282_v43 }
 0x19c   :  { %v5286_v47 = vpop.permute.xlu0 %1826  ;;  %1344 = vrot.lane.b32.xlu1 %v5080_v51, %s4338_s0 }
 0x19e   :  { %v5290_v44 = vpop.permute.xlu1 %1828  ;;  %2206 = vrot.lane.b32.xlu0 %v5074_v62, %s4338_s0  ;;  %v3919_v62 = vpop.f32.mrb[64].mxu0 }
 0x1a0   :  { %v5294_v6 = vpop.permute.xlu0 %2178  ;;  %2208 = vrot.lane.b32.xlu1 %v5084_v10, %s4338_s0  ;;  %v3920_v10 = vpop.f32.mrb[65].mxu0 }
 0x1a1   :  { %7758 = vst [vmem:[#allocation138_spill] sm:$0xff] %v5294_v6 }
 0x1a2   :  { %v5298_v54 = vpop.permute.xlu1 %2180  ;;  %1502 = vrot.lane.b32.xlu0 %v5076_v58, %s4338_s0  ;;  %v3922_v58 = vpop.f32.mrb[66].mxu0 }
 0x1a3   :  { %7759 = vst [vmem:[#allocation139_spill] sm:$0xff] %v5298_v54  ;;  %v5314_v54 = vadd.f32 %v3920_v10, %v3919_v62 }
 0x1a4   :  { %v5302_v2 = vpop.permute.xlu0 %1474  ;;  %1504 = vrot.lane.b32.xlu1 %v5086_v14, %s4338_s0  ;;  %v3923_v14 = vpop.f32.mrb[67].mxu0 }
 0x1a5   :  { %7760 = vst [vmem:[#allocation140_spill] sm:$0xff] %v5302_v2 }
 0x1a6   :  { %v5306_v51 = vpop.permute.xlu1 %1476  ;;  %1858 = vrot.lane.b32.xlu0 %v5092_v16, %s4338_s0 }
 0x1a7   :  { %7761 = vst [vmem:[#allocation141_spill] sm:$0xff] %v5306_v51  ;;  %v5320_v51 = vadd.f32 %v3923_v14, %v3922_v58 }
 0x1a8   :  { %v5310_v6 = vpop.permute.xlu0 %1318  ;;  %1860 = vrot.lane.b32.xlu1 %v5102_v12, %s4338_s0 }
 0x1aa   :  { %v5316_v43 = vpop.permute.xlu1 %1320  ;;  %1346 = vrot.lane.b32.xlu0 %v5094_v15, %s4338_s0 }
 0x1ac   :  { %v5322_v2 = vpop.permute.xlu0 %1830  ;;  %1348 = vrot.lane.b32.xlu1 %v5104_v8, %s4338_s0 }
 0x1ae   :  { %v5326_v16 = vpop.permute.xlu1 %1832  ;;  %2210 = vrot.lane.b32.xlu0 %v5098_v11, %s4338_s0 }
 0x1b0   :  { %v5330_v62 = vpop.permute.xlu0 %2182  ;;  %2212 = vrot.lane.b32.xlu1 %v5108_v17, %s4338_s0 }
 0x1b1   :  { %7762 = vst [vmem:[#allocation142_spill] sm:$0xff] %v5330_v62 }
 0x1b2   :  { %v5334_v10 = vpop.permute.xlu1 %2184  ;;  %1506 = vrot.lane.b32.xlu0 %v5100_v20, %s4338_s0  ;;  %v3925_v20 = vpop.f32.mrb[68].mxu0 }
 0x1b3   :  { %7763 = vst [vmem:[#allocation143_spill] sm:$0xff] %v5334_v10 }
 0x1b4   :  { %v5338_v58 = vpop.permute.xlu0 %1478  ;;  %1508 = vrot.lane.b32.xlu1 %v5110_v21, %s4338_s0  ;;  %v3926_v21 = vpop.f32.mrb[69].mxu0 }
 0x1b5   :  { %7764 = vst [vmem:[#allocation144_spill] sm:$0xff] %v5338_v58  ;;  %v5358_v15 = vadd.f32 %v3926_v21, %v3925_v20 }
 0x1b6   :  { %v5342_v14 = vpop.permute.xlu1 %1480  ;;  %1862 = vrot.lane.b32.xlu0 %v5116_v19, %s4338_s0  ;;  %v3928_v19 = vpop.f32.mrb[70].mxu0 }
 0x1b7   :  { %7765 = vst [vmem:[#allocation145_spill] sm:$0xff] %v5342_v14 }
 0x1b8   :  { %v5346_v11 = vpop.permute.xlu0 %1322  ;;  %1864 = vrot.lane.b32.xlu1 %v5126_v7, %s4338_s0  ;;  %v3929_v7 = vpop.f32.mrb[71].mxu0 }
 0x1b9   :  { %v5364_v14 = vadd.f32 %v3929_v7, %v3928_v19 }
 0x1ba   :  { %v5350_v17 = vpop.permute.xlu1 %1324  ;;  %1350 = vrot.lane.b32.xlu0 %v5118_v13, %s4338_s0 }
 0x1bc   :  { %v5354_v8 = vpop.permute.xlu0 %1834  ;;  %1352 = vrot.lane.b32.xlu1 %v5128_v3, %s4338_s0 }
 0x1be   :  { %v5360_v12 = vpop.permute.xlu1 %1836  ;;  %2214 = vrot.lane.b32.xlu0 %v5122_v9, %s4338_s0 }
 0x1c0   :  { %v5366_v58 = vpop.permute.xlu0 %2186  ;;  %2216 = vrot.lane.b32.xlu1 %v5132_v18, %s4338_s0 }
 0x1c1   :  { %7766 = vst [vmem:[#allocation146_spill] sm:$0xff] %v5366_v58 }
 0x1c2   :  { %v5370_v13 = vpop.permute.xlu1 %2188  ;;  %1510 = vrot.lane.b32.xlu0 %v5124_v23, %s4338_s0 }
 0x1c3   :  { %7767 = vst [vmem:[#allocation147_spill] sm:$0xff] %v5370_v13 }
 0x1c4   :  { %v5374_v20 = vpop.permute.xlu0 %1482  ;;  %1512 = vrot.lane.b32.xlu1 %v5134_v22, %s4338_s0 }
 0x1c5   :  { %7768 = vst [vmem:[#allocation148_spill] sm:$0xff] %v5374_v20 }
 0x1c6   :  { %v5378_v21 = vpop.permute.xlu1 %1484  ;;  %1866 = vrot.lane.b32.xlu0 %v5140_v24, %s4338_s0  ;;  %v3931_v24 = vpop.f32.mrb[72].mxu0 }
 0x1c7   :  { %7769 = vst [vmem:[#allocation149_spill] sm:$0xff] %v5378_v21 }
 0x1c8   :  { %v5382_v7 = vpop.permute.xlu0 %1326  ;;  %1868 = vrot.lane.b32.xlu1 %v5150_v5, %s4338_s0  ;;  %v3932_v5 = vpop.f32.mrb[73].mxu0 }
 0x1c9   :  { %v5402_v9 = vadd.f32 %v3932_v5, %v3931_v24 }
 0x1ca   :  { %v5386_v19 = vpop.permute.xlu1 %1328  ;;  %1354 = vrot.lane.b32.xlu0 %v5142_v4, %s4338_s0  ;;  %v3934_v4 = vpop.f32.mrb[74].mxu0 }
 0x1cc   :  { %v5390_v23 = vpop.permute.xlu0 %1838  ;;  %1356 = vrot.lane.b32.xlu1 %v5152_v1, %s4338_s0  ;;  %v3935_v1 = vpop.f32.mrb[75].mxu0 }
 0x1cd   :  { %v5408_v21 = vadd.f32 %v3935_v1, %v3934_v4 }
 0x1ce   :  { %v5394_v22 = vpop.permute.xlu1 %1840  ;;  %2218 = vrot.lane.b32.xlu0 %v5146_v0, %s4338_s0 }
 0x1d0   :  { %v5398_v18 = vpop.permute.xlu0 %2190  ;;  %2220 = vrot.lane.b32.xlu1 %v5156_v25, %s4338_s0 }
 0x1d1   :  { %7770 = vst [vmem:[#allocation150_spill] sm:$0xff] %v5398_v18 }
 0x1d2   :  { %v5404_v3 = vpop.permute.xlu1 %2192  ;;  %1514 = vrot.lane.b32.xlu0 %v5148_v28, %s4338_s0 }
 0x1d3   :  { %7771 = vst [vmem:[#allocation151_spill] sm:$0xff] %v5404_v3 }
 0x1d4   :  { %v5410_v20 = vpop.permute.xlu0 %1486  ;;  %1516 = vrot.lane.b32.xlu1 %v5158_v29, %s4338_s0 }
 0x1d5   :  { %7772 = vst [vmem:[#allocation152_spill] sm:$0xff] %v5410_v20 }
 0x1d6   :  { %v5414_v0 = vpop.permute.xlu1 %1488  ;;  %1870 = vrot.lane.b32.xlu0 %v5164_v26, %s4338_s0 }
 0x1d7   :  { %7773 = vst [vmem:[#allocation153_spill] sm:$0xff] %v5414_v0 }
 0x1d8   :  { %v5418_v5 = vpop.permute.xlu0 %1842  ;;  %1872 = vrot.lane.b32.xlu1 %v5174_v60, %s4338_s0 }
 0x1da   :  { %v5422_v24 = vpop.permute.xlu1 %1844  ;;  %1358 = vrot.lane.b32.xlu0 %v5166_v63, %s4338_s0  ;;  %v3937_v63 = vpop.f32.mrb[76].mxu0 }
 0x1dc   :  { %v5426_v1 = vpop.permute.xlu0 %1330  ;;  %1360 = vrot.lane.b32.xlu1 %v5176_v56, %s4338_s0  ;;  %v3938_v56 = vpop.f32.mrb[77].mxu0 }
 0x1dd   :  { %v5446_v26 = vadd.f32 %v3938_v56, %v3937_v63 }
 0x1de   :  { %v5430_v4 = vpop.permute.xlu1 %1332  ;;  %2222 = vrot.lane.b32.xlu0 %v5170_v59, %s4338_s0  ;;  %v3940_v59 = vpop.f32.mrb[78].mxu0 }
 0x1e0   :  { %v5434_v29 = vpop.permute.xlu0 %2194  ;;  %2224 = vrot.lane.b32.xlu1 %v5180_v27, %s4338_s0  ;;  %v3941_v27 = vpop.f32.mrb[79].mxu0 }
 0x1e1   :  { %7774 = vst [vmem:[#allocation154_spill] sm:$0xff] %v5434_v29  ;;  %v5452_v0 = vadd.f32 %v3941_v27, %v3940_v59 }
 0x1e2   :  { %v5438_v28 = vpop.permute.xlu1 %2196  ;;  %1518 = vrot.lane.b32.xlu0 %v5172_v30, %s4338_s0 }
 0x1e3   :  { %7775 = vst [vmem:[#allocation155_spill] sm:$0xff] %v5438_v28 }
 0x1e4   :  { %v5442_v60 = vpop.permute.xlu0 %1490  ;;  %1520 = vrot.lane.b32.xlu1 %v5182_v31, %s4338_s0 }
 0x1e5   :  { %7776 = vst [vmem:[#allocation156_spill] sm:$0xff] %v5442_v60 }
 0x1e6   :  { %v5448_v25 = vpop.permute.xlu1 %1492  ;;  %1874 = vrot.lane.b32.xlu0 %v5188_v32, %s4338_s0 }
 0x1e7   :  { %7777 = vst [vmem:[#allocation157_spill] sm:$0xff] %v5448_v25 }
 0x1e8   :  { %v5454_v20 = vpop.permute.xlu0 %1846  ;;  %1876 = vrot.lane.b32.xlu1 %v5198_v55, %s4338_s0 }
 0x1ea   :  { %v5458_v30 = vpop.permute.xlu1 %1848  ;;  %1362 = vrot.lane.b32.xlu0 %v5190_v61, %s4338_s0  ;;  %v7781_v61 = vld [vmem:[#allocation113_spill] sm:$0xff] }
 0x1ec   :  { %v5462_v56 = vpop.permute.xlu0 %1334  ;;  %1364 = vrot.lane.b32.xlu1 %v5200_v50, %s4338_s0 }
 0x1ee   :  { %v5466_v63 = vpop.permute.xlu1 %1336  ;;  %2226 = vrot.lane.b32.xlu0 %v5194_v57, %s4338_s0  ;;  %v3943_v57 = vpop.f32.mrb[80].mxu0 }
 0x1f0   :  { %v5470_v59 = vpop.permute.xlu0 %2198  ;;  %2228 = vrot.lane.b32.xlu1 %v5204_v33, %s4338_s0  ;;  %v3944_v33 = vpop.f32.mrb[81].mxu0 }
 0x1f1   :  { %7778 = vst [vmem:[#allocation158_spill] sm:$0xff] %v5470_v59  ;;  %v3946_v32 = vpop.f32.mrb[82].mxu0 }
 0x1f2   :  { %v5474_v27 = vpop.permute.xlu1 %2200  ;;  %1522 = vrot.lane.b32.xlu0 %v5196_v36, %s4338_s0  ;;  %v7785_v36 = vld [vmem:[#allocation115_spill] sm:$0xff] }
 0x1f3   :  { %7779 = vst [vmem:[#allocation159_spill] sm:$0xff] %v5474_v27 }
 0x1f4   :  { %v5478_v31 = vpop.permute.xlu0 %1494  ;;  %1524 = vrot.lane.b32.xlu1 %v7781_v61, %s4338_s0  ;;  %v5494_v61 = vadd.f32 %v3944_v33, %v3943_v57  ;;  %v7790_v57 = vld [vmem:[#allocation117_spill] sm:$0xff] }
 0x1f5   :  { %7780 = vst [vmem:[#allocation160_spill] sm:$0xff] %v5478_v31  ;;  %v3947_v31 = vpop.f32.mrb[83].mxu0 }
 0x1f6   :  { %v5482_v50 = vpop.permute.xlu1 %1496  ;;  %1878 = vrot.lane.b32.xlu0 %v5212_v34, %s4338_s0 }
 0x1f7   :  { %7782 = vst [vmem:[#allocation161_spill] sm:$0xff] %v5482_v50  ;;  %v5496_v50 = vadd.f32 %v3947_v31, %v3946_v32  ;;  %v7791_v31 = vld [vmem:[#allocation124_spill] sm:$0xff]  ;;  %v7792_v32 = vld [vmem:[#allocation3_spill] sm:$0xff] }
 0x1f8   :  { %v5486_v55 = vpop.permute.xlu0 %1850  ;;  %1880 = vrot.lane.b32.xlu1 %v5222_v53, %s4338_s0  ;;  %v1918_v33 = vmax.f32 %v7792_v32, %v7791_v31  ;;  %v7802_v31 = vld [vmem:[#allocation6_spill] sm:$0xff] }
 0x1f9   :  { %7783 = vst [vmem:[#allocation162_spill] sm:$0xff] %v5486_v55 }
 0x1fa   :  { %v5490_v25 = vpop.permute.xlu1 %1852  ;;  %1366 = vrot.lane.b32.xlu0 %v7785_v36, %s4338_s0 }
 0x1fb   :  { %7784 = vst [vmem:[#allocation163_spill] sm:$0xff] %v5490_v25 }
 0x1fc   :  { %v5498_v60 = vpop.permute.xlu0 %1338  ;;  %1368 = vrot.lane.b32.xlu1 %v5224_v49, %s4338_s0  ;;  %v7794_v49 = vld [vmem:[#allocation122_spill] sm:$0xff] }
 0x1fd   :  { %7786 = vst [vmem:[#allocation164_spill] sm:$0xff] %v5498_v60 }
 0x1fe   :  { %v5502_v34 = vpop.permute.xlu1 %1340  ;;  %2230 = vrot.lane.b32.xlu0 %v5218_v48, %s4338_s0  ;;  %v7796_v48 = vld [vmem:[#allocation7_spill] sm:$0xff] }
 0x1ff   :  { %7787 = vst [vmem:[#allocation165_spill] sm:$0xff] %v5502_v34  ;;  %v7795_v34 = vld [vmem:[#allocation123_spill] sm:$0xff] }
 0x200   :  { %v5506_v53 = vpop.permute.xlu0 %2202  ;;  %2232 = vrot.lane.b32.xlu1 %v5230_v39, %s4338_s0  ;;  %v1919_v25 = vmax.f32 %v7796_v48, %v7795_v34  ;;  %v7798_v39 = vld [vmem:[#allocation120_spill] sm:$0xff]  ;;  %v3949_v34 = vpop.f32.mrb[84].mxu0 }
 0x201   :  { %7788 = vst [vmem:[#allocation166_spill] sm:$0xff] %v5506_v53 }
 0x202   :  { %v5510_v36 = vpop.permute.xlu1 %2204  ;;  %1526 = vrot.lane.b32.xlu0 %v7790_v57, %s4338_s0 }
 0x203   :  { %7789 = vst [vmem:[#allocation167_spill] sm:$0xff] %v5510_v36  ;;  %v7799_v36 = vld [vmem:[#allocation2_spill] sm:$0xff] }
 0x204   :  { %v5516_v60 = vpop.permute.xlu0 %1498  ;;  %1528 = vrot.lane.b32.xlu1 %v7794_v49, %s4338_s0  ;;  %v5527_v55 = vmax.f32 %v7799_v36, %v7798_v39  ;;  %v3950_v36 = vpop.f32.mrb[85].mxu0 }
 0x205   :  { %7793 = vst [vmem:[#allocation124_spill] sm:$0xff] %v5516_v60  ;;  %v5534_v60 = vmax.f32 %v7802_v31, %v5278_v40  ;;  %v3952_v39 = vpop.f32.mrb[86].mxu0  ;;  %v7806_v40 = vld [vmem:[#allocation9_spill] sm:$0xff] }
 0x206   :  { %v5522_v53 = vpop.permute.xlu1 %1500  ;;  %1982 = vrot.lane.b32.xlu0 %v1918_v33, %s4339_s1  ;;  %7800 = vst [vmem:[#allocation123_spill] sm:$0xff] %v5527_v55  ;;  %v7805_v33 = vld [vmem:[#allocation4_spill] sm:$0xff]  ;;  %v2303_v31 = vmax.f32 %v7806_v40, %v5242_v38  ;;  %v7811_v40 = vld [vmem:[#allocation129_spill] sm:$0xff] }
 0x207   :  { %7797 = vst [vmem:[#allocation3_spill] sm:$0xff] %v5522_v53  ;;  %7803 = vst [vmem:[#allocation120_spill] sm:$0xff] %v5534_v60  ;;  %v2302_v53 = vmax.f32 %v7805_v33, %v5250_v35 }
 0x208   :  { %v5529_v57 = vpop.permute.xlu0 %1854  ;;  %1984 = vrot.lane.b32.xlu1 %v1919_v25, %s4339_s1  ;;  %v5546_v25 = vadd.f32 %v3950_v36, %v3949_v34  ;;  %v7809_v34 = vld [vmem:[#allocation126_spill] sm:$0xff] }
 0x209   :  { %7801 = vst [vmem:[#allocation7_spill] sm:$0xff] %v5529_v57 }
 0x20a   :  { %v5536_v49 = vpop.permute.xlu1 %1856  ;;  %1630 = vrot.lane.b32.xlu0 %v5527_v55, %s4339_s1  ;;  %v3953_v55 = vpop.f32.mrb[87].mxu0 }
 0x20b   :  { %7804 = vst [vmem:[#allocation2_spill] sm:$0xff] %v5536_v49  ;;  %v5553_v57 = vadd.f32 %v3953_v55, %v3952_v39  ;;  %v7815_v39 = vld [vmem:[#allocation127_spill] sm:$0xff] }
 0x20c   :  { %v5542_v27 = vpop.permute.xlu0 %1342  ;;  %1632 = vrot.lane.b32.xlu1 %v5534_v60, %s4339_s1 }
 0x20e   :  { %v5550_v49 = vpop.permute.xlu1 %1344  ;;  %2366 = vrot.lane.b32.xlu0 %v2302_v53, %s4339_s1 }
 0x210   :  { %v5555_v33 = vpop.permute.xlu0 %2206  ;;  %2368 = vrot.lane.b32.xlu1 %v2303_v31, %s4339_s1 }
 0x211   :  { %7807 = vst [vmem:[#allocation6_spill] sm:$0xff] %v5555_v33 }
 0x212   :  { %v5558_v35 = vpop.permute.xlu1 %2208  ;;  %1882 = vrot.lane.b32.xlu0 %v7809_v34, %s4338_s0 }
 0x213   :  { %7808 = vst [vmem:[#allocation168_spill] sm:$0xff] %v5558_v35 }
 0x214   :  { %v5562_v36 = vpop.permute.xlu0 %1502  ;;  %1884 = vrot.lane.b32.xlu1 %v7811_v40, %s4338_s0 }
 0x215   :  { %7810 = vst [vmem:[#allocation169_spill] sm:$0xff] %v5562_v36 }
 0x216   :  { %v5566_v60 = vpop.permute.xlu1 %1504  ;;  %1370 = vrot.lane.b32.xlu0 %v5262_v45, %s4338_s0  ;;  %v3955_v45 = vpop.f32.mrb[88].mxu0 }
 0x217   :  { %7812 = vst [vmem:[#allocation170_spill] sm:$0xff] %v5566_v60  ;;  %v7818_v60 = vld [vmem:[#allocation11_spill] sm:$0xff] }
 0x218   :  { %v5570_v53 = vpop.permute.xlu0 %1858  ;;  %1372 = vrot.lane.b32.xlu1 %v5270_v37, %s4338_s0  ;;  %v1920_v40 = vmax.f32 %v7818_v60, %v5286_v47  ;;  %v7822_v47 = vld [vmem:[#allocation10_spill] sm:$0xff] }
 0x219   :  { %7813 = vst [vmem:[#allocation171_spill] sm:$0xff] %v5570_v53 }
 0x21a   :  { %v5574_v55 = vpop.permute.xlu1 %1860  ;;  %2234 = vrot.lane.b32.xlu0 %v7815_v39, %s4338_s0  ;;  %v3956_v39 = vpop.f32.mrb[89].mxu0 }
 0x21b   :  { %7814 = vst [vmem:[#allocation172_spill] sm:$0xff] %v5574_v55  ;;  %v5592_v34 = vadd.f32 %v3956_v39, %v3955_v45  ;;  %v3958_v38 = vpop.f32.mrb[90].mxu0  ;;  %v7825_v45 = vld [vmem:[#allocation137_spill] sm:$0xff]  ;;  %v7826_v39 = vld [vmem:[#allocation14_spill] sm:$0xff] }
 0x21c   :  { %v5578_v31 = vpop.permute.xlu0 %1346  ;;  %2236 = vrot.lane.b32.xlu1 %v5256_v52, %s4338_s0  ;;  %v7820_v52 = vld [vmem:[#allocation15_spill] sm:$0xff] }
 0x21d   :  { %7816 = vst [vmem:[#allocation173_spill] sm:$0xff] %v5578_v31  ;;  %v1921_v31 = vmax.f32 %v7820_v52, %v5290_v44 }
 0x21e   :  { %v5582_v36 = vpop.permute.xlu1 %1348  ;;  %1530 = vrot.lane.b32.xlu0 %v5264_v42, %s4338_s0  ;;  %v3959_v42 = vpop.f32.mrb[91].mxu0 }
 0x21f   :  { %7817 = vst [vmem:[#allocation174_spill] sm:$0xff] %v5582_v36  ;;  %v5599_v55 = vadd.f32 %v3959_v42, %v3958_v38  ;;  %v7830_v38 = vld [vmem:[#allocation13_spill] sm:$0xff] }
 0x220   :  { %v5588_v37 = vpop.permute.xlu0 %2210  ;;  %1532 = vrot.lane.b32.xlu1 %v5272_v46, %s4338_s0  ;;  %v5610_v46 = vmax.f32 %v7826_v39, %v7825_v45 }
 0x221   :  { %7819 = vst [vmem:[#allocation11_spill] sm:$0xff] %v5588_v37  ;;  %v5603_v37 = vmax.f32 %v7822_v47, %v5274_v41  ;;  %v7831_v41 = vld [vmem:[#allocation139_spill] sm:$0xff]  ;;  %v7832_v47 = vld [vmem:[#allocation17_spill] sm:$0xff] }
 0x222   :  { %v5596_v36 = vpop.permute.xlu1 %2212  ;;  %1986 = vrot.lane.b32.xlu0 %v1920_v40, %s4339_s1  ;;  %7827 = vst [vmem:[#allocation137_spill] sm:$0xff] %v5610_v46  ;;  %v7829_v40 = vld [vmem:[#allocation138_spill] sm:$0xff] }
 0x223   :  { %7821 = vst [vmem:[#allocation15_spill] sm:$0xff] %v5596_v36  ;;  %7823 = vst [vmem:[#allocation10_spill] sm:$0xff] %v5603_v37  ;;  %v2304_v42 = vmax.f32 %v7830_v38, %v7829_v40 }
 0x224   :  { %v5605_v53 = vpop.permute.xlu0 %1506  ;;  %1988 = vrot.lane.b32.xlu1 %v1921_v31, %s4339_s1  ;;  %v2305_v31 = vmax.f32 %v7832_v47, %v7831_v41  ;;  %v7838_v47 = vld [vmem:[#allocation19_spill] sm:$0xff] }
 0x225   :  { %7824 = vst [vmem:[#allocation175_spill] sm:$0xff] %v5605_v53 }
 0x226   :  { %v5612_v44 = vpop.permute.xlu1 %1508  ;;  %1634 = vrot.lane.b32.xlu0 %v5603_v37, %s4339_s1  ;;  %v1922_v37 = vmax.f32 %v7838_v47, %v5322_v2  ;;  %v7842_v2 = vld [vmem:[#allocation18_spill] sm:$0xff] }
 0x227   :  { %7828 = vst [vmem:[#allocation14_spill] sm:$0xff] %v5612_v44 }
 0x228   :  { %v5618_v36 = vpop.permute.xlu0 %1862  ;;  %1636 = vrot.lane.b32.xlu1 %v5610_v46, %s4339_s1 }
 0x22a   :  { %v5624_v53 = vpop.permute.xlu1 %1864  ;;  %2370 = vrot.lane.b32.xlu0 %v2304_v42, %s4339_s1  ;;  %v3961_v42 = vpop.f32.mrb[92].mxu0 }
 0x22b   :  { %7833 = vst [vmem:[#allocation176_spill] sm:$0xff] %v5624_v53  ;;  %v3962_v44 = vpop.f32.mrb[93].mxu0 }
 0x22c   :  { %v5627_v45 = vpop.permute.xlu0 %1350  ;;  %2372 = vrot.lane.b32.xlu1 %v2305_v31, %s4339_s1  ;;  %v5648_v41 = vadd.f32 %v3962_v44, %v3961_v42  ;;  %v3964_v40 = vpop.f32.mrb[94].mxu0 }
 0x22d   :  { %7834 = vst [vmem:[#allocation177_spill] sm:$0xff] %v5627_v45 }
 0x22e   :  { %v5630_v39 = vpop.permute.xlu1 %1352  ;;  %2526 = vrot.lane.b32.xlu0 %v5314_v54, %s4338_s0 }
 0x22f   :  { %7835 = vst [vmem:[#allocation178_spill] sm:$0xff] %v5630_v39 }
 0x230   :  { %v5634_v38 = vpop.permute.xlu0 %2214  ;;  %2528 = vrot.lane.b32.xlu1 %v5320_v51, %s4338_s0 }
 0x231   :  { %7836 = vst [vmem:[#allocation179_spill] sm:$0xff] %v5634_v38  ;;  %v7840_v38 = vld [vmem:[#allocation23_spill] sm:$0xff] }
 0x232   :  { %v5638_v46 = vpop.permute.xlu1 %2216  ;;  %2654 = vrot.lane.b32.xlu0 %v5314_v54, %s4339_s1  ;;  %v1923_v39 = vmax.f32 %v7840_v38, %v5326_v16  ;;  %v3965_v54 = vpop.f32.mrb[95].mxu0 }
 0x233   :  { %7837 = vst [vmem:[#allocation180_spill] sm:$0xff] %v5638_v46  ;;  %v5655_v45 = vadd.f32 %v3965_v54, %v3964_v40 }
 0x234   :  { %v5644_v31 = vpop.permute.xlu0 %1510  ;;  %2656 = vrot.lane.b32.xlu1 %v5320_v51, %s4339_s1  ;;  %v7844_v51 = vld [vmem:[#allocation22_spill] sm:$0xff] }
 0x235   :  { %7839 = vst [vmem:[#allocation19_spill] sm:$0xff] %v5644_v31  ;;  %v5659_v31 = vmax.f32 %v7842_v2, %v5310_v6  ;;  %v5666_v44 = vmax.f32 %v7844_v51, %v5316_v43  ;;  %v7847_v6 = vld [vmem:[#allocation25_spill] sm:$0xff] }
 0x236   :  { %v5652_v46 = vpop.permute.xlu1 %1512  ;;  %1990 = vrot.lane.b32.xlu0 %v1922_v37, %s4339_s1  ;;  %v7846_v37 = vld [vmem:[#allocation21_spill] sm:$0xff] }
 0x237   :  { %7841 = vst [vmem:[#allocation23_spill] sm:$0xff] %v5652_v46  ;;  %7843 = vst [vmem:[#allocation18_spill] sm:$0xff] %v5659_v31  ;;  %v2306_v40 = vmax.f32 %v7846_v37, %v5330_v62 }
 0x238   :  { %v5661_v53 = vpop.permute.xlu0 %1866  ;;  %1992 = vrot.lane.b32.xlu1 %v1923_v39, %s4339_s1  ;;  %7845 = vst [vmem:[#allocation22_spill] sm:$0xff] %v5666_v44  ;;  %v2307_v39 = vmax.f32 %v7847_v6, %v5334_v10  ;;  %v7852_v6 = vld [vmem:[#allocation27_spill] sm:$0xff] }
 0x239   :  { %v7854_v10 = vld [vmem:[#allocation31_spill] sm:$0xff] }
 0x23a   :  { %v5668_v16 = vpop.permute.xlu1 %1868  ;;  %1638 = vrot.lane.b32.xlu0 %v5659_v31, %s4339_s1  ;;  %v1925_v62 = vmax.f32 %v7854_v10, %v5360_v12 }
 0x23c   :  { %v5674_v42 = vpop.permute.xlu0 %1354  ;;  %1640 = vrot.lane.b32.xlu1 %v5666_v44, %s4339_s1  ;;  %v1924_v44 = vmax.f32 %v7852_v6, %v5354_v8  ;;  %v7855_v8 = vld [vmem:[#allocation26_spill] sm:$0xff] }
 0x23e   :  { %v5680_v54 = vpop.permute.xlu1 %1356  ;;  %2374 = vrot.lane.b32.xlu0 %v2306_v40, %s4339_s1  ;;  %v3967_v40 = vpop.f32.mrb[96].mxu0 }
 0x23f   :  { %v3968_v31 = vpop.f32.mrb[97].mxu0 }
 0x240   :  { %v5683_v43 = vpop.permute.xlu0 %2218  ;;  %2376 = vrot.lane.b32.xlu1 %v2307_v39, %s4339_s1  ;;  %v5704_v46 = vadd.f32 %v3968_v31, %v3967_v40 }
 0x241   :  { %7848 = vst [vmem:[#allocation181_spill] sm:$0xff] %v5683_v43 }
 0x242   :  { %v5686_v2 = vpop.permute.xlu1 %2220  ;;  %2530 = vrot.lane.b32.xlu0 %v5358_v15, %s4338_s0 }
 0x243   :  { %7849 = vst [vmem:[#allocation182_spill] sm:$0xff] %v5686_v2 }
 0x244   :  { %v5690_v51 = vpop.permute.xlu0 %1514  ;;  %2532 = vrot.lane.b32.xlu1 %v5364_v14, %s4338_s0 }
 0x245   :  { %7850 = vst [vmem:[#allocation183_spill] sm:$0xff] %v5690_v51  ;;  %v3970_v51 = vpop.f32.mrb[98].mxu0 }
 0x246   :  { %v5694_v37 = vpop.permute.xlu1 %1516  ;;  %2658 = vrot.lane.b32.xlu0 %v5358_v15, %s4339_s1  ;;  %v3971_v15 = vpop.f32.mrb[99].mxu0 }
 0x247   :  { %7851 = vst [vmem:[#allocation184_spill] sm:$0xff] %v5694_v37  ;;  %v5711_v2 = vadd.f32 %v3971_v15, %v3970_v51 }
 0x248   :  { %v5700_v39 = vpop.permute.xlu0 %1870  ;;  %2660 = vrot.lane.b32.xlu1 %v5364_v14, %s4339_s1  ;;  %v7858_v14 = vld [vmem:[#allocation30_spill] sm:$0xff] }
 0x249   :  { %7853 = vst [vmem:[#allocation27_spill] sm:$0xff] %v5700_v39  ;;  %v5715_v39 = vmax.f32 %v7855_v8, %v5346_v11  ;;  %v5722_v31 = vmax.f32 %v7858_v14, %v5350_v17  ;;  %v7863_v11 = vld [vmem:[#allocation33_spill] sm:$0xff] }
 0x24a   :  { %v5708_v37 = vpop.permute.xlu1 %1872  ;;  %1994 = vrot.lane.b32.xlu0 %v1924_v44, %s4339_s1  ;;  %v7861_v44 = vld [vmem:[#allocation29_spill] sm:$0xff] }
 0x24b   :  { %7856 = vst [vmem:[#allocation31_spill] sm:$0xff] %v5715_v39  ;;  %7859 = vst [vmem:[#allocation30_spill] sm:$0xff] %v5722_v31  ;;  %v2308_v51 = vmax.f32 %v7861_v44, %v5366_v58 }
 0x24c   :  { %v5717_v43 = vpop.permute.xlu0 %1358  ;;  %1996 = vrot.lane.b32.xlu1 %v1925_v62, %s4339_s1  ;;  %v2309_v62 = vmax.f32 %v7863_v11, %v5370_v13  ;;  %v7868_v11 = vld [vmem:[#allocation35_spill] sm:$0xff] }
 0x24d   :  { %7857 = vst [vmem:[#allocation26_spill] sm:$0xff] %v5717_v43 }
 0x24e   :  { %v5724_v12 = vpop.permute.xlu1 %1360  ;;  %1642 = vrot.lane.b32.xlu0 %v5715_v39, %s4339_s1 }
 0x24f   :  { %7860 = vst [vmem:[#allocation185_spill] sm:$0xff] %v5724_v12  ;;  %v7870_v12 = vld [vmem:[#allocation39_spill] sm:$0xff] }
 0x250   :  { %v5730_v40 = vpop.permute.xlu0 %2222  ;;  %1644 = vrot.lane.b32.xlu1 %v5722_v31, %s4339_s1  ;;  %v1926_v31 = vmax.f32 %v7868_v11, %v5390_v23  ;;  %v1927_v43 = vmax.f32 %v7870_v12, %v5394_v22  ;;  %v7872_v23 = vld [vmem:[#allocation34_spill] sm:$0xff] }
 0x251   :  { %7862 = vst [vmem:[#allocation186_spill] sm:$0xff] %v5730_v40 }
 0x252   :  { %v5736_v15 = vpop.permute.xlu1 %2224  ;;  %2378 = vrot.lane.b32.xlu0 %v2308_v51, %s4339_s1  ;;  %v3973_v51 = vpop.f32.mrb[100].mxu0 }
 0x253   :  { %7864 = vst [vmem:[#allocation187_spill] sm:$0xff] %v5736_v15  ;;  %v3974_v39 = vpop.f32.mrb[101].mxu0 }
 0x254   :  { %v5739_v17 = vpop.permute.xlu0 %1518  ;;  %2380 = vrot.lane.b32.xlu1 %v2309_v62, %s4339_s1 }
 0x255   :  { %7865 = vst [vmem:[#allocation188_spill] sm:$0xff] %v5739_v17  ;;  %v3976_v17 = vpop.f32.mrb[102].mxu0 }
 0x256   :  { %v5742_v8 = vpop.permute.xlu1 %1520  ;;  %2534 = vrot.lane.b32.xlu0 %v5402_v9, %s4338_s0 }
 0x257   :  { %7866 = vst [vmem:[#allocation189_spill] sm:$0xff] %v5742_v8  ;;  %v5760_v8 = vadd.f32 %v3974_v39, %v3973_v51 }
 0x258   :  { %v5746_v14 = vpop.permute.xlu0 %1874  ;;  %2536 = vrot.lane.b32.xlu1 %v5408_v21, %s4338_s0 }
 0x25a   :  { %v5750_v44 = vpop.permute.xlu1 %1876  ;;  %2662 = vrot.lane.b32.xlu0 %v5402_v9, %s4339_s1  ;;  %v3977_v9 = vpop.f32.mrb[103].mxu0 }
 0x25b   :  { %7867 = vst [vmem:[#allocation190_spill] sm:$0xff] %v5750_v44  ;;  %v5767_v58 = vadd.f32 %v3977_v9, %v3976_v17 }
 0x25c   :  { %v5756_v62 = vpop.permute.xlu0 %1362  ;;  %2664 = vrot.lane.b32.xlu1 %v5408_v21, %s4339_s1  ;;  %v7875_v21 = vld [vmem:[#allocation38_spill] sm:$0xff] }
 0x25d   :  { %7869 = vst [vmem:[#allocation35_spill] sm:$0xff] %v5756_v62  ;;  %v5771_v62 = vmax.f32 %v7872_v23, %v5382_v7  ;;  %v5778_v39 = vmax.f32 %v7875_v21, %v5386_v19  ;;  %v7880_v7 = vld [vmem:[#allocation41_spill] sm:$0xff] }
 0x25e   :  { %v5764_v13 = vpop.permute.xlu1 %1364  ;;  %1998 = vrot.lane.b32.xlu0 %v1926_v31, %s4339_s1  ;;  %v7878_v31 = vld [vmem:[#allocation37_spill] sm:$0xff] }
 0x25f   :  { %7871 = vst [vmem:[#allocation39_spill] sm:$0xff] %v5764_v13  ;;  %7873 = vst [vmem:[#allocation34_spill] sm:$0xff] %v5771_v62  ;;  %v2310_v17 = vmax.f32 %v7878_v31, %v5398_v18  ;;  %v7895_v13 = vld [vmem:[#allocation5_spill] sm:$0xff] }
 0x260   :  { %v5773_v44 = vpop.permute.xlu0 %2226  ;;  %2000 = vrot.lane.b32.xlu1 %v1927_v43, %s4339_s1  ;;  %7876 = vst [vmem:[#allocation38_spill] sm:$0xff] %v5778_v39  ;;  %v2311_v43 = vmax.f32 %v7880_v7, %v5404_v3 }
 0x261   :  { %7874 = vst [vmem:[#allocation191_spill] sm:$0xff] %v5773_v44 }
 0x262   :  { %v5780_v22 = vpop.permute.xlu1 %2228  ;;  %1646 = vrot.lane.b32.xlu0 %v5771_v62, %s4339_s1 }
 0x263   :  { %7877 = vst [vmem:[#allocation192_spill] sm:$0xff] %v5780_v22 }
 0x264   :  { %v5786_v51 = vpop.permute.xlu0 %1522  ;;  %1648 = vrot.lane.b32.xlu1 %v5778_v39, %s4339_s1 }
 0x265   :  { %7879 = vst [vmem:[#allocation193_spill] sm:$0xff] %v5786_v51 }
 0x266   :  { %v5792_v9 = vpop.permute.xlu1 %1524  ;;  %2382 = vrot.lane.b32.xlu0 %v2310_v17, %s4339_s1  ;;  %v7884_v17 = vld [vmem:[#allocation42_spill] sm:$0xff] }
 0x267   :  { %7881 = vst [vmem:[#allocation194_spill] sm:$0xff] %v5792_v9  ;;  %v1928_v7 = vmax.f32 %v7884_v17, %v5418_v5  ;;  %v7891_v5 = vld [vmem:[#allocation47_spill] sm:$0xff] }
 0x268   :  { %v5795_v19 = vpop.permute.xlu0 %1878  ;;  %2384 = vrot.lane.b32.xlu1 %v2311_v43, %s4339_s1  ;;  %v7886_v43 = vld [vmem:[#allocation46_spill] sm:$0xff]  ;;  %v5830_v51 = vmax.f32 %v7891_v5, %v5430_v4 }
 0x269   :  { %v1929_v62 = vmax.f32 %v7886_v43, %v5422_v24  ;;  %v7894_v24 = vld [vmem:[#allocation134_spill] sm:$0xff] }
 0x26a   :  { %v5798_v23 = vpop.permute.xlu1 %1880  ;;  %2538 = vrot.lane.b32.xlu0 %v5446_v26, %s4338_s0  ;;  %7892 = vst [vmem:[#allocation47_spill] sm:$0xff] %v5830_v51 }
 0x26c   :  { %v5802_v21 = vpop.permute.xlu0 %1366  ;;  %2540 = vrot.lane.b32.xlu1 %v5452_v0, %s4338_s0 }
 0x26d   :  { %7882 = vst [vmem:[#allocation195_spill] sm:$0xff] %v5802_v21 }
 0x26e   :  { %v5806_v31 = vpop.permute.xlu1 %1368  ;;  %2666 = vrot.lane.b32.xlu0 %v5446_v26, %s4339_s1 }
 0x26f   :  { %7883 = vst [vmem:[#allocation196_spill] sm:$0xff] %v5806_v31  ;;  %v7888_v31 = vld [vmem:[#allocation43_spill] sm:$0xff] }
 0x270   :  { %v5812_v39 = vpop.permute.xlu0 %2230  ;;  %2668 = vrot.lane.b32.xlu1 %v5452_v0, %s4339_s1  ;;  %v5823_v9 = vmax.f32 %v7888_v31, %v5426_v1  ;;  %v7897_v1 = vld [vmem:[#allocation44_spill] sm:$0xff] }
 0x271   :  { %7885 = vst [vmem:[#allocation42_spill] sm:$0xff] %v5812_v39  ;;  %v2312_v31 = vmax.f32 %v7897_v1, %v5434_v29 }
 0x272   :  { %v5818_v21 = vpop.permute.xlu1 %2232  ;;  %2002 = vrot.lane.b32.xlu0 %v1928_v7, %s4339_s1  ;;  %7889 = vst [vmem:[#allocation43_spill] sm:$0xff] %v5823_v9  ;;  %v5838_v7 = vmax.f32 %v7895_v13, %v7894_v24 }
 0x273   :  { %7887 = vst [vmem:[#allocation46_spill] sm:$0xff] %v5818_v21 }
 0x274   :  { %v5825_v26 = vpop.permute.xlu0 %1526  ;;  %2004 = vrot.lane.b32.xlu1 %v1929_v62, %s4339_s1  ;;  %7896 = vst [vmem:[#allocation134_spill] sm:$0xff] %v5838_v7  ;;  %v7898_v62 = vld [vmem:[#allocation131_spill] sm:$0xff] }
 0x275   :  { %7890 = vst [vmem:[#allocation197_spill] sm:$0xff] %v5825_v26  ;;  %v7899_v26 = vld [vmem:[#allocation8_spill] sm:$0xff] }
 0x276   :  { %v5832_v0 = vpop.permute.xlu1 %1528  ;;  %1650 = vrot.lane.b32.xlu0 %v5823_v9, %s4339_s1  ;;  %v5846_v4 = vmax.f32 %v7899_v26, %v7898_v62 }
 0x277   :  { %7893 = vst [vmem:[#allocation198_spill] sm:$0xff] %v5832_v0  ;;  %v7901_v0 = vld [vmem:[#allocation48_spill] sm:$0xff] }
 0x278   :  { %v1983_v3 = vpop.permute.xlu0 %1982  ;;  %1652 = vrot.lane.b32.xlu1 %v5830_v51, %s4339_s1  ;;  %7900 = vst [vmem:[#allocation5_spill] sm:$0xff] %v5846_v4  ;;  %v2313_v9 = vmax.f32 %v7901_v0, %v5438_v28 }
 0x279   :  { %v2078_v5 = vmax.f32 %v5838_v7, %v1983_v3 }
 0x27a   :  { %v1985_v18 = vpop.permute.xlu1 %1984  ;;  %2386 = vrot.lane.b32.xlu0 %v2312_v31, %s4339_s1 }
 0x27b   :  { %v5853_v13 = vmax.f32 %v2078_v5, %v7792_v32  ;;  %v2079_v24 = vmax.f32 %v5846_v4, %v1985_v18  ;;  %v7904_v18 = vld [vmem:[#allocation50_spill] sm:$0xff]  ;;  %v7906_v4 = vld [vmem:[#allocation51_spill] sm:$0xff] }
 0x27c   :  { %v5856_v1 = vpop.permute.xlu0 %1630  ;;  %2388 = vrot.lane.b32.xlu1 %v2313_v9, %s4339_s1  ;;  %v1930_v9 = vmax.f32 %v7904_v18, %v5454_v20  ;;  %v5887_v7 = vmax.f32 %v7906_v4, %v5462_v56  ;;  %v7909_v20 = vld [vmem:[#allocation55_spill] sm:$0xff]  ;;  %v7914_v4 = vld [vmem:[#allocation56_spill] sm:$0xff] }
 0x27d   :  { %7902 = vst [vmem:[#allocation131_spill] sm:$0xff] %v5856_v1  ;;  %v5860_v26 = vmax.f32 %v2079_v24, %v7796_v48  ;;  %v7905_v24 = vld [vmem:[#allocation54_spill] sm:$0xff]  ;;  %v7913_v56 = vld [vmem:[#allocation159_spill] sm:$0xff] }
 0x27e   :  { %v5862_v62 = vpop.permute.xlu1 %1632  ;;  %2542 = vrot.lane.b32.xlu0 %v5494_v61, %s4338_s0  ;;  %v1931_v0 = vmax.f32 %v7905_v24, %v5458_v30  ;;  %7907 = vst [vmem:[#allocation50_spill] sm:$0xff] %v5887_v7  ;;  %v7912_v30 = vld [vmem:[#allocation52_spill] sm:$0xff] }
 0x27f   :  { %7903 = vst [vmem:[#allocation8_spill] sm:$0xff] %v5862_v62  ;;  %v5894_v62 = vmax.f32 %v7909_v20, %v5466_v63 }
 0x280   :  { %v5866_v3 = vpop.permute.xlu0 %2366  ;;  %2544 = vrot.lane.b32.xlu1 %v5496_v50, %s4338_s0 }
 0x281   :  { %7910 = vst [vmem:[#allocation51_spill] sm:$0xff] %v5894_v62 }
 0x282   :  { %v5870_v31 = vpop.permute.xlu1 %2368  ;;  %2670 = vrot.lane.b32.xlu0 %v5494_v61, %s4339_s1 }
 0x284   :  { %v5876_v5 = vpop.permute.xlu0 %1882  ;;  %2672 = vrot.lane.b32.xlu1 %v5496_v50, %s4339_s1 }
 0x286   :  { %v5882_v51 = vpop.permute.xlu1 %1884  ;;  %2006 = vrot.lane.b32.xlu0 %v1930_v9, %s4339_s1  ;;  %v2314_v9 = vmax.f32 %v7912_v30, %v5470_v59  ;;  %v7917_v30 = vld [vmem:[#allocation140_spill] sm:$0xff]  ;;  %v7925_v59 = vld [vmem:[#allocation58_spill] sm:$0xff] }
 0x288   :  { %v5889_v61 = vpop.permute.xlu0 %1370  ;;  %2008 = vrot.lane.b32.xlu1 %v1931_v0, %s4339_s1  ;;  %v2315_v0 = vmax.f32 %v7914_v4, %v7913_v56  ;;  %v7920_v4 = vld [vmem:[#allocation141_spill] sm:$0xff]  ;;  %v7921_v56 = vld [vmem:[#allocation16_spill] sm:$0xff] }
 0x289   :  { %7908 = vst [vmem:[#allocation54_spill] sm:$0xff] %v5889_v61 }
 0x28a   :  { %v5896_v50 = vpop.permute.xlu1 %1372  ;;  %1654 = vrot.lane.b32.xlu0 %v5887_v7, %s4339_s1  ;;  %v7918_v7 = vld [vmem:[#allocation12_spill] sm:$0xff] }
 0x28b   :  { %7911 = vst [vmem:[#allocation55_spill] sm:$0xff] %v5896_v50  ;;  %v5920_v50 = vmax.f32 %v7918_v7, %v7917_v30  ;;  %v7924_v30 = vld [vmem:[#allocation162_spill] sm:$0xff] }
 0x28c   :  { %v5902_v1 = vpop.permute.xlu0 %2234  ;;  %1656 = vrot.lane.b32.xlu1 %v5894_v62, %s4339_s1  ;;  %v1932_v28 = vmax.f32 %v7925_v59, %v7924_v30 }
 0x28d   :  { %7919 = vst [vmem:[#allocation140_spill] sm:$0xff] %v5920_v50 }
 0x28e   :  { %v5908_v61 = vpop.permute.xlu1 %2236  ;;  %2390 = vrot.lane.b32.xlu0 %v2314_v9, %s4339_s1  ;;  %v5926_v9 = vmax.f32 %v7921_v56, %v7920_v4  ;;  %v7929_v4 = vld [vmem:[#allocation62_spill] sm:$0xff] }
 0x290   :  { %v5911_v63 = vpop.permute.xlu0 %1530  ;;  %2392 = vrot.lane.b32.xlu1 %v2315_v0, %s4339_s1  ;;  %7922 = vst [vmem:[#allocation12_spill] sm:$0xff] %v5926_v9 }
 0x291   :  { %7915 = vst [vmem:[#allocation199_spill] sm:$0xff] %v5911_v63 }
 0x292   :  { %v5914_v20 = vpop.permute.xlu1 %1532  ;;  %2546 = vrot.lane.b32.xlu0 %v5546_v25, %s4338_s0 }
 0x293   :  { %7916 = vst [vmem:[#allocation200_spill] sm:$0xff] %v5914_v20 }
 0x294   :  { %v1987_v62 = vpop.permute.xlu0 %1986  ;;  %2548 = vrot.lane.b32.xlu1 %v5553_v57, %s4338_s0 }
 0x295   :  { %v2080_v63 = vmax.f32 %v5920_v50, %v1987_v62  ;;  %v7928_v62 = vld [vmem:[#allocation163_spill] sm:$0xff] }
 0x296   :  { %v1989_v0 = vpop.permute.xlu1 %1988  ;;  %2674 = vrot.lane.b32.xlu0 %v5546_v25, %s4339_s1  ;;  %v1933_v50 = vmax.f32 %v7929_v4, %v7928_v62  ;;  %v7939_v62 = vld [vmem:[#allocation166_spill] sm:$0xff] }
 0x297   :  { %v5932_v20 = vmax.f32 %v2080_v63, %v7818_v60  ;;  %v2081_v7 = vmax.f32 %v5926_v9, %v1989_v0  ;;  %v7931_v63 = vld [vmem:[#allocation164_spill] sm:$0xff]  ;;  %v7932_v0 = vld [vmem:[#allocation59_spill] sm:$0xff] }
 0x298   :  { %v5937_v29 = vpop.permute.xlu0 %1634  ;;  %2676 = vrot.lane.b32.xlu1 %v5553_v57, %s4339_s1  ;;  %v5951_v9 = vmax.f32 %v7932_v0, %v7931_v63  ;;  %v7936_v57 = vld [vmem:[#allocation63_spill] sm:$0xff] }
 0x299   :  { %7923 = vst [vmem:[#allocation141_spill] sm:$0xff] %v5932_v20  ;;  %7926 = vst [vmem:[#allocation16_spill] sm:$0xff] %v5937_v29  ;;  %v5942_v56 = vmax.f32 %v2081_v7, %v7820_v52  ;;  %v7935_v29 = vld [vmem:[#allocation165_spill] sm:$0xff]  ;;  %v7942_v0 = vld [vmem:[#allocation167_spill] sm:$0xff] }
 0x29a   :  { %v5946_v25 = vpop.permute.xlu1 %1636  ;;  %2010 = vrot.lane.b32.xlu0 %v1932_v28, %s4339_s1  ;;  %7933 = vst [vmem:[#allocation163_spill] sm:$0xff] %v5951_v9  ;;  %v5958_v20 = vmax.f32 %v7936_v57, %v7935_v29 }
 0x29b   :  { %7927 = vst [vmem:[#allocation162_spill] sm:$0xff] %v5942_v56  ;;  %7930 = vst [vmem:[#allocation58_spill] sm:$0xff] %v5946_v25  ;;  %v7940_v25 = vld [vmem:[#allocation60_spill] sm:$0xff] }
 0x29c   :  { %v5953_v30 = vpop.permute.xlu0 %2370  ;;  %2012 = vrot.lane.b32.xlu1 %v1933_v50, %s4339_s1  ;;  %7937 = vst [vmem:[#allocation164_spill] sm:$0xff] %v5958_v20  ;;  %v2316_v28 = vmax.f32 %v7940_v25, %v7939_v62  ;;  %v7943_v56 = vld [vmem:[#allocation64_spill] sm:$0xff] }
 0x29d   :  { %7934 = vst [vmem:[#allocation62_spill] sm:$0xff] %v5953_v30  ;;  %v2317_v50 = vmax.f32 %v7943_v56, %v7942_v0  ;;  %v7947_v25 = vld [vmem:[#allocation144_spill] sm:$0xff]  ;;  %v7954_v0 = vld [vmem:[#allocation66_spill] sm:$0xff] }
 0x29e   :  { %v5960_v7 = vpop.permute.xlu1 %2372  ;;  %1658 = vrot.lane.b32.xlu0 %v5951_v9, %s4339_s1 }
 0x29f   :  { %7938 = vst [vmem:[#allocation59_spill] sm:$0xff] %v5960_v7 }
 0x2a0   :  { %1660 = vrot.lane.b32.xlu1 %v5958_v20, %s4339_s1  ;;  %v5968_v63 = vpop.permute.xlu0 %2526  ;;  %v7948_v20 = vld [vmem:[#allocation20_spill] sm:$0xff] }
 0x2a1   :  { %7941 = vst [vmem:[#allocation165_spill] sm:$0xff] %v5968_v63  ;;  %v5984_v9 = vmax.f32 %v7948_v20, %v7947_v25  ;;  %v7951_v63 = vld [vmem:[#allocation24_spill] sm:$0xff]  ;;  %v7953_v25 = vld [vmem:[#allocation7_spill] sm:$0xff] }
 0x2a2   :  { %v5972_v30 = vpop.permute.xlu1 %2528  ;;  %2394 = vrot.lane.b32.xlu0 %v2316_v28, %s4339_s1  ;;  %v1934_v62 = vmax.f32 %v7954_v0, %v7953_v25 }
 0x2a3   :  { %7944 = vst [vmem:[#allocation63_spill] sm:$0xff] %v5972_v30  ;;  %7949 = vst [vmem:[#allocation144_spill] sm:$0xff] %v5984_v9  ;;  %v7950_v30 = vld [vmem:[#allocation145_spill] sm:$0xff] }
 0x2a4   :  { %2396 = vrot.lane.b32.xlu1 %v2317_v50, %s4339_s1  ;;  %v5976_v29 = vpop.permute.xlu0 %2654  ;;  %v5990_v28 = vmax.f32 %v7951_v63, %v7950_v30  ;;  %v7957_v63 = vld [vmem:[#allocation70_spill] sm:$0xff] }
 0x2a5   :  { %7945 = vst [vmem:[#allocation201_spill] sm:$0xff] %v5976_v29 }
 0x2a6   :  { %v5978_v57 = vpop.permute.xlu1 %2656  ;;  %2550 = vrot.lane.b32.xlu0 %v5592_v34, %s4338_s0  ;;  %7952 = vst [vmem:[#allocation20_spill] sm:$0xff] %v5990_v28 }
 0x2a7   :  { %7946 = vst [vmem:[#allocation202_spill] sm:$0xff] %v5978_v57 }
 0x2a8   :  { %2552 = vrot.lane.b32.xlu1 %v5599_v55, %s4338_s0  ;;  %v1991_v56 = vpop.permute.xlu0 %1990 }
 0x2a9   :  { %v2082_v50 = vmax.f32 %v5984_v9, %v1991_v56  ;;  %v7956_v56 = vld [vmem:[#allocation2_spill] sm:$0xff] }
 0x2aa   :  { %v1993_v29 = vpop.permute.xlu1 %1992  ;;  %2678 = vrot.lane.b32.xlu0 %v5592_v34, %s4339_s1  ;;  %v1935_v9 = vmax.f32 %v7957_v63, %v7956_v56  ;;  %v7963_v56 = vld [vmem:[#allocation68_spill] sm:$0xff] }
 0x2ab   :  { %v5996_v57 = vmax.f32 %v2082_v50, %v7838_v47  ;;  %v2083_v20 = vmax.f32 %v5990_v28, %v1993_v29  ;;  %v7959_v29 = vld [vmem:[#allocation67_spill] sm:$0xff] }
 0x2ac   :  { %2680 = vrot.lane.b32.xlu1 %v5599_v55, %s4339_s1  ;;  %v6003_v7 = vpop.permute.xlu0 %1638  ;;  %v6015_v50 = vmax.f32 %v7959_v29, %v5542_v27  ;;  %v7961_v55 = vld [vmem:[#allocation71_spill] sm:$0xff] }
 0x2ad   :  { %7955 = vst [vmem:[#allocation145_spill] sm:$0xff] %v6003_v7  ;;  %v6006_v30 = vmax.f32 %v2083_v20, %v7840_v38  ;;  %v6022_v28 = vmax.f32 %v7961_v55, %v5550_v49  ;;  %v7972_v7 = vld [vmem:[#allocation149_spill] sm:$0xff] }
 0x2ae   :  { %v6010_v34 = vpop.permute.xlu1 %1640  ;;  %2014 = vrot.lane.b32.xlu0 %v1934_v62, %s4339_s1  ;;  %7960 = vst [vmem:[#allocation7_spill] sm:$0xff] %v6015_v50  ;;  %v2318_v62 = vmax.f32 %v7963_v56, %v5555_v33  ;;  %v7969_v56 = vld [vmem:[#allocation148_spill] sm:$0xff] }
 0x2af   :  { %7958 = vst [vmem:[#allocation24_spill] sm:$0xff] %v6010_v34  ;;  %7962 = vst [vmem:[#allocation66_spill] sm:$0xff] %v6022_v28 }
 0x2b0   :  { %2016 = vrot.lane.b32.xlu1 %v1935_v9, %s4339_s1  ;;  %v6018_v25 = vpop.permute.xlu0 %2374  ;;  %v7965_v9 = vld [vmem:[#allocation72_spill] sm:$0xff] }
 0x2b1   :  { %v2319_v29 = vmax.f32 %v7965_v9, %v5558_v35 }
 0x2b2   :  { %v6024_v20 = vpop.permute.xlu1 %2376  ;;  %1662 = vrot.lane.b32.xlu0 %v6015_v50, %s4339_s1 }
 0x2b4   :  { %1664 = vrot.lane.b32.xlu1 %v6022_v28, %s4339_s1  ;;  %v6032_v27 = vpop.permute.xlu0 %2530  ;;  %v7970_v28 = vld [vmem:[#allocation28_spill] sm:$0xff] }
 0x2b5   :  { %7964 = vst [vmem:[#allocation2_spill] sm:$0xff] %v6032_v27  ;;  %v6048_v50 = vmax.f32 %v7970_v28, %v7969_v56  ;;  %v7975_v56 = vld [vmem:[#allocation171_spill] sm:$0xff]  ;;  %v7976_v27 = vld [vmem:[#allocation74_spill] sm:$0xff] }
 0x2b6   :  { %v6036_v34 = vpop.permute.xlu1 %2532  ;;  %2398 = vrot.lane.b32.xlu0 %v2318_v62, %s4339_s1  ;;  %v1936_v35 = vmax.f32 %v7976_v27, %v7975_v56 }
 0x2b7   :  { %7966 = vst [vmem:[#allocation70_spill] sm:$0xff] %v6036_v34  ;;  %7971 = vst [vmem:[#allocation148_spill] sm:$0xff] %v6048_v50  ;;  %v7973_v34 = vld [vmem:[#allocation32_spill] sm:$0xff] }
 0x2b8   :  { %2400 = vrot.lane.b32.xlu1 %v2319_v29, %s4339_s1  ;;  %v6040_v49 = vpop.permute.xlu0 %2658  ;;  %v6054_v62 = vmax.f32 %v7973_v34, %v7972_v7  ;;  %v7979_v34 = vld [vmem:[#allocation172_spill] sm:$0xff] }
 0x2b9   :  { %7967 = vst [vmem:[#allocation67_spill] sm:$0xff] %v6040_v49 }
 0x2ba   :  { %v6042_v55 = vpop.permute.xlu1 %2660  ;;  %2554 = vrot.lane.b32.xlu0 %v5648_v41, %s4338_s0  ;;  %7974 = vst [vmem:[#allocation28_spill] sm:$0xff] %v6054_v62 }
 0x2bb   :  { %7968 = vst [vmem:[#allocation71_spill] sm:$0xff] %v6042_v55 }
 0x2bc   :  { %2556 = vrot.lane.b32.xlu1 %v5655_v45, %s4338_s0  ;;  %v1995_v9 = vpop.permute.xlu0 %1994 }
 0x2bd   :  { %v2084_v29 = vmax.f32 %v6048_v50, %v1995_v9  ;;  %v7980_v9 = vld [vmem:[#allocation78_spill] sm:$0xff] }
 0x2be   :  { %v1997_v49 = vpop.permute.xlu1 %1996  ;;  %2682 = vrot.lane.b32.xlu0 %v5648_v41, %s4339_s1  ;;  %v1937_v50 = vmax.f32 %v7980_v9, %v7979_v34  ;;  %v7988_v34 = vld [vmem:[#allocation11_spill] sm:$0xff] }
 0x2bf   :  { %v6060_v55 = vmax.f32 %v2084_v29, %v7852_v6  ;;  %v2085_v28 = vmax.f32 %v6054_v62, %v1997_v49  ;;  %v7982_v29 = vld [vmem:[#allocation173_spill] sm:$0xff]  ;;  %v7983_v49 = vld [vmem:[#allocation75_spill] sm:$0xff] }
 0x2c0   :  { %2684 = vrot.lane.b32.xlu1 %v5655_v45, %s4339_s1  ;;  %v6067_v33 = vpop.permute.xlu0 %1642  ;;  %v6079_v62 = vmax.f32 %v7983_v49, %v7982_v29  ;;  %v7985_v45 = vld [vmem:[#allocation174_spill] sm:$0xff]  ;;  %v7992_v49 = vld [vmem:[#allocation80_spill] sm:$0xff] }
 0x2c1   :  { %7977 = vst [vmem:[#allocation149_spill] sm:$0xff] %v6067_v33  ;;  %v6070_v7 = vmax.f32 %v2085_v28, %v7854_v10  ;;  %v7986_v33 = vld [vmem:[#allocation79_spill] sm:$0xff] }
 0x2c2   :  { %v6074_v41 = vpop.permute.xlu1 %1644  ;;  %2018 = vrot.lane.b32.xlu0 %v1936_v35, %s4339_s1  ;;  %7984 = vst [vmem:[#allocation172_spill] sm:$0xff] %v6079_v62  ;;  %v6086_v27 = vmax.f32 %v7986_v33, %v7985_v45 }
 0x2c3   :  { %7978 = vst [vmem:[#allocation32_spill] sm:$0xff] %v6070_v7  ;;  %7981 = vst [vmem:[#allocation171_spill] sm:$0xff] %v6074_v41  ;;  %v7989_v41 = vld [vmem:[#allocation76_spill] sm:$0xff] }
 0x2c4   :  { %2020 = vrot.lane.b32.xlu1 %v1937_v50, %s4339_s1  ;;  %v6082_v56 = vpop.permute.xlu0 %2378  ;;  %7987 = vst [vmem:[#allocation173_spill] sm:$0xff] %v6086_v27  ;;  %v2320_v35 = vmax.f32 %v7989_v41, %v7988_v34  ;;  %v7991_v50 = vld [vmem:[#allocation15_spill] sm:$0xff]  ;;  %v7996_v41 = vld [vmem:[#allocation152_spill] sm:$0xff] }
 0x2c5   :  { %v2321_v9 = vmax.f32 %v7992_v49, %v7991_v50 }
 0x2c6   :  { %v6088_v28 = vpop.permute.xlu1 %2380  ;;  %1666 = vrot.lane.b32.xlu0 %v6079_v62, %s4339_s1 }
 0x2c8   :  { %1668 = vrot.lane.b32.xlu1 %v6086_v27, %s4339_s1  ;;  %v6096_v29 = vpop.permute.xlu0 %2534  ;;  %v7997_v27 = vld [vmem:[#allocation36_spill] sm:$0xff] }
 0x2c9   :  { %7990 = vst [vmem:[#allocation75_spill] sm:$0xff] %v6096_v29  ;;  %v6112_v62 = vmax.f32 %v7997_v27, %v7996_v41  ;;  %v8000_v29 = vld [vmem:[#allocation40_spill] sm:$0xff]  ;;  %v8003_v41 = vld [vmem:[#allocation82_spill] sm:$0xff] }
 0x2ca   :  { %v6100_v7 = vpop.permute.xlu1 %2536  ;;  %2402 = vrot.lane.b32.xlu0 %v2320_v35, %s4339_s1  ;;  %v1938_v50 = vmax.f32 %v8003_v41, %v5618_v36 }
 0x2cb   :  { %7993 = vst [vmem:[#allocation174_spill] sm:$0xff] %v6100_v7  ;;  %7998 = vst [vmem:[#allocation152_spill] sm:$0xff] %v6112_v62  ;;  %v7999_v7 = vld [vmem:[#allocation153_spill] sm:$0xff] }
 0x2cc   :  { %2404 = vrot.lane.b32.xlu1 %v2321_v9, %s4339_s1  ;;  %v6104_v33 = vpop.permute.xlu0 %2662  ;;  %v6118_v35 = vmax.f32 %v8000_v29, %v7999_v7  ;;  %v8006_v29 = vld [vmem:[#allocation176_spill] sm:$0xff] }
 0x2cd   :  { %7994 = vst [vmem:[#allocation79_spill] sm:$0xff] %v6104_v33 }
 0x2ce   :  { %v6106_v45 = vpop.permute.xlu1 %2664  ;;  %2558 = vrot.lane.b32.xlu0 %v5704_v46, %s4338_s0  ;;  %8001 = vst [vmem:[#allocation36_spill] sm:$0xff] %v6118_v35 }
 0x2cf   :  { %7995 = vst [vmem:[#allocation203_spill] sm:$0xff] %v6106_v45 }
 0x2d0   :  { %2560 = vrot.lane.b32.xlu1 %v5711_v2, %s4338_s0  ;;  %v1999_v49 = vpop.permute.xlu0 %1998 }
 0x2d1   :  { %v2086_v9 = vmax.f32 %v6112_v62, %v1999_v49  ;;  %v8007_v49 = vld [vmem:[#allocation86_spill] sm:$0xff] }
 0x2d2   :  { %v2001_v33 = vpop.permute.xlu1 %2000  ;;  %2686 = vrot.lane.b32.xlu0 %v5704_v46, %s4339_s1  ;;  %v1939_v62 = vmax.f32 %v8007_v49, %v8006_v29  ;;  %v3979_v29 = vpop.f32.mrb[104].mxu0 }
 0x2d3   :  { %v6124_v45 = vmax.f32 %v2086_v9, %v7868_v11  ;;  %v2087_v27 = vmax.f32 %v6118_v35, %v2001_v33  ;;  %v8009_v9 = vld [vmem:[#allocation177_spill] sm:$0xff]  ;;  %v8010_v33 = vld [vmem:[#allocation83_spill] sm:$0xff] }
 0x2d4   :  { %2688 = vrot.lane.b32.xlu1 %v5711_v2, %s4339_s1  ;;  %v6131_v34 = vpop.permute.xlu0 %1646  ;;  %v6143_v35 = vmax.f32 %v8010_v33, %v8009_v9  ;;  %v8013_v2 = vld [vmem:[#allocation178_spill] sm:$0xff] }
 0x2d5   :  { %8002 = vst [vmem:[#allocation153_spill] sm:$0xff] %v6124_v45  ;;  %8004 = vst [vmem:[#allocation40_spill] sm:$0xff] %v6131_v34  ;;  %v6134_v7 = vmax.f32 %v2087_v27, %v7870_v12  ;;  %v8014_v34 = vld [vmem:[#allocation87_spill] sm:$0xff] }
 0x2d6   :  { %v6138_v46 = vpop.permute.xlu1 %1648  ;;  %2022 = vrot.lane.b32.xlu0 %v1938_v50, %s4339_s1  ;;  %8011 = vst [vmem:[#allocation177_spill] sm:$0xff] %v6143_v35  ;;  %v6150_v41 = vmax.f32 %v8014_v34, %v8013_v2  ;;  %v8018_v50 = vld [vmem:[#allocation84_spill] sm:$0xff] }
 0x2d7   :  { %8005 = vst [vmem:[#allocation204_spill] sm:$0xff] %v6134_v7  ;;  %8008 = vst [vmem:[#allocation176_spill] sm:$0xff] %v6138_v46  ;;  %v8017_v46 = vld [vmem:[#allocation179_spill] sm:$0xff]  ;;  %v8021_v34 = vld [vmem:[#allocation180_spill] sm:$0xff] }
 0x2d8   :  { %2024 = vrot.lane.b32.xlu1 %v1939_v62, %s4339_s1  ;;  %v6146_v36 = vpop.permute.xlu0 %2382  ;;  %8015 = vst [vmem:[#allocation178_spill] sm:$0xff] %v6150_v41  ;;  %v2322_v49 = vmax.f32 %v8018_v50, %v8017_v46  ;;  %v3980_v62 = vpop.f32.mrb[105].mxu0  ;;  %v8022_v2 = vld [vmem:[#allocation88_spill] sm:$0xff] }
 0x2d9   :  { %8012 = vst [vmem:[#allocation83_spill] sm:$0xff] %v6146_v36  ;;  %v6162_v33 = vadd.f32 %v3980_v62, %v3979_v29  ;;  %v3982_v7 = vpop.f32.mrb[106].mxu0  ;;  %v2323_v45 = vmax.f32 %v8022_v2, %v8021_v34  ;;  %v8027_v29 = vld [vmem:[#allocation156_spill] sm:$0xff]  ;;  %v8028_v62 = vld [vmem:[#allocation45_spill] sm:$0xff] }
 0x2da   :  { %v6152_v27 = vpop.permute.xlu1 %2384  ;;  %1670 = vrot.lane.b32.xlu0 %v6143_v35, %s4339_s1  ;;  %v3983_v35 = vpop.f32.mrb[107].mxu0 }
 0x2db   :  { %8016 = vst [vmem:[#allocation87_spill] sm:$0xff] %v6152_v27  ;;  %8020 = vst [vmem:[#allocation206_spill] sm:$0xff] %v6162_v33  ;;  %v6169_v36 = vadd.f32 %v3983_v35, %v3982_v7  ;;  %v3985_v2 = vpop.f32.mrb[108].mxu0  ;;  %v8030_v7 = vld [vmem:[#allocation157_spill] sm:$0xff] }
 0x2dc   :  { %1672 = vrot.lane.b32.xlu1 %v6150_v41, %s4339_s1  ;;  %v6160_v9 = vpop.permute.xlu0 %2538  ;;  %v3986_v35 = vpop.f32.mrb[109].mxu0 }
 0x2dd   :  { %8019 = vst [vmem:[#allocation205_spill] sm:$0xff] %v6160_v9  ;;  %8024 = vst [vmem:[#allocation208_spill] sm:$0xff] %v6169_v36  ;;  %v6180_v9 = vmax.f32 %v8028_v62, %v8027_v29  ;;  %v3988_v34 = vpop.f32.mrb[110].mxu0 }
 0x2de   :  { %v6166_v27 = vpop.permute.xlu1 %2540  ;;  %2406 = vrot.lane.b32.xlu0 %v2322_v49, %s4339_s1  ;;  %v3989_v29 = vpop.f32.mrb[111].mxu0 }
 0x2df   :  { %8023 = vst [vmem:[#allocation207_spill] sm:$0xff] %v6166_v27  ;;  %8029 = vst [vmem:[#allocation156_spill] sm:$0xff] %v6180_v9  ;;  %v8031_v27 = vld [vmem:[#allocation49_spill] sm:$0xff]  ;;  %v6197_v33 = vadd.f32 %v3989_v29, %v3988_v34 }
 0x2e0   :  { %2408 = vrot.lane.b32.xlu1 %v2323_v45, %s4339_s1  ;;  %v6172_v50 = vpop.permute.xlu0 %2666  ;;  %v6186_v45 = vmax.f32 %v8031_v27, %v8030_v7  ;;  %v8033_v27 = vld [vmem:[#allocation90_spill] sm:$0xff] }
 0x2e1   :  { %8025 = vst [vmem:[#allocation209_spill] sm:$0xff] %v6172_v50  ;;  %v1940_v7 = vmax.f32 %v8033_v27, %v5661_v53 }
 0x2e2   :  { %v6174_v41 = vpop.permute.xlu1 %2668  ;;  %2562 = vrot.lane.b32.xlu0 %v5760_v8, %s4338_s0  ;;  %8032 = vst [vmem:[#allocation45_spill] sm:$0xff] %v6186_v45 }
 0x2e3   :  { %8026 = vst [vmem:[#allocation210_spill] sm:$0xff] %v6174_v41  ;;  %v6189_v41 = vadd.f32 %v3986_v35, %v3985_v2 }
 0x2e4   :  { %2564 = vrot.lane.b32.xlu1 %v5767_v58, %s4338_s0  ;;  %v2003_v49 = vpop.permute.xlu0 %2002 }
 0x2e5   :  { %v2088_v50 = vmax.f32 %v6180_v9, %v2003_v49 }
 0x2e6   :  { %v2005_v46 = vpop.permute.xlu1 %2004  ;;  %2690 = vrot.lane.b32.xlu0 %v5760_v8, %s4339_s1  ;;  %v8035_v8 = vld [vmem:[#allocation94_spill] sm:$0xff] }
 0x2e7   :  { %v6194_v62 = vmax.f32 %v2088_v50, %v7884_v17  ;;  %v2089_v36 = vmax.f32 %v6186_v45, %v2005_v46  ;;  %v1941_v35 = vmax.f32 %v8035_v8, %v5668_v16  ;;  %v8037_v46 = vld [vmem:[#allocation91_spill] sm:$0xff]  ;;  %v8041_v16 = vld [vmem:[#allocation181_spill] sm:$0xff]  ;;  %v8042_v45 = vld [vmem:[#allocation92_spill] sm:$0xff] }
 0x2e8   :  { %2692 = vrot.lane.b32.xlu1 %v5767_v58, %s4339_s1  ;;  %v6203_v2 = vpop.permute.xlu0 %1650  ;;  %v6215_v34 = vmax.f32 %v8037_v46, %v5674_v42  ;;  %v8039_v58 = vld [vmem:[#allocation95_spill] sm:$0xff]  ;;  %v8045_v46 = vld [vmem:[#allocation96_spill] sm:$0xff] }
 0x2e9   :  { %8034 = vst [vmem:[#allocation157_spill] sm:$0xff] %v6203_v2  ;;  %v6206_v49 = vmax.f32 %v2089_v36, %v7886_v43  ;;  %v6222_v29 = vmax.f32 %v8039_v58, %v5680_v54  ;;  %v8047_v54 = vld [vmem:[#allocation27_spill] sm:$0xff]  ;;  %v8048_v58 = vld [vmem:[#allocation98_spill] sm:$0xff] }
 0x2ea   :  { %v6210_v50 = vpop.permute.xlu1 %1652  ;;  %2026 = vrot.lane.b32.xlu0 %v1940_v7, %s4339_s1  ;;  %8038 = vst [vmem:[#allocation90_spill] sm:$0xff] %v6215_v34  ;;  %v2324_v7 = vmax.f32 %v8042_v45, %v8041_v16  ;;  %v1942_v2 = vmax.f32 %v8048_v58, %v8047_v54  ;;  %v8050_v45 = vld [vmem:[#allocation102_spill] sm:$0xff]  ;;  %v8057_v58 = vld [vmem:[#allocation57_spill] sm:$0xff] }
 0x2eb   :  { %8036 = vst [vmem:[#allocation49_spill] sm:$0xff] %v6210_v50  ;;  %8040 = vst [vmem:[#allocation94_spill] sm:$0xff] %v6222_v29  ;;  %v1943_v16 = vmax.f32 %v8050_v45, %v5708_v37 }
 0x2ec   :  { %2028 = vrot.lane.b32.xlu1 %v1941_v35, %s4339_s1  ;;  %v6218_v53 = vpop.permute.xlu0 %2386  ;;  %v8044_v35 = vld [vmem:[#allocation182_spill] sm:$0xff] }
 0x2ed   :  { %v2325_v9 = vmax.f32 %v8045_v46, %v8044_v35  ;;  %v8053_v46 = vld [vmem:[#allocation53_spill] sm:$0xff] }
 0x2ee   :  { %v6224_v36 = vpop.permute.xlu1 %2388  ;;  %1674 = vrot.lane.b32.xlu0 %v6215_v34, %s4339_s1 }
 0x2f0   :  { %1676 = vrot.lane.b32.xlu1 %v6222_v29, %s4339_s1  ;;  %v6232_v42 = vpop.permute.xlu0 %2542 }
 0x2f1   :  { %8043 = vst [vmem:[#allocation91_spill] sm:$0xff] %v6232_v42  ;;  %v8052_v42 = vld [vmem:[#allocation160_spill] sm:$0xff] }
 0x2f2   :  { %v6236_v50 = vpop.permute.xlu1 %2544  ;;  %2410 = vrot.lane.b32.xlu0 %v2324_v7, %s4339_s1  ;;  %v6251_v35 = vmax.f32 %v8053_v46, %v8052_v42  ;;  %v8055_v7 = vld [vmem:[#allocation100_spill] sm:$0xff] }
 0x2f3   :  { %8046 = vst [vmem:[#allocation95_spill] sm:$0xff] %v6236_v50  ;;  %v2326_v50 = vmax.f32 %v8055_v7, %v5730_v40 }
 0x2f4   :  { %2412 = vrot.lane.b32.xlu1 %v2325_v9, %s4339_s1  ;;  %v6242_v34 = vpop.permute.xlu0 %2670  ;;  %8054 = vst [vmem:[#allocation160_spill] sm:$0xff] %v6251_v35  ;;  %v8056_v9 = vld [vmem:[#allocation161_spill] sm:$0xff] }
 0x2f5   :  { %8049 = vst [vmem:[#allocation27_spill] sm:$0xff] %v6242_v34  ;;  %v6258_v34 = vmax.f32 %v8057_v58, %v8056_v9  ;;  %v8062_v9 = vld [vmem:[#allocation190_spill] sm:$0xff] }
 0x2f6   :  { %v6246_v29 = vpop.permute.xlu1 %2672  ;;  %2030 = vrot.lane.b32.xlu0 %v1942_v2, %s4339_s1 }
 0x2f7   :  { %8051 = vst [vmem:[#allocation211_spill] sm:$0xff] %v6246_v29  ;;  %8058 = vst [vmem:[#allocation53_spill] sm:$0xff] %v6258_v34  ;;  %v8059_v29 = vld [vmem:[#allocation104_spill] sm:$0xff] }
 0x2f8   :  { %2032 = vrot.lane.b32.xlu1 %v1943_v16, %s4339_s1  ;;  %v2007_v54 = vpop.permute.xlu0 %2006  ;;  %v2327_v45 = vmax.f32 %v8059_v29, %v5736_v15  ;;  %v8060_v16 = vld [vmem:[#allocation106_spill] sm:$0xff] }
 0x2f9   :  { %v2090_v37 = vmax.f32 %v6251_v35, %v2007_v54  ;;  %v1944_v7 = vmax.f32 %v8060_v16, %v5746_v14  ;;  %v8063_v29 = vld [vmem:[#allocation110_spill] sm:$0xff]  ;;  %v8065_v14 = vld [vmem:[#allocation108_spill] sm:$0xff] }
 0x2fa   :  { %v2009_v2 = vpop.permute.xlu1 %2008  ;;  %2414 = vrot.lane.b32.xlu0 %v2326_v50, %s4339_s1  ;;  %v1945_v35 = vmax.f32 %v8063_v29, %v8062_v9  ;;  %v4321_v50 = vld [vmem:[%s7342_s3] sm:$0xff]  }
 0x2fb   :  { %v6265_v42 = vmax.f32 %v2090_v37, %v7904_v18  ;;  %v2091_v46 = vmax.f32 %v6258_v34, %v2009_v2  ;;  %v2328_v37 = vmax.f32 %v8065_v14, %v5773_v44  ;;  %4063 = vmatprep.subr.bf16.mxu1 %v4321_v50  ;;  %v8066_v2 = vld [vmem:[#allocation112_spill] sm:$0xff]  ;;  %v4322_v34 = vld [vmem:[%s7342_s3 + $0x8] sm:$0xff]   ;;  %v8067_v14 = vld [vmem:[#allocation114_spill] sm:$0xff] }
 0x2fc   :  { %2416 = vrot.lane.b32.xlu1 %v2327_v45, %s4339_s1  ;;  %v6271_v58 = vpop.permute.xlu0 %1654  ;;  %4064 = vmatpush3.bf16.msra.mxu1 %v4321_v50 }
 0x2fd   :  { %8061 = vst [vmem:[#allocation161_spill] sm:$0xff] %v6271_v58  ;;  %v6274_v54 = vmax.f32 %v2091_v46, %v7905_v24  ;;  %v2329_v46 = vmax.f32 %v8066_v2, %v5780_v22  ;;  %4065 = vmatprep.subr.bf16.mxu1 %v4322_v34 }
 0x2fe   :  { %v6278_v15 = vpop.permute.xlu1 %1656  ;;  %2034 = vrot.lane.b32.xlu0 %v1944_v7, %s4339_s1  ;;  %v3991_v7 = vpop.f32.mrb[112].mxu0 }
 0x2ff   :  { %8064 = vst [vmem:[#allocation57_spill] sm:$0xff] %v6278_v15  ;;  %v3992_v15 = vpop.f32.mrb[113].mxu0 }
 0x300   :  { %2036 = vrot.lane.b32.xlu1 %v1945_v35, %s4339_s1  ;;  %v6287_v45 = vpop.permute.xlu0 %2390  ;;  %v1946_v35 = vmax.f32 %v8067_v14, %v5795_v19  ;;  %v6302_v50 = vadd.f32 %v3992_v15, %v3991_v7  ;;  %v3994_v2 = vpop.f32.mrb[114].mxu0  ;;  %4066 = vmatpush3.bf16.msra.mxu1 %v4322_v34  ;;  %v4323_v19 = vld [vmem:[%s7342_s3 + $0x10] sm:$0xff]  }
 0x301   :  { %v3995_v29 = vpop.f32.mrb[115].mxu0  ;;  %v8071_v15 = vld [vmem:[#allocation116_spill] sm:$0xff]  ;;  %4067 = vmatprep.subr.bf16.mxu1 %v4323_v19 }
 0x302   :  { %v6291_v9 = vpop.permute.xlu1 %2392  ;;  %2418 = vrot.lane.b32.xlu0 %v2328_v37, %s4339_s1  ;;  %v8069_v37 = vld [vmem:[#allocation118_spill] sm:$0xff]  ;;  %v2330_v7 = vmax.f32 %v8071_v15, %v5812_v39  ;;  %v3997_v39 = vpop.f32.mrb[116].mxu0 }
 0x303   :  { %v1947_v22 = vmax.f32 %v8069_v37, %v5798_v23  ;;  %v8073_v23 = vld [vmem:[#allocation128_spill] sm:$0xff] }
 0x304   :  { %2420 = vrot.lane.b32.xlu1 %v2329_v46, %s4339_s1  ;;  %v6300_v58 = vpop.permute.xlu0 %2546  ;;  %v6312_v46 = vadd.f32 %v3995_v29, %v3994_v2  ;;  %4068 = vmatpush3.bf16.msra.mxu1 %v4323_v19  ;;  %v2270_v37 = vmax.f32 %v7792_v32, %v8073_v23  ;;  %v4324_v29 = vld [vmem:[%s7342_s3 + $0x18] sm:$0xff]   ;;  %v8076_v2 = vld [vmem:[#allocation124_spill] sm:$0xff] }
 0x305   :  { %8068 = vst [vmem:[#allocation106_spill] sm:$0xff] %v6300_v58  ;;  %v8079_v19 = vld [vmem:[#allocation125_spill] sm:$0xff]  ;;  %4069 = vmatprep.subr.bf16.mxu1 %v4324_v29 }
 0x306   :  { %v6306_v44 = vpop.permute.xlu1 %2548  ;;  %2038 = vrot.lane.b32.xlu0 %v1946_v35, %s4339_s1  ;;  %v8074_v35 = vld [vmem:[#allocation121_spill] sm:$0xff]  ;;  %v2462_v32 = vmax.f32 %v2270_v37, %v5866_v3 }
 0x307   :  { %8070 = vst [vmem:[#allocation190_spill] sm:$0xff] %v6306_v44  ;;  %v2331_v14 = vmax.f32 %v8074_v35, %v5818_v21  ;;  %v3998_v35 = vpop.f32.mrb[117].mxu0  ;;  %v8081_v21 = vld [vmem:[#allocation65_spill] sm:$0xff] }
 0x308   :  { %2040 = vrot.lane.b32.xlu1 %v1947_v22, %s4339_s1  ;;  %v6317_v34 = vpop.permute.xlu0 %2674  ;;  %v8077_v22 = vld [vmem:[#allocation61_spill] sm:$0xff]  ;;  %v6342_v40 = vadd.f32 %v3998_v35, %v3997_v39  ;;  %4070 = vmatpush3.bf16.msra.mxu1 %v4324_v29  ;;  %v8084_v35 = vld [vmem:[#allocation126_spill] sm:$0xff] }
 0x309   :  { %8072 = vst [vmem:[#allocation212_spill] sm:$0xff] %v6317_v34  ;;  %v6331_v15 = vmax.f32 %v8077_v22, %v8076_v2  ;;  %v2271_v34 = vmax.f32 %v7796_v48, %v8079_v19  ;;  %v4000_v2 = vpop.f32.mrb[118].mxu0  ;;  %v1948_v29 = vmax.f32 %v8084_v35, %v5876_v5  ;;  %v8086_v5 = vld [vmem:[#allocation127_spill] sm:$0xff] }
 0x30a   :  { %v6323_v44 = vpop.permute.xlu1 %2676  ;;  %2422 = vrot.lane.b32.xlu0 %v2330_v7, %s4339_s1  ;;  %v8080_v7 = vld [vmem:[#allocation3_spill] sm:$0xff]  ;;  %v4001_v3 = vpop.f32.mrb[119].mxu0 }
 0x30b   :  { %8075 = vst [vmem:[#allocation128_spill] sm:$0xff] %v6323_v44  ;;  %8078 = vst [vmem:[#allocation124_spill] sm:$0xff] %v6331_v15  ;;  %v6339_v44 = vmax.f32 %v8081_v21, %v8080_v7  ;;  %v2463_v22 = vmax.f32 %v2271_v34, %v5870_v31  ;;  %v6353_v19 = vadd.f32 %v4001_v3, %v4000_v2  ;;  %v8088_v3 = vld [vmem:[#allocation130_spill] sm:$0xff] }
 0x30c   :  { %2424 = vrot.lane.b32.xlu1 %v2331_v14, %s4339_s1  ;;  %v2011_v23 = vpop.permute.xlu0 %2010  ;;  %v4325_v14 = vld [vmem:[%s7342_s3 + $0x20] sm:$0xff]  }
 0x30d   :  { %8082 = vst [vmem:[#allocation61_spill] sm:$0xff] %v6339_v44  ;;  %v2092_v58 = vmax.f32 %v6331_v15, %v2011_v23  ;;  %4071 = vmatprep.subr.bf16.mxu1 %v4325_v14  ;;  %v8085_v23 = vld [vmem:[#allocation129_spill] sm:$0xff] }
 0x30e   :  { %v2013_v48 = vpop.permute.xlu1 %2012  ;;  %2942 = vrot.lane.b32.xlu0 %v2462_v32, %s4338_s0  ;;  %4072 = vmatpush3.bf16.msra.mxu1 %v4325_v14  ;;  %v1949_v7 = vmax.f32 %v8085_v23, %v5882_v51  ;;  %v2333_v14 = vmax.f32 %v8088_v3, %v5908_v61  ;;  %v8094_v15 = vld [vmem:[#allocation69_spill] sm:$0xff] }
 0x30f   :  { %v6350_v37 = vmax.f32 %v2092_v58, %v7925_v59  ;;  %v2093_v21 = vmax.f32 %v6339_v44, %v2013_v48  ;;  %v4326_v58 = vld [vmem:[%s7342_s3 + $0x28] sm:$0xff]   ;;  %v8087_v48 = vld [vmem:[#allocation138_spill] sm:$0xff] }
 0x310   :  { %2944 = vrot.lane.b32.xlu1 %v2463_v22, %s4338_s0  ;;  %v6356_v39 = vpop.permute.xlu0 %1658  ;;  %4073 = vmatprep.subr.bf16.mxu1 %v4326_v58  ;;  %v2332_v22 = vmax.f32 %v8086_v5, %v5902_v1  ;;  %v2272_v51 = vmax.f32 %v7818_v60, %v8087_v48  ;;  %v8090_v5 = vld [vmem:[#allocation62_spill] sm:$0xff]  ;;  %v8091_v60 = vld [vmem:[#allocation59_spill] sm:$0xff] }
 0x311   :  { %v6359_v31 = vmax.f32 %v2093_v21, %v7929_v4 }
 0x312   :  { %v6361_v34 = vpop.permute.xlu1 %1660  ;;  %2814 = vrot.lane.b32.xlu0 %v5853_v13, %s4338_s0  ;;  %4074 = vmatpush3.bf16.msra.mxu1 %v4326_v58  ;;  %v4327_v13 = vld [vmem:[%s7342_s3 + $0x30] sm:$0xff]   ;;  %v4328_v58 = vld [vmem:[%s7342_s3 + $0x38] sm:$0xff]   ;;  %v2464_v44 = vmax.f32 %v2272_v51, %v8090_v5  ;;  %v8096_v5 = vld [vmem:[#allocation170_spill] sm:$0xff] }
 0x313   :  { %8083 = vst [vmem:[#allocation125_spill] sm:$0xff] %v6361_v34  ;;  %4075 = vmatprep.subr.bf16.mxu1 %v4327_v13  ;;  %v8097_v51 = vld [vmem:[#allocation73_spill] sm:$0xff] }
 0x314   :  { %2816 = vrot.lane.b32.xlu1 %v5860_v26, %s4338_s0  ;;  %v6372_v32 = vpop.permute.xlu0 %2394 }
 0x316   :  { %v6376_v2 = vpop.permute.xlu1 %2396  ;;  %2042 = vrot.lane.b32.xlu0 %v1948_v29, %s4339_s1  ;;  %4076 = vmatpush3.bf16.msra.mxu1 %v4327_v13  ;;  %v8089_v29 = vld [vmem:[#allocation139_spill] sm:$0xff] }
 0x317   :  { %4077 = vmatprep.subr.bf16.mxu1 %v4328_v58 }
 0x318   :  { %2044 = vrot.lane.b32.xlu1 %v1949_v7, %s4339_s1  ;;  %v6385_v26 = vpop.permute.xlu0 %2550  ;;  %v2273_v7 = vmax.f32 %v7820_v52, %v8089_v29 }
 0x31a   :  { %v6391_v21 = vpop.permute.xlu1 %2552  ;;  %2426 = vrot.lane.b32.xlu0 %v2332_v22, %s4339_s1  ;;  %4078 = vmatpush3.bf16.msra.mxu1 %v4328_v58  ;;  %v2465_v48 = vmax.f32 %v2273_v7, %v8091_v60  ;;  %v8093_v22 = vld [vmem:[#allocation169_spill] sm:$0xff]  ;;  %v8099_v58 = vld [vmem:[#allocation142_spill] sm:$0xff] }
 0x31b   :  { %v6409_v34 = vmax.f32 %v8094_v15, %v8093_v22  ;;  %v2274_v7 = vmax.f32 %v7838_v47, %v8099_v58 }
 0x31c   :  { %2428 = vrot.lane.b32.xlu1 %v2333_v14, %s4339_s1  ;;  %v6401_v13 = vpop.permute.xlu0 %2678  ;;  %v6414_v14 = vmax.f32 %v8097_v51, %v8096_v5  ;;  %v8102_v51 = vld [vmem:[#allocation162_spill] sm:$0xff] }
 0x31d   :  { %8095 = vst [vmem:[#allocation65_spill] sm:$0xff] %v6409_v34  ;;  %v2466_v5 = vmax.f32 %v2274_v7, %v6018_v25 }
 0x31e   :  { %v6404_v3 = vpop.permute.xlu1 %2680  ;;  %2946 = vrot.lane.b32.xlu0 %v2464_v44, %s4338_s0  ;;  %8098 = vst [vmem:[#allocation126_spill] sm:$0xff] %v6414_v14 }
 0x31f   :  { %8092 = vst [vmem:[#allocation3_spill] sm:$0xff] %v6404_v3  ;;  %v8100_v3 = vld [vmem:[#allocation141_spill] sm:$0xff] }
 0x320   :  { %2948 = vrot.lane.b32.xlu1 %v2465_v48, %s4338_s0  ;;  %v2015_v52 = vpop.permute.xlu0 %2014  ;;  %v8101_v48 = vld [vmem:[#allocation143_spill] sm:$0xff] }
 0x321   :  { %v2094_v29 = vmax.f32 %v6409_v34, %v2015_v52  ;;  %v2275_v22 = vmax.f32 %v7840_v38, %v8101_v48  ;;  %v8105_v38 = vld [vmem:[#allocation146_spill] sm:$0xff]  ;;  %v8106_v48 = vld [vmem:[#allocation147_spill] sm:$0xff]  ;;  %v8115_v34 = vld [vmem:[#allocation32_spill] sm:$0xff] }
 0x322   :  { %v2017_v60 = vpop.permute.xlu1 %2016  ;;  %2818 = vrot.lane.b32.xlu0 %v8100_v3, %s4338_s0  ;;  %v2276_v25 = vmax.f32 %v7852_v6, %v8105_v38 }
 0x323   :  { %v6422_v44 = vmax.f32 %v2094_v29, %v7954_v0  ;;  %v2095_v15 = vmax.f32 %v6414_v14, %v2017_v60  ;;  %v2467_v3 = vmax.f32 %v2275_v22, %v6024_v20  ;;  %v4003_v60 = vpop.f32.mrb[120].mxu0  ;;  %v2277_v20 = vmax.f32 %v7854_v10, %v8106_v48 }
 0x324   :  { %2820 = vrot.lane.b32.xlu1 %v8102_v51, %s4338_s0  ;;  %v6430_v52 = vpop.permute.xlu0 %1662  ;;  %v2468_v22 = vmax.f32 %v2276_v25, %v6082_v56  ;;  %v8109_v56 = vld [vmem:[#allocation150_spill] sm:$0xff] }
 0x325   :  { %8103 = vst [vmem:[#allocation129_spill] sm:$0xff] %v6430_v52  ;;  %v6433_v47 = vmax.f32 %v2095_v15, %v7957_v63  ;;  %v4004_v15 = vpop.f32.mrb[121].mxu0 }
 0x326   :  { %v6436_v58 = vpop.permute.xlu1 %1664  ;;  %2950 = vrot.lane.b32.xlu0 %v2466_v5, %s4338_s0  ;;  %v6455_v51 = vadd.f32 %v4004_v15, %v4003_v60  ;;  %v4006_v6 = vpop.f32.mrb[122].mxu0  ;;  %v8111_v60 = vld [vmem:[#allocation175_spill] sm:$0xff]  ;;  %v8112_v15 = vld [vmem:[#allocation77_spill] sm:$0xff] }
 0x327   :  { %8104 = vst [vmem:[#allocation138_spill] sm:$0xff] %v6436_v58  ;;  %v6474_v48 = vmax.f32 %v8112_v15, %v8111_v60  ;;  %v8116_v58 = vld [vmem:[#allocation14_spill] sm:$0xff]  ;;  %v8119_v15 = vld [vmem:[#allocation87_spill] sm:$0xff] }
 0x328   :  { %2952 = vrot.lane.b32.xlu1 %v2467_v3, %s4338_s0  ;;  %v6440_v29 = vpop.permute.xlu0 %2398  ;;  %v2469_v3 = vmax.f32 %v2277_v20, %v6088_v28 }
 0x32a   :  { %v6444_v7 = vpop.permute.xlu1 %2400  ;;  %2822 = vrot.lane.b32.xlu0 %v5996_v57, %s4338_s0  ;;  %v4007_v57 = vpop.f32.mrb[123].mxu0 }
 0x32b   :  { %v6461_v14 = vadd.f32 %v4007_v57, %v4006_v6  ;;  %v4009_v28 = vpop.f32.mrb[124].mxu0 }
 0x32c   :  { %2824 = vrot.lane.b32.xlu1 %v6006_v30, %s4338_s0  ;;  %v6453_v5 = vpop.permute.xlu0 %2554  ;;  %v2278_v30 = vmax.f32 %v7868_v11, %v8109_v56  ;;  %v4010_v20 = vpop.f32.mrb[125].mxu0 }
 0x32d   :  { %v6481_v56 = vadd.f32 %v4010_v20, %v4009_v28  ;;  %v4012_v60 = vpop.f32.mrb[126].mxu0 }
 0x32e   :  { %v6458_v38 = vpop.permute.xlu1 %2556  ;;  %2954 = vrot.lane.b32.xlu0 %v2468_v22, %s4338_s0  ;;  %v8113_v22 = vld [vmem:[#allocation151_spill] sm:$0xff] }
 0x32f   :  { %8107 = vst [vmem:[#allocation139_spill] sm:$0xff] %v6458_v38  ;;  %v2279_v6 = vmax.f32 %v7870_v12, %v8113_v22  ;;  %v4013_v12 = vpop.f32.mrb[127].mxu0 }
 0x330   :  { %2956 = vrot.lane.b32.xlu1 %v2469_v3, %s4338_s0  ;;  %v6464_v10 = vpop.permute.xlu0 %2682  ;;  %v8114_v3 = vld [vmem:[#allocation83_spill] sm:$0xff]  ;;  %v6494_v28 = vadd.f32 %v4013_v12, %v4012_v60 }
 0x331   :  { %8108 = vst [vmem:[#allocation62_spill] sm:$0xff] %v6464_v10  ;;  %v2470_v57 = vmax.f32 %v2278_v30, %v8114_v3  ;;  %v2471_v10 = vmax.f32 %v2279_v6, %v8119_v15  ;;  %v8120_v30 = vld [vmem:[#allocation74_spill] sm:$0xff] }
 0x332   :  { %v6468_v25 = vpop.permute.xlu1 %2684  ;;  %2826 = vrot.lane.b32.xlu0 %v6060_v55, %s4338_s0  ;;  %v8122_v3 = vld [vmem:[#allocation154_spill] sm:$0xff] }
 0x333   :  { %8110 = vst [vmem:[#allocation59_spill] sm:$0xff] %v6468_v25  ;;  %v8117_v25 = vld [vmem:[#allocation81_spill] sm:$0xff]  ;;  %v2280_v6 = vmax.f32 %v7884_v17, %v8122_v3  ;;  %v8126_v3 = vld [vmem:[#allocation158_spill] sm:$0xff] }
 0x334   :  { %2828 = vrot.lane.b32.xlu1 %v8115_v34, %s4338_s0  ;;  %v2019_v11 = vpop.permute.xlu0 %2018  ;;  %v6485_v55 = vmax.f32 %v8117_v25, %v8116_v58  ;;  %v8121_v25 = vld [vmem:[#allocation78_spill] sm:$0xff] }
 0x335   :  { %v2096_v52 = vmax.f32 %v6474_v48, %v2019_v11  ;;  %v2472_v60 = vmax.f32 %v2280_v6, %v6218_v53 }
 0x336   :  { %8118 = vst [vmem:[#allocation169_spill] sm:$0xff] %v6485_v55  ;;  %v2021_v38 = vpop.permute.xlu1 %2020  ;;  %2958 = vrot.lane.b32.xlu0 %v2470_v57, %s4338_s0  ;;  %v8123_v57 = vld [vmem:[#allocation153_spill] sm:$0xff] }
 0x337   :  { %v6491_v22 = vmax.f32 %v2096_v52, %v8120_v30  ;;  %v2097_v34 = vmax.f32 %v6485_v55, %v2021_v38  ;;  %v8124_v52 = vld [vmem:[#allocation155_spill] sm:$0xff] }
 0x338   :  { %2960 = vrot.lane.b32.xlu1 %v2471_v10, %s4338_s0  ;;  %v6497_v58 = vpop.permute.xlu0 %1666  ;;  %v2281_v38 = vmax.f32 %v7886_v43, %v8124_v52  ;;  %v8125_v10 = vld [vmem:[#allocation204_spill] sm:$0xff]  ;;  %v8127_v43 = vld [vmem:[#allocation159_spill] sm:$0xff] }
 0x339   :  { %v6500_v20 = vmax.f32 %v2097_v34, %v8121_v25  ;;  %v2283_v53 = vmax.f32 %v7905_v24, %v8127_v43  ;;  %v8135_v43 = vld [vmem:[#allocation82_spill] sm:$0xff] }
 0x33a   :  { %v6504_v11 = vpop.permute.xlu1 %1668  ;;  %2830 = vrot.lane.b32.xlu0 %v8123_v57, %s4338_s0  ;;  %v2473_v12 = vmax.f32 %v2281_v38, %v6224_v36  ;;  %v2282_v57 = vmax.f32 %v7904_v18, %v8126_v3  ;;  %v8128_v18 = vld [vmem:[#allocation19_spill] sm:$0xff]  ;;  %v8134_v3 = vld [vmem:[#allocation166_spill] sm:$0xff] }
 0x33b   :  { %v2475_v52 = vmax.f32 %v2283_v53, %v6291_v9  ;;  %v2284_v9 = vmax.f32 %v7925_v59, %v8134_v3 }
 0x33c   :  { %2832 = vrot.lane.b32.xlu1 %v8125_v10, %s4338_s0  ;;  %v2403_v15 = vpop.permute.xlu0 %2402  ;;  %v2474_v36 = vmax.f32 %v2282_v57, %v6287_v45  ;;  %v8132_v45 = vld [vmem:[#allocation89_spill] sm:$0xff] }
 0x33e   :  { %v2405_v34 = vpop.permute.xlu1 %2404  ;;  %2962 = vrot.lane.b32.xlu0 %v2472_v60, %s4338_s0  ;;  %v8129_v60 = vld [vmem:[#allocation85_spill] sm:$0xff] }
 0x33f   :  { %v6537_v10 = vmax.f32 %v8129_v60, %v8128_v18  ;;  %v8136_v18 = vld [vmem:[#allocation167_spill] sm:$0xff]  ;;  %v2476_v60 = vmax.f32 %v2284_v9, %v6372_v32 }
 0x340   :  { %2964 = vrot.lane.b32.xlu1 %v2473_v12, %s4338_s0  ;;  %v6516_v17 = vpop.permute.xlu0 %2558 }
 0x341   :  { %8130 = vst [vmem:[#allocation69_spill] sm:$0xff] %v6537_v10 }
 0x342   :  { %v6520_v55 = vpop.permute.xlu1 %2560  ;;  %2834 = vrot.lane.b32.xlu0 %v6194_v62, %s4338_s0  ;;  %v8131_v62 = vld [vmem:[#allocation23_spill] sm:$0xff] }
 0x343   :  { %v6542_v12 = vmax.f32 %v8132_v45, %v8131_v62  ;;  %v8138_v62 = vld [vmem:[#allocation86_spill] sm:$0xff] }
 0x344   :  { %2836 = vrot.lane.b32.xlu1 %v6206_v49, %s4338_s0  ;;  %v6529_v6 = vpop.permute.xlu0 %2686 }
 0x345   :  { %8133 = vst [vmem:[#allocation170_spill] sm:$0xff] %v6542_v12 }
 0x346   :  { %v6532_v38 = vpop.permute.xlu1 %2688  ;;  %2966 = vrot.lane.b32.xlu0 %v2474_v36, %s4338_s0 }
 0x348   :  { %2968 = vrot.lane.b32.xlu1 %v2475_v52, %s4338_s0  ;;  %v2023_v24 = vpop.permute.xlu0 %2022  ;;  %v2285_v52 = vmax.f32 %v7929_v4, %v8136_v18 }
 0x349   :  { %v2098_v49 = vmax.f32 %v6537_v10, %v2023_v24 }
 0x34a   :  { %v2025_v57 = vpop.permute.xlu1 %2024  ;;  %2838 = vrot.lane.b32.xlu0 %v6265_v42, %s4338_s0  ;;  %v2477_v45 = vmax.f32 %v2285_v52, %v6376_v2 }
 0x34b   :  { %v2130_v53 = vmax.f32 %v2098_v49, %v8135_v43  ;;  %v2099_v36 = vmax.f32 %v6542_v12, %v2025_v57  ;;  %v8140_v49 = vld [vmem:[#allocation6_spill] sm:$0xff] }
 0x34c   :  { %2840 = vrot.lane.b32.xlu1 %v6274_v54, %s4338_s0  ;;  %v6556_v24 = vpop.permute.xlu0 %1670  ;;  %v2286_v4 = vmax.f32 %v7954_v0, %v8140_v49  ;;  %v8141_v54 = vld [vmem:[#allocation168_spill] sm:$0xff] }
 0x34d   :  { %8137 = vst [vmem:[#allocation73_spill] sm:$0xff] %v6556_v24  ;;  %v2131_v59 = vmax.f32 %v2099_v36, %v8138_v62  ;;  %v2287_v9 = vmax.f32 %v7957_v63, %v8141_v54  ;;  %v8150_v54 = vld [vmem:[#allocation184_spill] sm:$0xff] }
 0x34e   :  { %v6560_v3 = vpop.permute.xlu1 %1672  ;;  %2970 = vrot.lane.b32.xlu0 %v2476_v60, %s4338_s0  ;;  %v2478_v57 = vmax.f32 %v2286_v4, %v6440_v29  ;;  %v8147_v29 = vld [vmem:[#allocation93_spill] sm:$0xff] }
 0x34f   :  { %8139 = vst [vmem:[#allocation142_spill] sm:$0xff] %v6560_v3  ;;  %v2479_v36 = vmax.f32 %v2287_v9, %v6444_v7  ;;  %v8149_v7 = vld [vmem:[#allocation15_spill] sm:$0xff]  ;;  %v8151_v9 = vld [vmem:[#allocation97_spill] sm:$0xff] }
 0x350   :  { %2972 = vrot.lane.b32.xlu1 %v2477_v45, %s4338_s0  ;;  %v2407_v42 = vpop.permute.xlu0 %2406  ;;  %v2289_v45 = vmax.f32 %v8121_v25, %v8149_v7  ;;  %v8156_v7 = vld [vmem:[#allocation208_spill] sm:$0xff]  ;;  %v8200_v3 = vld [vmem:[#allocation17_spill] sm:$0xff] }
 0x352   :  { %v2409_v32 = vpop.permute.xlu1 %2408  ;;  %2842 = vrot.lane.b32.xlu0 %v6350_v37, %s4338_s0  ;;  %v8144_v37 = vld [vmem:[#allocation11_spill] sm:$0xff] }
 0x353   :  { %v2288_v63 = vmax.f32 %v8120_v30, %v8144_v37  ;;  %v6598_v30 = vmax.f32 %v8151_v9, %v8150_v54 }
 0x354   :  { %2844 = vrot.lane.b32.xlu1 %v6359_v31, %s4338_s0  ;;  %v6573_v2 = vpop.permute.xlu0 %2562  ;;  %v8146_v31 = vld [vmem:[#allocation183_spill] sm:$0xff] }
 0x355   :  { %v6590_v60 = vmax.f32 %v8147_v29, %v8146_v31  ;;  %v2480_v49 = vmax.f32 %v2288_v63, %v2403_v15  ;;  %8152 = vst [vmem:[#allocation147_spill] sm:$0xff] %v6598_v30  ;;  %v8155_v29 = vld [vmem:[#allocation206_spill] sm:$0xff] }
 0x356   :  { %v6576_v18 = vpop.permute.xlu1 %2564  ;;  %2974 = vrot.lane.b32.xlu0 %v2478_v57, %s4338_s0 }
 0x357   :  { %8142 = vst [vmem:[#allocation141_spill] sm:$0xff] %v6576_v18  ;;  %8148 = vst [vmem:[#allocation146_spill] sm:$0xff] %v6590_v60 }
 0x358   :  { %2976 = vrot.lane.b32.xlu1 %v2479_v36, %s4338_s0  ;;  %v6580_v0 = vpop.permute.xlu0 %2690  ;;  %v2481_v36 = vmax.f32 %v2289_v45, %v2405_v34 }
 0x359   :  { %8143 = vst [vmem:[#allocation143_spill] sm:$0xff] %v6580_v0  ;;  %v8218_v0 = vld [vmem:[#allocation25_spill] sm:$0xff] }
 0x35a   :  { %v6584_v52 = vpop.permute.xlu1 %2692  ;;  %2846 = vrot.lane.b32.xlu0 %v6422_v44, %s4338_s0 }
 0x35b   :  { %8145 = vst [vmem:[#allocation162_spill] sm:$0xff] %v6584_v52 }
 0x35c   :  { %2848 = vrot.lane.b32.xlu1 %v6433_v47, %s4338_s0  ;;  %v2027_v4 = vpop.permute.xlu0 %2026 }
 0x35d   :  { %v2100_v57 = vmax.f32 %v6590_v60, %v2027_v4 }
 0x35e   :  { %v2029_v44 = vpop.permute.xlu1 %2028  ;;  %2978 = vrot.lane.b32.xlu0 %v2480_v49, %s4338_s0 }
 0x35f   :  { %v2132_v37 = vmax.f32 %v2100_v57, %v8033_v27  ;;  %v2101_v31 = vmax.f32 %v6598_v30, %v2029_v44  ;;  %v8157_v44 = vld [vmem:[#allocation179_spill] sm:$0xff] }
 0x360   :  { %2980 = vrot.lane.b32.xlu1 %v2481_v36, %s4338_s0  ;;  %v6605_v25 = vpop.permute.xlu0 %1674 }
 0x361   :  { %8153 = vst [vmem:[#allocation150_spill] sm:$0xff] %v6605_v25  ;;  %v2133_v47 = vmax.f32 %v2101_v31, %v8035_v8  ;;  %v2290_v31 = vmax.f32 %v8135_v43, %v8157_v44  ;;  %v8160_v43 = vld [vmem:[#allocation131_spill] sm:$0xff] }
 0x362   :  { %v6608_v15 = vpop.permute.xlu1 %1676  ;;  %2850 = vrot.lane.b32.xlu0 %v6491_v22, %s4338_s0  ;;  %v8161_v44 = vld [vmem:[#allocation123_spill] sm:$0xff] }
 0x363   :  { %8154 = vst [vmem:[#allocation175_spill] sm:$0xff] %v6608_v15  ;;  %v1726_v15 = vmax.f32 %v8161_v44, %v8160_v43  ;;  %v8168_v44 = vld [vmem:[#allocation26_spill] sm:$0xff] }
 0x364   :  { %2852 = vrot.lane.b32.xlu1 %v6500_v20, %s4338_s0  ;;  %v2411_v34 = vpop.permute.xlu0 %2410 }
 0x366   :  { %v2413_v63 = vpop.permute.xlu1 %2412  ;;  %2566 = vrot.lane.b32.xlu0 %v8155_v29, %s4338_s0 }
 0x368   :  { %2568 = vrot.lane.b32.xlu1 %v8156_v7, %s4338_s0  ;;  %v6618_v45 = vpop.permute.xlu0 %2030 }
 0x36a   :  { %v6620_v49 = vpop.permute.xlu1 %2032  ;;  %2570 = vrot.lane.b32.xlu0 %v6189_v41, %s4338_s0 }
 0x36c   :  { %2572 = vrot.lane.b32.xlu1 %v6197_v33, %s4338_s0  ;;  %v6626_v22 = vpop.permute.xlu0 %2414 }
 0x36e   :  { %v6628_v20 = vpop.permute.xlu1 %2416  ;;  %2694 = vrot.lane.b32.xlu0 %v8155_v29, %s4339_s1 }
 0x370   :  { %2696 = vrot.lane.b32.xlu1 %v8156_v7, %s4339_s1  ;;  %v6634_v4 = vpop.permute.xlu0 %2034  ;;  %v2482_v7 = vmax.f32 %v2290_v31, %v2407_v42  ;;  %v8164_v31 = vld [vmem:[#allocation120_spill] sm:$0xff] }
 0x372   :  { %v6636_v54 = vpop.permute.xlu1 %2036  ;;  %2854 = vrot.lane.b32.xlu0 %v2130_v53, %s4338_s0  ;;  %v8158_v53 = vld [vmem:[#allocation180_spill] sm:$0xff] }
 0x374   :  { %2856 = vrot.lane.b32.xlu1 %v2131_v59, %s4338_s0  ;;  %v6640_v9 = vpop.permute.xlu0 %2418  ;;  %v2291_v59 = vmax.f32 %v8138_v62, %v8158_v53 }
 0x376   :  { %v6642_v57 = vpop.permute.xlu1 %2420  ;;  %2698 = vrot.lane.b32.xlu0 %v6189_v41, %s4339_s1  ;;  %v8159_v41 = vld [vmem:[#allocation181_spill] sm:$0xff]  ;;  %v2483_v60 = vmax.f32 %v2291_v59, %v2409_v32  ;;  %v8165_v32 = vld [vmem:[#allocation134_spill] sm:$0xff] }
 0x377   :  { %v1758_v59 = vmax.f32 %v1726_v15, %v8165_v32  ;;  %v6689_v32 = vld [vmem:[%s7343_s2] ss:$0 sm:$0xff] }
 0x378   :  { %2700 = vrot.lane.b32.xlu1 %v6197_v33, %s4339_s1  ;;  %v6648_v36 = vpop.permute.xlu0 %2038  ;;  %v2292_v33 = vmax.f32 %v8033_v27, %v8159_v41  ;;  %v8167_v41 = vld [vmem:[#allocation4_spill] sm:$0xff] }
 0x37a   :  { %v6652_v29 = vpop.permute.xlu1 %2040  ;;  %2858 = vrot.lane.b32.xlu0 %v2132_v37, %s4338_s0  ;;  %v8162_v37 = vld [vmem:[#allocation182_spill] sm:$0xff]  ;;  %v2484_v62 = vmax.f32 %v2292_v33, %v2411_v34  ;;  %v8171_v33 = vld [vmem:[#allocation5_spill] sm:$0xff] }
 0x37b   :  { %v2293_v10 = vmax.f32 %v8035_v8, %v8162_v37  ;;  %v8169_v8 = vld [vmem:[#allocation99_spill] sm:$0xff]  ;;  %v8173_v37 = vld [vmem:[#allocation9_spill] sm:$0xff] }
 0x37c   :  { %2860 = vrot.lane.b32.xlu1 %v2133_v47, %s4338_s0  ;;  %v6658_v30 = vpop.permute.xlu0 %2422  ;;  %v8163_v47 = vld [vmem:[#allocation8_spill] sm:$0xff]  ;;  %v6678_v34 = vmax.f32 %v8169_v8, %v8168_v44 }
 0x37d   :  { %v1727_v53 = vmax.f32 %v8164_v31, %v8163_v47  ;;  %v2485_v25 = vmax.f32 %v2293_v10, %v2413_v63  ;;  %v8172_v63 = vld [vmem:[#allocation63_spill] sm:$0xff]  ;;  %v8174_v47 = vld [vmem:[#allocation201_spill] sm:$0xff] }
 0x37e   :  { %v6662_v12 = vpop.permute.xlu1 %2424  ;;  %2982 = vrot.lane.b32.xlu0 %v2482_v7, %s4338_s0  ;;  %v8166_v7 = vld [vmem:[#allocation165_spill] sm:$0xff]  ;;  %8170 = vst [vmem:[#allocation77_spill] sm:$0xff] %v6678_v34 }
 0x37f   :  { %v2622_v43 = vmax.f32 %v8167_v41, %v8166_v7  ;;  %v1759_v10 = vmax.f32 %v1727_v53, %v8171_v33  ;;  %v8175_v7 = vld [vmem:[#allocation185_spill] sm:$0xff]  ;;  %v8176_v41 = vld [vmem:[#allocation103_spill] sm:$0xff]  ;;  %v8178_v53 = vld [vmem:[#allocation202_spill] sm:$0xff] }
 0x380   :  { %2984 = vrot.lane.b32.xlu1 %v2483_v60, %s4338_s0  ;;  %v2943_v42 = vpop.permute.xlu0 %2942  ;;  %v6693_v44 = vmax.f32 %v8176_v41, %v8175_v7  ;;  %v8183_v41 = vld [vmem:[#allocation111_spill] sm:$0xff] }
 0x381   :  { %v2750_v31 = vmax.f32 %v2622_v43, %v8174_v47 }
 0x382   :  { %v2945_v27 = vpop.permute.xlu1 %2944  ;;  %2986 = vrot.lane.b32.xlu0 %v2484_v62, %s4338_s0  ;;  %v2623_v62 = vmax.f32 %v8173_v37, %v8172_v63  ;;  %8177 = vst [vmem:[#allocation151_spill] sm:$0xff] %v6693_v44  ;;  %v8180_v63 = vld [vmem:[#allocation107_spill] sm:$0xff] }
 0x384   :  { %2988 = vrot.lane.b32.xlu1 %v2485_v25, %s4338_s0  ;;  %v2815_v60 = vpop.permute.xlu0 %2814  ;;  %v2751_v33 = vmax.f32 %v2623_v62, %v8178_v53  ;;  %v8182_v62 = vld [vmem:[#allocation39_spill] sm:$0xff] }
 0x385   :  { %v3039_v15 = vsel %vm3038_vm0, %v1758_v59, %v2815_v60  ;;  %v8179_v60 = vld [vmem:[#allocation35_spill] sm:$0xff] }
 0x386   :  { %v3072_v25 = vsel %vm3071_vm1, %v3039_v15, %v2943_v42  ;;  %v2817_v8 = vpop.permute.xlu1 %2816  ;;  %1678 = vrot.lane.b32.xlu0 %v6678_v34, %s4339_s1  ;;  %v6703_v37 = vmax.f32 %v8180_v63, %v8179_v60  ;;  %v8199_v34 = vld [vmem:[#allocation70_spill] sm:$0xff] }
 0x387   :  { %v3105_v43 = vsel %vm3104_vm2, %v3072_v25, %v2750_v31  ;;  %v3040_v59 = vsel %vm3038_vm0, %v1759_v10, %v2817_v8  ;;  %v6714_v31 = vmax.f32 %v8183_v41, %v8182_v62  ;;  %v2300_v25 = vmax.f32 %v8084_v35, %v5902_v1  ;;  %v8187_v41 = vld [vmem:[#allocation58_spill] sm:$0xff] }
 0x388   :  { %8181 = vst [vmem:[#allocation83_spill] sm:$0xff] %v6703_v37  ;;  %v3073_v47 = vsel %vm3071_vm1, %v3040_v59, %v2945_v27  ;;  %1680 = vrot.lane.b32.xlu1 %v6693_v44, %s4339_s1  ;;  %v6708_v42 = vpop.permute.xlu0 %2042  ;;  %v3144_v15 = vadd.f32 %v6689_v32, %v3105_v43  ;;  %v2301_v59 = vmax.f32 %v8085_v23, %v5908_v61  ;;  %v8190_v61 = vld [vmem:[#allocation101_spill] sm:$0xff] }
 0x389   :  { %v3106_v7 = vsel %vm3104_vm2, %v3073_v47, %v2751_v33  ;;  %8184 = vst [vmem:[#allocation32_spill] sm:$0xff] %v6714_v31  ;;  %v8185_v47 = vld [vmem:[#allocation16_spill] sm:$0xff]  ;;  %v8196_v44 = vld [vmem:[#allocation105_spill] sm:$0xff]  ;;  %v2625_v24 = vmax.f32 %v8200_v3, %v8199_v34 }
 0x38a   :  { %v6716_v10 = vpop.permute.xlu1 %2044  ;;  %1682 = vrot.lane.b32.xlu0 %v6703_v37, %s4339_s1  ;;  %v3145_v27 = vadd.f32 %v6689_v32, %v3106_v7  ;;  %v3176_v53 = vmax.f32 %v3144_v15, 0.0  ;;  %v8186_v7 = vld [vmem:[#allocation10_spill] sm:$0xff] }
 0x38b   :  { %v1728_v62 = vmax.f32 %v8186_v7, %v8185_v47  ;;  %v8195_v7 = vld [vmem:[#allocation189_spill] sm:$0xff] }
 0x38c   :  { %1684 = vrot.lane.b32.xlu1 %v6714_v31, %s4339_s1  ;;  %v2427_v8 = vpop.permute.xlu0 %2426  ;;  %v3177_v33 = vmax.f32 %v3145_v27, 0.0  ;;  %v8188_v27 = vld [vmem:[#allocation137_spill] sm:$0xff] }
 0x38d   :  { %v6725_v43 = vmax.f32 %v2300_v25, %v2427_v8  ;;  %v1729_v25 = vmax.f32 %v8188_v27, %v8187_v41  ;;  %v8189_v8 = vld [vmem:[#allocation188_spill] sm:$0xff] }
 0x38e   :  { %v2429_v60 = vpop.permute.xlu1 %2428  ;;  %2574 = vrot.lane.b32.xlu0 %v6302_v50, %s4338_s0  ;;  %v3208_v63 = vpack.c.bf16 %v3177_v33, %v3176_v53  ;;  %v6741_v31 = vmax.f32 %v8190_v61, %v8189_v8  ;;  %v8192_v53 = vld [vmem:[#allocation140_spill] sm:$0xff] }
 0x38f   :  { %v6733_v1 = vmax.f32 %v2301_v59, %v2429_v60  ;;  %v1760_v33 = vmax.f32 %v1728_v62, %v8192_v53  ;;  %v8193_v59 = vld [vmem:[#allocation2_spill] sm:$0xff]  ;;  %v8194_v60 = vld [vmem:[#allocation13_spill] sm:$0xff]  ;;  %v8198_v8 = vld [vmem:[#allocation12_spill] sm:$0xff] }
 0x390   :  { %2576 = vrot.lane.b32.xlu1 %v6312_v46, %s4338_s0  ;;  %4079 = vmatprep.mubr.bf16.mxu1 %v3208_v63  ;;  %v2947_v15 = vpop.permute.xlu0 %2946  ;;  %8191 = vst [vmem:[#allocation14_spill] sm:$0xff] %v6741_v31  ;;  %v2624_v47 = vmax.f32 %v8194_v60, %v8193_v59  ;;  %v6750_v63 = vmax.f32 %v8196_v44, %v8195_v7  ;;  %v8201_v62 = vld [vmem:[#allocation67_spill] sm:$0xff] }
 0x391   :  { %v2102_v41 = vmax.f32 %v6741_v31, %v6618_v45  ;;  %v1761_v61 = vmax.f32 %v1729_v25, %v8198_v8  ;;  %v8202_v45 = vld [vmem:[#allocation145_spill] sm:$0xff]  ;;  %v8203_v31 = vld [vmem:[#allocation18_spill] sm:$0xff]  ;;  %v8204_v25 = vld [vmem:[#allocation71_spill] sm:$0xff] }
 0x392   :  { %v2949_v37 = vpop.permute.xlu1 %2948  ;;  %2578 = vrot.lane.b32.xlu0 %v6342_v40, %s4338_s0  ;;  %8197 = vst [vmem:[#allocation81_spill] sm:$0xff] %v6750_v63  ;;  %v2752_v53 = vmax.f32 %v2624_v47, %v8201_v62  ;;  %v2103_v44 = vmax.f32 %v6750_v63, %v6620_v49  ;;  %v1730_v52 = vmax.f32 %v8203_v31, %v8202_v45  ;;  %v8205_v47 = vld [vmem:[#allocation98_spill] sm:$0xff]  ;;  %v8209_v45 = vld [vmem:[#allocation109_spill] sm:$0xff] }
 0x393   :  { %v2753_v8 = vmax.f32 %v2625_v24, %v8204_v25  ;;  %v8207_v62 = vld [vmem:[#allocation22_spill] sm:$0xff]  ;;  %v8208_v24 = vld [vmem:[#allocation193_spill] sm:$0xff] }
 0x394   :  { %2580 = vrot.lane.b32.xlu1 %v6353_v19, %s4338_s0  ;;  %v2819_v27 = vpop.permute.xlu0 %2818  ;;  %v8214_v63 = vld [vmem:[#allocation194_spill] sm:$0xff] }
 0x395   :  { %v3041_v59 = vsel %vm3038_vm0, %v1760_v33, %v2819_v27  ;;  %v2134_v33 = vmax.f32 %v2102_v41, %v8205_v47 }
 0x396   :  { %v3074_v60 = vsel %vm3071_vm1, %v3041_v59, %v2947_v15  ;;  %v2821_v7 = vpop.permute.xlu1 %2820  ;;  %2702 = vrot.lane.b32.xlu0 %v6302_v50, %s4339_s1  ;;  %v8206_v50 = vld [vmem:[#allocation24_spill] sm:$0xff] }
 0x397   :  { %v3107_v3 = vsel %vm3104_vm2, %v3074_v60, %v2752_v53  ;;  %v3042_v34 = vsel %vm3038_vm0, %v1761_v61, %v2821_v7  ;;  %v1731_v59 = vmax.f32 %v8207_v62, %v8206_v50  ;;  %v6781_v53 = vmax.f32 %v8209_v45, %v8208_v24  ;;  %v8210_v61 = vld [vmem:[#allocation102_spill] sm:$0xff]  ;;  %v8215_v50 = vld [vmem:[#allocation113_spill] sm:$0xff] }
 0x398   :  { %v3146_v27 = vadd.f32 %v6689_v32, %v3107_v3  ;;  %v3075_v49 = vsel %vm3071_vm1, %v3042_v34, %v2949_v37  ;;  %2704 = vrot.lane.b32.xlu1 %v6312_v46, %s4339_s1  ;;  %v2951_v15 = vpop.permute.xlu0 %2950  ;;  %v2135_v60 = vmax.f32 %v2103_v44, %v8210_v61  ;;  %v8211_v37 = vld [vmem:[#allocation144_spill] sm:$0xff]  ;;  %v8212_v46 = vld [vmem:[#allocation75_spill] sm:$0xff]  ;;  %v8213_v3 = vld [vmem:[#allocation21_spill] sm:$0xff]  ;;  %v6791_v62 = vmax.f32 %v8215_v50, %v8214_v63 }
 0x399   :  { %v3108_v31 = vsel %vm3104_vm2, %v3075_v49, %v2753_v8  ;;  %v1762_v25 = vmax.f32 %v1730_v52, %v8211_v37  ;;  %v2626_v34 = vmax.f32 %v8213_v3, %v8212_v46  ;;  %v2104_v8 = vmax.f32 %v6781_v53, %v6634_v4  ;;  %v8219_v37 = vld [vmem:[#allocation79_spill] sm:$0xff] }
 0x39a   :  { %v3147_v41 = vadd.f32 %v6689_v32, %v3108_v31  ;;  %v2953_v7 = vpop.permute.xlu1 %2952  ;;  %2862 = vrot.lane.b32.xlu0 %v2134_v33, %s4338_s0  ;;  %v3178_v49 = vmax.f32 %v3146_v27, 0.0  ;;  %v8216_v31 = vld [vmem:[#allocation20_spill] sm:$0xff]  ;;  %v8217_v33 = vld [vmem:[#allocation174_spill] sm:$0xff]  ;;  %v2105_v63 = vmax.f32 %v6791_v62, %v6636_v54  ;;  %v8222_v50 = vld [vmem:[#allocation203_spill] sm:$0xff] }
 0x39b   :  { %v1763_v45 = vmax.f32 %v1731_v59, %v8216_v31  ;;  %v2627_v52 = vmax.f32 %v8218_v0, %v8217_v33  ;;  %v2754_v18 = vmax.f32 %v2626_v34, %v8219_v37 }
 0x39c   :  { %v3179_v24 = vmax.f32 %v3147_v41, 0.0  ;;  %2864 = vrot.lane.b32.xlu1 %v2135_v60, %s4338_s0  ;;  %v2823_v44 = vpop.permute.xlu0 %2822  ;;  %v8220_v60 = vld [vmem:[#allocation149_spill] sm:$0xff]  ;;  %v8221_v41 = vld [vmem:[#allocation31_spill] sm:$0xff] }
 0x39d   :  { %v3043_v46 = vsel %vm3038_vm0, %v1762_v25, %v2823_v44  ;;  %v1732_v59 = vmax.f32 %v8221_v41, %v8220_v60  ;;  %v2755_v31 = vmax.f32 %v2627_v52, %v8222_v50  ;;  %v2136_v25 = vmax.f32 %v2104_v8, %v8060_v16  ;;  %v8225_v52 = vld [vmem:[#allocation186_spill] sm:$0xff]  ;;  %v8230_v60 = vld [vmem:[#allocation29_spill] sm:$0xff]  ;;  %v8231_v50 = vld [vmem:[#allocation191_spill] sm:$0xff] }
 0x39e   :  { %v3209_v3 = vpack.c.bf16 %v3179_v24, %v3178_v49  ;;  %v3076_v4 = vsel %vm3071_vm1, %v3043_v46, %v2951_v15  ;;  %v2825_v27 = vpop.permute.xlu1 %2824  ;;  %2706 = vrot.lane.b32.xlu0 %v6342_v40, %s4339_s1  ;;  %v8223_v49 = vld [vmem:[#allocation171_spill] sm:$0xff]  ;;  %v8224_v24 = vld [vmem:[#allocation30_spill] sm:$0xff] }
 0x39f   :  { %v3109_v0 = vsel %vm3104_vm2, %v3076_v4, %v2754_v18  ;;  %v3044_v34 = vsel %vm3038_vm0, %v1763_v45, %v2825_v27  ;;  %v1733_v44 = vmax.f32 %v8224_v24, %v8223_v49  ;;  %v2294_v18 = vmax.f32 %v8205_v47, %v8225_v52  ;;  %v8226_v45 = vld [vmem:[#allocation110_spill] sm:$0xff]  ;;  %v8229_v27 = vld [vmem:[#allocation205_spill] sm:$0xff]  ;;  %v8233_v49 = vld [vmem:[#allocation207_spill] sm:$0xff] }
 0x3a0   :  { %v3077_v54 = vsel %vm3071_vm1, %v3044_v34, %v2953_v7  ;;  %2708 = vrot.lane.b32.xlu1 %v6353_v19, %s4339_s1  ;;  %4080 = vmatmul.mubr.bf16.vlgmr.msra.gmra.mrb[64].mxu1 %v3209_v3  ;;  %v2955_v15 = vpop.permute.xlu0 %2954  ;;  %v3148_v40 = vadd.f32 %v6689_v32, %v3109_v0  ;;  %v2137_v37 = vmax.f32 %v2105_v63, %v8226_v45  ;;  %v8227_v19 = vld [vmem:[#allocation187_spill] sm:$0xff]  ;;  %v8228_v3 = vld [vmem:[#allocation148_spill] sm:$0xff]  ;;  %v8234_v24 = vld [vmem:[#allocation33_spill] sm:$0xff] }
 0x3a1   :  { %v3110_v33 = vsel %vm3104_vm2, %v3077_v54, %v2755_v31  ;;  %v2295_v46 = vmax.f32 %v8210_v61, %v8227_v19  ;;  %v1764_v4 = vmax.f32 %v1732_v59, %v8228_v3  ;;  %v2628_v41 = vmax.f32 %v8230_v60, %v8229_v27  ;;  %v8236_v19 = vld [vmem:[#allocation192_spill] sm:$0xff]  ;;  %v8239_v27 = vld [vmem:[#allocation210_spill] sm:$0xff] }
 0x3a2   :  { %v2957_v8 = vpop.permute.xlu1 %2956  ;;  %2866 = vrot.lane.b32.xlu0 %v2136_v25, %s4338_s0  ;;  %v3149_v7 = vadd.f32 %v6689_v32, %v3110_v33  ;;  %v2296_v31 = vmax.f32 %v8060_v16, %v8231_v50  ;;  %v2486_v47 = vmax.f32 %v2294_v18, %v6626_v22  ;;  %v3180_v0 = vmax.f32 %v3148_v40, 0.0  ;;  %v8232_v25 = vld [vmem:[#allocation28_spill] sm:$0xff]  ;;  %v8235_v33 = vld [vmem:[#allocation209_spill] sm:$0xff] }
 0x3a3   :  { %v1765_v54 = vmax.f32 %v1733_v44, %v8232_v25  ;;  %v2629_v61 = vmax.f32 %v8234_v24, %v8233_v49  ;;  %v2756_v59 = vmax.f32 %v2628_v41, %v8235_v33  ;;  %v2297_v3 = vmax.f32 %v8226_v45, %v8236_v19  ;;  %v8238_v44 = vld [vmem:[#allocation34_spill] sm:$0xff]  ;;  %v8244_v49 = vld [vmem:[#allocation37_spill] sm:$0xff]  ;;  %v8246_v33 = vld [vmem:[#allocation115_spill] sm:$0xff] }
 0x3a4   :  { %2868 = vrot.lane.b32.xlu1 %v2137_v37, %s4338_s0  ;;  %v2827_v63 = vpop.permute.xlu0 %2826  ;;  %v3181_v34 = vmax.f32 %v3149_v7, 0.0  ;;  %v2487_v16 = vmax.f32 %v2295_v46, %v6628_v20  ;;  %v8237_v37 = vld [vmem:[#allocation40_spill] sm:$0xff]  ;;  %v2488_v50 = vmax.f32 %v2296_v31, %v6640_v9 }
 0x3a5   :  { %v3045_v52 = vsel %vm3038_vm0, %v1764_v4, %v2827_v63  ;;  %v1734_v7 = vmax.f32 %v8238_v44, %v8237_v37  ;;  %v2757_v60 = vmax.f32 %v2629_v61, %v8239_v27  ;;  %v8240_v46 = vld [vmem:[#allocation176_spill] sm:$0xff]  ;;  %v8245_v61 = vld [vmem:[#allocation195_spill] sm:$0xff] }
 0x3a6   :  { %v3078_v22 = vsel %vm3071_vm1, %v3045_v52, %v2955_v15  ;;  %v2829_v18 = vpop.permute.xlu1 %2828  ;;  %2990 = vrot.lane.b32.xlu0 %v2486_v47, %s4338_s0  ;;  %v3210_v40 = vpack.c.bf16 %v3181_v34, %v3180_v0  ;;  %v8241_v47 = vld [vmem:[#allocation38_spill] sm:$0xff]  ;;  %v2489_v34 = vmax.f32 %v2297_v3, %v6642_v57  ;;  %v8242_v31 = vld [vmem:[#allocation152_spill] sm:$0xff]  ;;  %v8250_v37 = vld [vmem:[#allocation27_spill] sm:$0xff] }
 0x3a7   :  { %v3111_v41 = vsel %vm3104_vm2, %v3078_v22, %v2756_v59  ;;  %v3046_v4 = vsel %vm3038_vm0, %v1765_v54, %v2829_v18  ;;  %v1735_v63 = vmax.f32 %v8241_v47, %v8240_v46  ;;  %v8243_v54 = vld [vmem:[#allocation91_spill] sm:$0xff]  ;;  %v6863_v59 = vmax.f32 %v8246_v33, %v8245_v61  ;;  %v8247_v57 = vld [vmem:[#allocation36_spill] sm:$0xff]  ;;  %v8249_v18 = vld [vmem:[#allocation41_spill] sm:$0xff] }
 0x3a8   :  { %v3079_v45 = vsel %vm3071_vm1, %v3046_v4, %v2957_v8  ;;  %2992 = vrot.lane.b32.xlu1 %v2487_v16, %s4338_s0  ;;  %4083 = vmatprep.mubr.bf16.mxu1 %v3210_v40  ;;  %v2959_v20 = vpop.permute.xlu0 %2958  ;;  %v3150_v15 = vadd.f32 %v6689_v32, %v3111_v41  ;;  %v1766_v8 = vmax.f32 %v1734_v7, %v8242_v31  ;;  %v8248_v22 = vld [vmem:[#allocation95_spill] sm:$0xff]  ;;  %v8251_v27 = vld [vmem:[#allocation196_spill] sm:$0xff]  ;;  %v8256_v31 = vld [vmem:[#allocation54_spill] sm:$0xff] }
 0x3a9   :  { %v3112_v0 = vsel %vm3104_vm2, %v3079_v45, %v2757_v60  ;;  %v2630_v24 = vmax.f32 %v8244_v49, %v8243_v54  ;;  %v1767_v3 = vmax.f32 %v1735_v63, %v8247_v57  ;;  %v2631_v40 = vmax.f32 %v8249_v18, %v8248_v22  ;;  %v8252_v60 = vld [vmem:[#allocation119_spill] sm:$0xff]  ;;  %v8258_v61 = vld [vmem:[#allocation49_spill] sm:$0xff]  ;;  %v8262_v18 = vld [vmem:[#allocation156_spill] sm:$0xff] }
 0x3aa   :  { %v2961_v25 = vpop.permute.xlu1 %2960  ;;  %2994 = vrot.lane.b32.xlu0 %v2488_v50, %s4338_s0  ;;  %v3151_v9 = vadd.f32 %v6689_v32, %v3112_v0  ;;  %v3182_v19 = vmax.f32 %v3150_v15, 0.0  ;;  %v6873_v41 = vmax.f32 %v8252_v60, %v8251_v27  ;;  %v8253_v15 = vld [vmem:[#allocation157_spill] sm:$0xff]  ;;  %v8254_v46 = vld [vmem:[#allocation43_spill] sm:$0xff] }
 0x3ab   :  { %v2758_v44 = vmax.f32 %v2630_v24, %v8250_v37  ;;  %v1736_v47 = vmax.f32 %v8254_v46, %v8253_v15  ;;  %v8255_v63 = vld [vmem:[#allocation211_spill] sm:$0xff]  ;;  %v8263_v37 = vld [vmem:[#allocation106_spill] sm:$0xff]  ;;  %v8267_v46 = vld [vmem:[#allocation48_spill] sm:$0xff] }
 0x3ac   :  { %2996 = vrot.lane.b32.xlu1 %v2489_v34, %s4338_s0  ;;  %v2831_v52 = vpop.permute.xlu0 %2830  ;;  %v3183_v16 = vmax.f32 %v3151_v9, 0.0  ;;  %v2759_v0 = vmax.f32 %v2631_v40, %v8255_v63  ;;  %v8259_v33 = vld [vmem:[#allocation47_spill] sm:$0xff]  ;;  %v8266_v15 = vld [vmem:[#allocation190_spill] sm:$0xff] }
 0x3ad   :  { %v3047_v7 = vsel %vm3038_vm0, %v1766_v8, %v2831_v52  ;;  %v8257_v8 = vld [vmem:[#allocation132_spill] sm:$0xff]  ;;  %v1737_v52 = vmax.f32 %v8259_v33, %v8258_v61  ;;  %v8261_v57 = vld [vmem:[#allocation135_spill] sm:$0xff]  ;;  %v1768_v40 = vmax.f32 %v1736_v47, %v8262_v18  ;;  %v2633_v63 = vmax.f32 %v8267_v46, %v8266_v15  ;;  %v8270_v61 = vld [vmem:[#allocation50_spill] sm:$0xff] }
 0x3ae   :  { %v3080_v4 = vsel %vm3071_vm1, %v3047_v7, %v2959_v20  ;;  %v2833_v50 = vpop.permute.xlu1 %2832  ;;  %1686 = vrot.lane.b32.xlu0 %v6863_v59, %s4339_s1  ;;  %v3211_v45 = vpack.c.bf16 %v3183_v16, %v3182_v19  ;;  %v6885_v54 = vmax.f32 %v8257_v8, %v8256_v31  ;;  %v8260_v16 = vld [vmem:[#allocation55_spill] sm:$0xff]  ;;  %v8271_v33 = vld [vmem:[#allocation128_spill] sm:$0xff]  ;;  %v8272_v18 = vld [vmem:[#allocation57_spill] sm:$0xff] }
 0x3af   :  { %v3113_v34 = vsel %vm3104_vm2, %v3080_v4, %v2758_v44  ;;  %v3048_v9 = vsel %vm3038_vm0, %v1767_v3, %v2833_v50  ;;  %v6896_v3 = vmax.f32 %v8261_v57, %v8260_v16  ;;  %v8264_v44 = vld [vmem:[#allocation44_spill] sm:$0xff]  ;;  %v8265_v50 = vld [vmem:[#allocation45_spill] sm:$0xff] }
 0x3b0   :  { %v3081_v20 = vsel %vm3071_vm1, %v3048_v9, %v2961_v25  ;;  %1688 = vrot.lane.b32.xlu1 %v6873_v41, %s4339_s1  ;;  %4084 = vmatmul.mubr.bf16.gmra.mrb[68].mxu1 %v3211_v45  ;;  %v2963_v49 = vpop.permute.xlu0 %2962  ;;  %v3152_v24 = vadd.f32 %v6689_v32, %v3113_v34  ;;  %v2632_v7 = vmax.f32 %v8264_v44, %v8263_v37  ;;  %v8277_v15 = vld [vmem:[#allocation52_spill] sm:$0xff] }
 0x3b1   :  { %v3114_v19 = vsel %vm3104_vm2, %v3081_v20, %v2759_v0  ;;  %v1769_v45 = vmax.f32 %v1737_v52, %v8265_v50  ;;  %v8268_v0 = vld [vmem:[#allocation212_spill] sm:$0xff]  ;;  %v8269_v20 = vld [vmem:[#allocation161_spill] sm:$0xff]  ;;  %v2634_v46 = vmax.f32 %v8277_v15, %v6385_v26 }
 0x3b2   :  { %v2965_v22 = vpop.permute.xlu1 %2964  ;;  %1690 = vrot.lane.b32.xlu0 %v6885_v54, %s4339_s1  ;;  %v3153_v25 = vadd.f32 %v6689_v32, %v3114_v19  ;;  %v3184_v60 = vmax.f32 %v3152_v24, 0.0  ;;  %v2760_v34 = vmax.f32 %v2632_v7, %v8268_v0  ;;  %v1738_v24 = vmax.f32 %v8270_v61, %v8269_v20  ;;  %v8274_v7 = vld [vmem:[#allocation197_spill] sm:$0xff]  ;;  %v8276_v50 = vld [vmem:[#allocation160_spill] sm:$0xff]  ;;  %v8279_v0 = vld [vmem:[#allocation122_spill] sm:$0xff] }
 0x3b3   :  { %v2761_v19 = vmax.f32 %v2633_v63, %v8271_v33  ;;  %v8278_v63 = vld [vmem:[#allocation198_spill] sm:$0xff]  ;;  %v8280_v20 = vld [vmem:[#allocation53_spill] sm:$0xff]  ;;  %v2762_v26 = vmax.f32 %v2634_v46, %v6401_v13 }
 0x3b4   :  { %1692 = vrot.lane.b32.xlu1 %v6896_v3, %s4339_s1  ;;  %v2835_v27 = vpop.permute.xlu0 %2834  ;;  %v3185_v4 = vmax.f32 %v3153_v25, 0.0  ;;  %v8288_v15 = vld [vmem:[#allocation133_spill] sm:$0xff] }
 0x3b5   :  { %v3049_v9 = vsel %vm3038_vm0, %v1768_v40, %v2835_v27  ;;  %v8273_v40 = vld [vmem:[#allocation51_spill] sm:$0xff]  ;;  %v8275_v27 = vld [vmem:[#allocation117_spill] sm:$0xff] }
 0x3b6   :  { %v3082_v47 = vsel %vm3071_vm1, %v3049_v9, %v2963_v49  ;;  %v2837_v31 = vpop.permute.xlu1 %2836  ;;  %2582 = vrot.lane.b32.xlu0 %v6455_v51, %s4338_s0  ;;  %v3212_v8 = vpack.c.bf16 %v3185_v4, %v3184_v60  ;;  %v1739_v37 = vmax.f32 %v8273_v40, %v8272_v18  ;;  %v6928_v60 = vmax.f32 %v8275_v27, %v8274_v7  ;;  %v8283_v40 = vld [vmem:[#allocation3_spill] sm:$0xff]  ;;  %v8285_v27 = vld [vmem:[#allocation125_spill] sm:$0xff] }
 0x3b7   :  { %v3115_v52 = vsel %vm3104_vm2, %v3082_v47, %v2760_v34  ;;  %v3050_v16 = vsel %vm3038_vm0, %v1769_v45, %v2837_v31  ;;  %v1770_v45 = vmax.f32 %v1738_v24, %v8276_v50  ;;  %v6938_v34 = vmax.f32 %v8279_v0, %v8278_v63  ;;  %v8281_v24 = vld [vmem:[#allocation56_spill] sm:$0xff]  ;;  %v8289_v63 = vld [vmem:[#allocation118_spill] sm:$0xff] }
 0x3b8   :  { %v3083_v57 = vsel %vm3071_vm1, %v3050_v16, %v2965_v22  ;;  %2584 = vrot.lane.b32.xlu1 %v6461_v14, %s4338_s0  ;;  %4087 = vmatprep.mubr.bf16.mxu1 %v3212_v8  ;;  %v2967_v49 = vpop.permute.xlu0 %2966  ;;  %v3154_v25 = vadd.f32 %v6689_v32, %v3115_v52  ;;  %v2106_v9 = vmax.f32 %v6928_v60, %v6648_v36 }
 0x3b9   :  { %v3116_v44 = vsel %vm3104_vm2, %v3083_v57, %v2761_v19  ;;  %v1771_v61 = vmax.f32 %v1739_v37, %v8280_v20  ;;  %v2635_v33 = vmax.f32 %v8281_v24, %v6391_v21  ;;  %v2107_v52 = vmax.f32 %v6938_v34, %v6652_v29  ;;  %v8292_v20 = vld [vmem:[#allocation200_spill] sm:$0xff] }
 0x3ba   :  { %v2969_v4 = vpop.permute.xlu1 %2968  ;;  %2586 = vrot.lane.b32.xlu0 %v6481_v56, %s4338_s0  ;;  %v3155_v22 = vadd.f32 %v6689_v32, %v3116_v44  ;;  %v3186_v31 = vmax.f32 %v3154_v25, 0.0  ;;  %v8282_v25 = vld [vmem:[#allocation163_spill] sm:$0xff]  ;;  %v8284_v44 = vld [vmem:[#allocation114_spill] sm:$0xff] }
 0x3bb   :  { %v1740_v18 = vmax.f32 %v8282_v25, %v6356_v39  ;;  %v2763_v37 = vmax.f32 %v2635_v33, %v8283_v40  ;;  %v2138_v7 = vmax.f32 %v2106_v9, %v8284_v44  ;;  %v2139_v0 = vmax.f32 %v2107_v52, %v8289_v63  ;;  %v8296_v25 = vld [vmem:[#allocation64_spill] sm:$0xff]  ;;  %v8297_v40 = vld [vmem:[#allocation62_spill] sm:$0xff] }
 0x3bc   :  { %2588 = vrot.lane.b32.xlu1 %v6494_v28, %s4338_s0  ;;  %v2839_v47 = vpop.permute.xlu0 %2838  ;;  %v3187_v8 = vmax.f32 %v3155_v22, 0.0  ;;  %v8286_v22 = vld [vmem:[#allocation164_spill] sm:$0xff] }
 0x3bd   :  { %v3051_v19 = vsel %vm3038_vm0, %v1770_v45, %v2839_v47  ;;  %v1741_v39 = vmax.f32 %v8286_v22, %v8285_v27  ;;  %v8287_v45 = vld [vmem:[#allocation199_spill] sm:$0xff] }
 0x3be   :  { %v3084_v36 = vsel %vm3071_vm1, %v3051_v19, %v2967_v49  ;;  %v2841_v16 = vpop.permute.xlu1 %2840  ;;  %2710 = vrot.lane.b32.xlu0 %v6455_v51, %s4339_s1  ;;  %v3213_v57 = vpack.c.bf16 %v3187_v8, %v3186_v31  ;;  %v6969_v46 = vmax.f32 %v8288_v15, %v8287_v45  ;;  %v8291_v31 = vld [vmem:[#allocation60_spill] sm:$0xff]  ;;  %v8300_v22 = vld [vmem:[#allocation59_spill] sm:$0xff] }
 0x3bf   :  { %v3117_v21 = vsel %vm3104_vm2, %v3084_v36, %v2762_v26  ;;  %v3052_v13 = vsel %vm3038_vm0, %v1771_v61, %v2841_v16  ;;  %v2636_v8 = vmax.f32 %v8291_v31, %v6453_v5  ;;  %v8293_v61 = vld [vmem:[#allocation136_spill] sm:$0xff]  ;;  %v8294_v36 = vld [vmem:[#allocation61_spill] sm:$0xff]  ;;  %v8303_v31 = vld [vmem:[#allocation42_spill] sm:$0xff] }
 0x3c0   :  { %v3085_v29 = vsel %vm3071_vm1, %v3052_v13, %v2969_v4  ;;  %2712 = vrot.lane.b32.xlu1 %v6461_v14, %s4339_s1  ;;  %4088 = vmatmul.mubr.bf16.gmra.mrb[72].mxu1 %v3213_v57  ;;  %v2971_v49 = vpop.permute.xlu0 %2970  ;;  %v3156_v51 = vadd.f32 %v6689_v32, %v3117_v21  ;;  %v8290_v4 = vld [vmem:[#allocation124_spill] sm:$0xff]  ;;  %v6979_v24 = vmax.f32 %v8293_v61, %v8292_v20  ;;  %v8295_v57 = vld [vmem:[#allocation139_spill] sm:$0xff] }
 0x3c1   :  { %v3118_v50 = vsel %vm3104_vm2, %v3085_v29, %v2763_v37  ;;  %v1772_v47 = vmax.f32 %v1740_v18, %v8290_v4  ;;  %v2108_v33 = vmax.f32 %v6969_v46, %v6708_v42  ;;  %v1773_v16 = vmax.f32 %v1741_v39, %v8294_v36  ;;  %v8298_v29 = vld [vmem:[#allocation129_spill] sm:$0xff] }
 0x3c2   :  { %v2973_v9 = vpop.permute.xlu1 %2972  ;;  %2870 = vrot.lane.b32.xlu0 %v2138_v7, %s4338_s0  ;;  %v3157_v14 = vadd.f32 %v6689_v32, %v3118_v50  ;;  %v3188_v19 = vmax.f32 %v3156_v51, 0.0  ;;  %v2637_v18 = vmax.f32 %v8296_v25, %v8295_v57  ;;  %v2764_v37 = vmax.f32 %v2636_v8, %v8297_v40  ;;  %v8299_v51 = vld [vmem:[#allocation7_spill] sm:$0xff]  ;;  %v8307_v57 = vld [vmem:[#allocation126_spill] sm:$0xff] }
 0x3c3   :  { %v2109_v21 = vmax.f32 %v6979_v24, %v6716_v10  ;;  %v1742_v27 = vmax.f32 %v8299_v51, %v8298_v29  ;;  %v2140_v15 = vmax.f32 %v2108_v33, %v8084_v35  ;;  %v2298_v8 = vmax.f32 %v8284_v44, %v8303_v31  ;;  %v8305_v33 = vld [vmem:[#allocation68_spill] sm:$0xff] }
 0x3c4   :  { %2872 = vrot.lane.b32.xlu1 %v2139_v0, %s4338_s0  ;;  %v2843_v26 = vpop.permute.xlu0 %2842  ;;  %v3189_v52 = vmax.f32 %v3157_v14, 0.0  ;;  %v2765_v39 = vmax.f32 %v2637_v18, %v8300_v22  ;;  %v8301_v0 = vld [vmem:[#allocation138_spill] sm:$0xff]  ;;  %v8308_v18 = vld [vmem:[#allocation72_spill] sm:$0xff] }
 0x3c5   :  { %v3053_v5 = vsel %vm3038_vm0, %v1772_v47, %v2843_v26  ;;  %v8302_v14 = vld [vmem:[#allocation66_spill] sm:$0xff]  ;;  %v2141_v20 = vmax.f32 %v2109_v21, %v8085_v23  ;;  %v2638_v26 = vmax.f32 %v8305_v33, %v6516_v17  ;;  %v2490_v36 = vmax.f32 %v2298_v8, %v6658_v30  ;;  %v8314_v31 = vld [vmem:[#allocation80_spill] sm:$0xff]  ;;  %v8315_v8 = vld [vmem:[#allocation143_spill] sm:$0xff] }
 0x3c6   :  { %v3086_v13 = vsel %vm3071_vm1, %v3053_v5, %v2971_v49  ;;  %v2845_v42 = vpop.permute.xlu1 %2844  ;;  %2714 = vrot.lane.b32.xlu0 %v6481_v56, %s4339_s1  ;;  %v3214_v7 = vpack.c.bf16 %v3189_v52, %v3188_v19  ;;  %v1743_v4 = vmax.f32 %v8302_v14, %v8301_v0  ;;  %v8306_v19 = vld [vmem:[#allocation46_spill] sm:$0xff]  ;;  %v2639_v40 = vmax.f32 %v8308_v18, %v6520_v55  ;;  %v8312_v14 = vld [vmem:[#allocation169_spill] sm:$0xff] }
 0x3c7   :  { %v3119_v50 = vsel %vm3104_vm2, %v3086_v13, %v2764_v37  ;;  %v3054_v45 = vsel %vm3038_vm0, %v1773_v16, %v2845_v42  ;;  %v2299_v52 = vmax.f32 %v8289_v63, %v8306_v19  ;;  %v2766_v37 = vmax.f32 %v2638_v26, %v6529_v6  ;;  %v8309_v13 = vld [vmem:[#allocation172_spill] sm:$0xff] }
 0x3c8   :  { %v3087_v10 = vsel %vm3071_vm1, %v3054_v45, %v2973_v9  ;;  %2716 = vrot.lane.b32.xlu1 %v6494_v28, %s4339_s1  ;;  %4091 = vmatprep.mubr.bf16.mxu1 %v3214_v7  ;;  %v2975_v49 = vpop.permute.xlu0 %2974  ;;  %v3158_v56 = vadd.f32 %v6689_v32, %v3119_v50  ;;  %v8304_v28 = vld [vmem:[#allocation65_spill] sm:$0xff]  ;;  %v1775_v25 = vmax.f32 %v1743_v4, %v8307_v57 }
 0x3c9   :  { %v3120_v47 = vsel %vm3104_vm2, %v3087_v10, %v2765_v39  ;;  %v1774_v61 = vmax.f32 %v1742_v27, %v8304_v28  ;;  %v2491_v17 = vmax.f32 %v2299_v52, %v6662_v12  ;;  %v1744_v42 = vmax.f32 %v8309_v13, %v6497_v58  ;;  %v4329_v27 = vld [vmem:[%s7344_s5] sm:$0xff]   ;;  %v8310_v58 = vld [vmem:[#allocation173_spill] sm:$0xff]  ;;  %v4330_v39 = vld [vmem:[%s7344_s5 + $0x8] sm:$0xff]  }
 0x3ca   :  { %v2977_v35 = vpop.permute.xlu1 %2976  ;;  %2874 = vrot.lane.b32.xlu0 %v2140_v15, %s4338_s0  ;;  %v3159_v9 = vadd.f32 %v6689_v32, %v3120_v47  ;;  %v3190_v16 = vmax.f32 %v3158_v56, 0.0  ;;  %v2767_v7 = vmax.f32 %v2639_v40, %v6532_v38  ;;  %v1745_v22 = vmax.f32 %v8310_v58, %v6504_v11  ;;  %4111 = vmatprep.subr.bf16.mxu1 %v4329_v27  ;;  %v8311_v10 = vld [vmem:[#allocation76_spill] sm:$0xff]  ;;  %v8313_v47 = vld [vmem:[#allocation141_spill] sm:$0xff]  ;;  %v8316_v28 = vld [vmem:[#allocation162_spill] sm:$0xff] }
 0x3cb   :  { %v1776_v15 = vmax.f32 %v1744_v42, %v6474_v48  ;;  %4112 = vmatpush3.bf16.msra.mxu1 %v4329_v27  ;;  %v2641_v48 = vmax.f32 %v8314_v31, %v8313_v47  ;;  %v8320_v27 = vld [vmem:[#allocation178_spill] sm:$0xff]  ;;  %v8328_v47 = vld [vmem:[#allocation88_spill] sm:$0xff] }
 0x3cc   :  { %2876 = vrot.lane.b32.xlu1 %v2141_v20, %s4338_s0  ;;  %v2847_v44 = vpop.permute.xlu0 %2846  ;;  %v3191_v23 = vmax.f32 %v3159_v9, 0.0  ;;  %4113 = vmatprep.subr.bf16.mxu1 %v4330_v39  ;;  %v1777_v4 = vmax.f32 %v1745_v22, %v8312_v14  ;;  %v8327_v14 = vld [vmem:[#allocation170_spill] sm:$0xff] }
 0x3cd   :  { %v3055_v5 = vsel %vm3038_vm0, %v1774_v61, %v2847_v44  ;;  %v2769_v61 = vmax.f32 %v2641_v48, %v8316_v28  ;;  %v4332_v44 = vld [vmem:[%s7344_s5 + $0x18] sm:$0xff]  }
 0x3ce   :  { %v3088_v63 = vsel %vm3071_vm1, %v3055_v5, %v2975_v49  ;;  %v2849_v21 = vpop.permute.xlu1 %2848  ;;  %2998 = vrot.lane.b32.xlu0 %v2490_v36, %s4338_s0  ;;  %v3215_v30 = vpack.c.bf16 %v3191_v23, %v3190_v16  ;;  %v2640_v49 = vmax.f32 %v8311_v10, %v6573_v2  ;;  %v8324_v10 = vld [vmem:[#allocation84_spill] sm:$0xff] }
 0x3cf   :  { %v3121_v29 = vsel %vm3104_vm2, %v3088_v63, %v2766_v37  ;;  %v3056_v55 = vsel %vm3038_vm0, %v1775_v25, %v2849_v21  ;;  %4114 = vmatpush3.bf16.msra.mxu1 %v4330_v39  ;;  %v4333_v37 = vld [vmem:[%s7344_s5 + $0x20] sm:$0xff]   ;;  %v4334_v21 = vld [vmem:[%s7344_s5 + $0x28] sm:$0xff]  }
 0x3d0   :  { %v3089_v6 = vsel %vm3071_vm1, %v3056_v55, %v2977_v35  ;;  %3000 = vrot.lane.b32.xlu1 %v2491_v17, %s4338_s0  ;;  %4092 = vmatmul.mubr.bf16.gmra.mrb[76].mxu1 %v3215_v30  ;;  %v2979_v12 = vpop.permute.xlu0 %2978  ;;  %v3160_v51 = vadd.f32 %v6689_v32, %v3121_v29  ;;  %v2768_v20 = vmax.f32 %v2640_v49, %v8315_v8  ;;  %v8317_v29 = vld [vmem:[#allocation73_spill] sm:$0xff]  ;;  %v8322_v39 = vld [vmem:[#allocation90_spill] sm:$0xff] }
 0x3d1   :  { %v3122_v38 = vsel %vm3104_vm2, %v3089_v6, %v2767_v7  ;;  %v8318_v55 = vld [vmem:[#allocation177_spill] sm:$0xff] }
 0x3d2   :  { %v2981_v50 = vpop.permute.xlu1 %2980  ;;  %3002 = vrot.lane.b32.xlu0 %v6725_v43, %s4338_s0  ;;  %v3161_v45 = vadd.f32 %v6689_v32, %v3122_v38  ;;  %v3192_v56 = vmax.f32 %v3160_v51, 0.0  ;;  %v4331_v43 = vld [vmem:[%s7344_s5 + $0x10] sm:$0xff]   ;;  %v1746_v6 = vmax.f32 %v8318_v55, %v8317_v29  ;;  %v8319_v51 = vld [vmem:[#allocation142_spill] sm:$0xff] }
 0x3d3   :  { %4115 = vmatprep.subr.bf16.mxu1 %v4331_v43  ;;  %v1747_v58 = vmax.f32 %v8320_v27, %v8319_v51  ;;  %v8321_v38 = vld [vmem:[#allocation150_spill] sm:$0xff] }
 0x3d4   :  { %3004 = vrot.lane.b32.xlu1 %v6733_v1, %s4338_s0  ;;  %v2851_v11 = vpop.permute.xlu0 %2850  ;;  %v3193_v0 = vmax.f32 %v3161_v45, 0.0  ;;  %4116 = vmatpush3.bf16.msra.mxu1 %v4331_v43  ;;  %v8323_v45 = vld [vmem:[#allocation69_spill] sm:$0xff] }
 0x3d5   :  { %v3057_v2 = vsel %vm3038_vm0, %v1776_v15, %v2851_v11  ;;  %4117 = vmatprep.subr.bf16.mxu1 %v4332_v44  ;;  %v1778_v15 = vmax.f32 %v1746_v6, %v8323_v45  ;;  %v8325_v11 = vld [vmem:[#allocation175_spill] sm:$0xff] }
 0x3d6   :  { %v3090_v35 = vsel %vm3071_vm1, %v3057_v2, %v2979_v12  ;;  %v2853_v9 = vpop.permute.xlu1 %2852  ;;  %v3216_v1 = vpack.c.bf16 %v3193_v0, %v3192_v56  ;;  %v8326_v0 = vld [vmem:[#allocation94_spill] sm:$0xff] }
 0x3d7   :  { %v3123_v33 = vsel %vm3104_vm2, %v3090_v35, %v2768_v20  ;;  %v3058_v26 = vsel %vm3038_vm0, %v1777_v4, %v2853_v9  ;;  %v1749_v43 = vmax.f32 %v8326_v0, %v8325_v11  ;;  %v1779_v4 = vmax.f32 %v1747_v58, %v8327_v14  ;;  %v8329_v2 = vld [vmem:[#allocation146_spill] sm:$0xff] }
 0x3d8   :  { %v3091_v19 = vsel %vm3071_vm1, %v3058_v26, %v2981_v50  ;;  %4095 = vmatprep.mubr.bf16.mxu1 %v3216_v1  ;;  %v2567_v52 = vpop.permute.xlu0 %2566  ;;  %v3162_v36 = vadd.f32 %v6689_v32, %v3123_v33  ;;  %4118 = vmatpush3.bf16.msra.mxu1 %v4332_v44  ;;  %v1748_v50 = vmax.f32 %v8322_v39, %v8321_v38  ;;  %v8330_v1 = vld [vmem:[#allocation92_spill] sm:$0xff] }
 0x3d9   :  { %v3124_v16 = vsel %vm3104_vm2, %v3091_v19, %v2769_v61  ;;  %4119 = vmatprep.subr.bf16.mxu1 %v4333_v37  ;;  %v2642_v49 = vmax.f32 %v8324_v10, %v2567_v52  ;;  %v8331_v52 = vld [vmem:[#allocation147_spill] sm:$0xff] }
 0x3da   :  { %v2569_v23 = vpop.permute.xlu1 %2568  ;;  %v3163_v57 = vadd.f32 %v6689_v32, %v3124_v16  ;;  %v3194_v18 = vmax.f32 %v3162_v36, 0.0  ;;  %v1780_v35 = vmax.f32 %v1748_v50, %v8329_v2  ;;  %v1781_v36 = vmax.f32 %v1749_v43, %v8331_v52  ;;  %v8334_v2 = vld [vmem:[#allocation151_spill] sm:$0xff] }
 0x3db   :  { %v2643_v31 = vmax.f32 %v8328_v47, %v2569_v23  ;;  %v8332_v23 = vld [vmem:[#allocation96_spill] sm:$0xff] }
 0x3dc   :  { %v2571_v25 = vpop.permute.xlu0 %2570  ;;  %v3195_v40 = vmax.f32 %v3163_v57, 0.0  ;;  %4120 = vmatpush3.bf16.msra.mxu1 %v4333_v37 }
 0x3dd   :  { %4121 = vmatprep.subr.bf16.mxu1 %v4334_v21  ;;  %v2644_v28 = vmax.f32 %v8330_v1, %v2571_v25  ;;  %v8335_v1 = vld [vmem:[#allocation83_spill] sm:$0xff] }
 0x3de   :  { %v2573_v5 = vpop.permute.xlu1 %2572  ;;  %v3217_v17 = vpack.c.bf16 %v3195_v40, %v3194_v18 }
 0x3df   :  { %v2645_v57 = vmax.f32 %v8332_v23, %v2573_v5 }
 0x3e0   :  { %4096 = vmatmul.mubr.bf16.gmra.mrb[80].mxu1 %v3217_v17  ;;  %v2695_v63 = vpop.permute.xlu0 %2694  ;;  %v4335_v17 = vld [vmem:[%s7344_s5 + $0x30] sm:$0xff]  }
 0x3e1   :  { %4122 = vmatpush3.bf16.msra.mxu1 %v4334_v21  ;;  %v2770_v48 = vmax.f32 %v2642_v49, %v2695_v63 }
 0x3e2   :  { %v2697_v30 = vpop.permute.xlu1 %2696  ;;  %4123 = vmatprep.subr.bf16.mxu1 %v4335_v17 }
 0x3e3   :  { %v2771_v61 = vmax.f32 %v2643_v31, %v2697_v30 }
 0x3e4   :  { %v2855_v13 = vpop.permute.xlu0 %2854 }
 0x3e5   :  { %v3059_v8 = vsel %vm3038_vm0, %v1778_v15, %v2855_v13  ;;  %4124 = vmatpush3.bf16.msra.mxu1 %v4335_v17 }
 0x3e6   :  { %v2857_v42 = vpop.permute.xlu1 %2856 }
 0x3e7   :  { %v3060_v33 = vsel %vm3038_vm0, %v1779_v4, %v2857_v42 }
 0x3e8   :  { %v2699_v7 = vpop.permute.xlu0 %2698 }
 0x3e9   :  { %v2772_v18 = vmax.f32 %v2644_v28, %v2699_v7 }
 0x3ea   :  { %v2701_v12 = vpop.permute.xlu1 %2700 }
 0x3eb   :  { %v2773_v30 = vmax.f32 %v2645_v57, %v2701_v12  ;;  %v4336_v12 = vld [vmem:[%s7344_s5 + $0x38] sm:$0xff]   ;;  %v8340_v57 = vld [vmem:[#allocation104_spill] sm:$0xff] }
 0x3ec   :  { %v2859_v22 = vpop.permute.xlu0 %2858  ;;  %4125 = vmatprep.subr.bf16.mxu1 %v4336_v12 }
 0x3ed   :  { %v3061_v40 = vsel %vm3038_vm0, %v1780_v35, %v2859_v22  ;;  %4126 = vmatpush3.bf16.msra.mxu1 %v4336_v12 }
 0x3ee   :  { %v2861_v56 = vpop.permute.xlu1 %2860 }
 0x3ef   :  { %v3062_v13 = vsel %vm3038_vm0, %v1781_v36, %v2861_v56  ;;  %v8338_v36 = vld [vmem:[#allocation32_spill] sm:$0xff] }
 0x3f0   :  { %v2983_v20 = vpop.permute.xlu0 %2982 }
 0x3f1   :  { %v3092_v9 = vsel %vm3071_vm1, %v3059_v8, %v2983_v20 }
 0x3f2   :  { %v3125_v26 = vsel %vm3104_vm2, %v3092_v9, %v2770_v48  ;;  %v2985_v19 = vpop.permute.xlu1 %2984  ;;  %v8333_v48 = vld [vmem:[#allocation77_spill] sm:$0xff] }
 0x3f3   :  { %v3164_v44 = vadd.f32 %v6689_v32, %v3125_v26  ;;  %v3093_v16 = vsel %vm3071_vm1, %v3060_v33, %v2985_v19  ;;  %v8337_v26 = vld [vmem:[#allocation100_spill] sm:$0xff] }
 0x3f4   :  { %v3126_v37 = vsel %vm3104_vm2, %v3093_v16, %v2771_v61  ;;  %v2987_v25 = vpop.permute.xlu0 %2986  ;;  %v8336_v61 = vld [vmem:[#allocation14_spill] sm:$0xff]  ;;  %v8339_v16 = vld [vmem:[#allocation81_spill] sm:$0xff] }
 0x3f5   :  { %v3165_v63 = vadd.f32 %v6689_v32, %v3126_v37  ;;  %v3094_v21 = vsel %vm3071_vm1, %v3061_v40, %v2987_v25  ;;  %v3196_v7 = vmax.f32 %v3164_v44, 0.0 }
 0x3f6   :  { %v3127_v42 = vsel %vm3104_vm2, %v3094_v21, %v2772_v18  ;;  %v2989_v5 = vpop.permute.xlu1 %2988  ;;  %v8341_v21 = vld [vmem:[#allocation108_spill] sm:$0xff] }
 0x3f7   :  { %v3197_v29 = vmax.f32 %v3165_v63, 0.0  ;;  %v3166_v55 = vadd.f32 %v6689_v32, %v3127_v42  ;;  %v3095_v6 = vsel %vm3071_vm1, %v3062_v13, %v2989_v5 }
 0x3f8   :  { %v3128_v51 = vsel %vm3104_vm2, %v3095_v6, %v2773_v30  ;;  %v1679_v27 = vpop.permute.xlu0 %1678 }
 0x3f9   :  { %v3167_v58 = vadd.f32 %v6689_v32, %v3128_v51  ;;  %v3218_v22 = vpack.c.bf16 %v3197_v29, %v3196_v7  ;;  %v3198_v39 = vmax.f32 %v3166_v55, 0.0  ;;  %v1750_v8 = vmax.f32 %v8333_v48, %v1679_v27  ;;  %v8342_v51 = vld [vmem:[#allocation112_spill] sm:$0xff] }
 0x3fa   :  { %v1681_v38 = vpop.permute.xlu1 %1680 }
 0x3fb   :  { %v3199_v50 = vmax.f32 %v3167_v58, 0.0  ;;  %4099 = vmatprep.mubr.bf16.mxu1 %v3218_v22  ;;  %v1751_v35 = vmax.f32 %v8334_v2, %v1681_v38  ;;  %v1782_v33 = vmax.f32 %v1750_v8, %v8336_v61 }
 0x3fc   :  { %v1683_v45 = vpop.permute.xlu0 %1682 }
 0x3fd   :  { %v3219_v15 = vpack.c.bf16 %v3199_v50, %v3198_v39  ;;  %v1752_v28 = vmax.f32 %v8335_v1, %v1683_v45  ;;  %v1783_v23 = vmax.f32 %v1751_v35, %v8339_v16 }
 0x3fe   :  { %v1685_v10 = vpop.permute.xlu1 %1684 }
 0x3ff   :  { %4100 = vmatmul.mubr.bf16.gmra.mrb[84].mxu1 %v3219_v15  ;;  %v1753_v44 = vmax.f32 %v8338_v36, %v1685_v10  ;;  %v1784_v17 = vmax.f32 %v1752_v28, %v6781_v53 }
 0x400   :  { %v2575_v49 = vpop.permute.xlu0 %2574 }
 0x401   :  { %v2646_v19 = vmax.f32 %v8337_v26, %v2575_v49  ;;  %v1785_v29 = vmax.f32 %v1753_v44, %v6791_v62 }
 0x402   :  { %v2577_v56 = vpop.permute.xlu1 %2576 }
 0x403   :  { %v2647_v18 = vmax.f32 %v8340_v57, %v2577_v56 }
 0x404   :  { %v2579_v11 = vpop.permute.xlu0 %2578 }
 0x405   :  { %v2648_v30 = vmax.f32 %v8341_v21, %v2579_v11 }
 0x406   :  { %v2581_v0 = vpop.permute.xlu1 %2580 }
 0x407   :  { %v2649_v27 = vmax.f32 %v8342_v51, %v2581_v0 }
 0x408   :  { %v2703_v43 = vpop.permute.xlu0 %2702 }
 0x409   :  { %v2774_v40 = vmax.f32 %v2646_v19, %v2703_v43 }
 0x40a   :  { %v2705_v14 = vpop.permute.xlu1 %2704 }
 0x40b   :  { %v2775_v13 = vmax.f32 %v2647_v18, %v2705_v14  ;;  %v8343_v18 = vld [vmem:[#allocation116_spill] sm:$0xff] }
 0x40c   :  { %v2863_v4 = vpop.permute.xlu0 %2862 }
 0x40d   :  { %v3063_v37 = vsel %vm3038_vm0, %v1782_v33, %v2863_v4 }
 0x40e   :  { %v2865_v47 = vpop.permute.xlu1 %2864 }
 0x40f   :  { %v3064_v42 = vsel %vm3038_vm0, %v1783_v23, %v2865_v47 }
 0x410   :  { %v2707_v31 = vpop.permute.xlu0 %2706 }
 0x411   :  { %v2776_v12 = vmax.f32 %v2648_v30, %v2707_v31 }
 0x412   :  { %v2709_v20 = vpop.permute.xlu1 %2708 }
 0x413   :  { %v2777_v50 = vmax.f32 %v2649_v27, %v2709_v20 }
 0x414   :  { %v2867_v9 = vpop.permute.xlu0 %2866 }
 0x415   :  { %v3065_v53 = vsel %vm3038_vm0, %v1784_v17, %v2867_v9 }
 0x416   :  { %v2869_v52 = vpop.permute.xlu1 %2868 }
 0x417   :  { %v3066_v45 = vsel %vm3038_vm0, %v1785_v29, %v2869_v52 }
 0x418   :  { %v2991_v25 = vpop.permute.xlu0 %2990 }
 0x419   :  { %v3096_v63 = vsel %vm3071_vm1, %v3063_v37, %v2991_v25 }
 0x41a   :  { %v3129_v5 = vsel %vm3104_vm2, %v3096_v63, %v2774_v40  ;;  %v2993_v7 = vpop.permute.xlu1 %2992  ;;  %v8344_v63 = vld [vmem:[#allocation121_spill] sm:$0xff] }
 0x41b   :  { %v3168_v55 = vadd.f32 %v6689_v32, %v3129_v5  ;;  %v3097_v6 = vsel %vm3071_vm1, %v3064_v42, %v2993_v7 }
 0x41c   :  { %v3130_v58 = vsel %vm3104_vm2, %v3097_v6, %v2775_v13  ;;  %v2995_v22 = vpop.permute.xlu0 %2994 }
 0x41d   :  { %v3169_v38 = vadd.f32 %v6689_v32, %v3130_v58  ;;  %v3098_v39 = vsel %vm3071_vm1, %v3065_v53, %v2995_v22  ;;  %v3200_v10 = vmax.f32 %v3168_v55, 0.0  ;;  %v4337_v55 = vld [vmem:[%s7343_s2] ss:$0 sm:$0xff] }
 0x41e   :  { %v3131_v62 = vsel %vm3104_vm2, %v3098_v39, %v2776_v12  ;;  %v2997_v15 = vpop.permute.xlu1 %2996 }
 0x41f   :  { %v3201_v49 = vmax.f32 %v3169_v38, 0.0  ;;  %v3170_v56 = vadd.f32 %v6689_v32, %v3131_v62  ;;  %v3099_v11 = vsel %vm3071_vm1, %v3066_v45, %v2997_v15 }
 0x420   :  { %v3132_v0 = vsel %vm3104_vm2, %v3099_v11, %v2777_v50  ;;  %v1687_v43 = vpop.permute.xlu0 %1686 }
 0x421   :  { %v3171_v14 = vadd.f32 %v6689_v32, %v3132_v0  ;;  %v3220_v4 = vpack.c.bf16 %v3201_v49, %v3200_v10  ;;  %v3202_v31 = vmax.f32 %v3170_v56, 0.0  ;;  %v1754_v32 = vmax.f32 %v6863_v59, %v1687_v43 }
 0x422   :  { %v1689_v47 = vpop.permute.xlu1 %1688 }
 0x423   :  { %v3203_v48 = vmax.f32 %v3171_v14, 0.0  ;;  %4103 = vmatprep.mubr.bf16.mxu1 %v3220_v4  ;;  %v1755_v44 = vmax.f32 %v6873_v41, %v1689_v47  ;;  %v1786_v57 = vmax.f32 %v1754_v32, %v6928_v60 }
 0x424   :  { %v1691_v8 = vpop.permute.xlu0 %1690 }
 0x425   :  { %v3221_v20 = vpack.c.bf16 %v3203_v48, %v3202_v31  ;;  %v1756_v23 = vmax.f32 %v6885_v54, %v1691_v8  ;;  %v1787_v17 = vmax.f32 %v1755_v44, %v6938_v34  ;;  %v8345_v54 = vld [vmem:[#allocation127_spill] sm:$0xff]  ;;  %v7173_v31 = vld [vmem:[%s7345_s4] ss:$0 sm:$0xff] }
 0x426   :  { %v1693_v2 = vpop.permute.xlu1 %1692 }
 0x427   :  { %4104 = vmatmul.mubr.bf16.gmra.mrb[88].mxu1 %v3221_v20  ;;  %v1757_v25 = vmax.f32 %v6896_v3, %v1693_v2  ;;  %v1788_v41 = vmax.f32 %v1756_v23, %v6969_v46  ;;  %v8346_v46 = vld [vmem:[#allocation130_spill] sm:$0xff] }
 0x428   :  { %v2583_v35 = vpop.permute.xlu0 %2582 }
 0x429   :  { %v2650_v40 = vmax.f32 %v8343_v18, %v2583_v35  ;;  %v1789_v34 = vmax.f32 %v1757_v25, %v6979_v24 }
 0x42a   :  { %v2585_v9 = vpop.permute.xlu1 %2584 }
 0x42b   :  { %v2651_v21 = vmax.f32 %v8344_v63, %v2585_v9 }
 0x42c   :  { %v2587_v1 = vpop.permute.xlu0 %2586 }
 0x42d   :  { %v2652_v5 = vmax.f32 %v8345_v54, %v2587_v1 }
 0x42e   :  { %v2589_v28 = vpop.permute.xlu1 %2588 }
 0x42f   :  { %v2653_v27 = vmax.f32 %v8346_v46, %v2589_v28 }
 0x430   :  { %v2711_v61 = vpop.permute.xlu0 %2710 }
 0x431   :  { %v2778_v30 = vmax.f32 %v2650_v40, %v2711_v61 }
 0x432   :  { %v2713_v33 = vpop.permute.xlu1 %2712 }
 0x433   :  { %v2779_v60 = vmax.f32 %v2651_v21, %v2713_v33 }
 0x434   :  { %v2871_v26 = vpop.permute.xlu0 %2870 }
 0x435   :  { %v3067_v59 = vsel %vm3038_vm0, %v1786_v57, %v2871_v26 }
 0x436   :  { %v2873_v19 = vpop.permute.xlu1 %2872 }
 0x437   :  { %v3068_v7 = vsel %vm3038_vm0, %v1787_v17, %v2873_v19 }
 0x438   :  { %v2715_v52 = vpop.permute.xlu0 %2714 }
 0x439   :  { %v2780_v12 = vmax.f32 %v2652_v5, %v2715_v52 }
 0x43a   :  { %v2717_v36 = vpop.permute.xlu1 %2716 }
 0x43b   :  { %v2781_v50 = vmax.f32 %v2653_v27, %v2717_v36 }
 0x43c   :  { %v2875_v16 = vpop.permute.xlu0 %2874 }
 0x43d   :  { %v3069_v53 = vsel %vm3038_vm0, %v1788_v41, %v2875_v16 }
 0x43e   :  { %v2877_v37 = vpop.permute.xlu1 %2876 }
 0x43f   :  { %v3070_v24 = vsel %vm3038_vm0, %v1789_v34, %v2877_v37 }
 0x440   :  { %v2999_v13 = vpop.permute.xlu0 %2998 }
 0x441   :  { %v3100_v42 = vsel %vm3071_vm1, %v3067_v59, %v2999_v13 }
 0x442   :  { %v3133_v29 = vsel %vm3104_vm2, %v3100_v42, %v2778_v30  ;;  %v3001_v3 = vpop.permute.xlu1 %3000 }
 0x443   :  { %v3172_v6 = vadd.f32 %v4337_v55, %v3133_v29  ;;  %v3101_v51 = vsel %vm3071_vm1, %v3068_v7, %v3001_v3 }
 0x444   :  { %v3134_v58 = vsel %vm3104_vm2, %v3101_v51, %v2779_v60  ;;  %v3003_v22 = vpop.permute.xlu0 %3002 }
 0x445   :  { %v3173_v38 = vadd.f32 %v4337_v55, %v3134_v58  ;;  %v3102_v39 = vsel %vm3071_vm1, %v3069_v53, %v3003_v22  ;;  %v3204_v15 = vmax.f32 %v3172_v6, 0.0 }
 0x446   :  { %v3135_v45 = vsel %vm3104_vm2, %v3102_v39, %v2780_v12  ;;  %v3005_v62 = vpop.permute.xlu1 %3004 }
 0x447   :  { %v3205_v10 = vmax.f32 %v3173_v38, 0.0  ;;  %v3174_v49 = vadd.f32 %v4337_v55, %v3135_v45  ;;  %v3103_v56 = vsel %vm3071_vm1, %v3070_v24, %v3005_v62 }
 0x448   :  { %v3136_v11 = vsel %vm3104_vm2, %v3103_v56, %v2781_v50 }
 0x449   :  { %v3175_v0 = vadd.f32 %v4337_v55, %v3136_v11  ;;  %v3222_v43 = vpack.c.bf16 %v3205_v10, %v3204_v15  ;;  %v3206_v14 = vmax.f32 %v3174_v49, 0.0 }
 0x44b   :  { %v3207_v4 = vmax.f32 %v3175_v0, 0.0  ;;  %4107 = vmatprep.mubr.bf16.mxu1 %v3222_v43 }
 0x44d   :  { %v3223_v47 = vpack.c.bf16 %v3207_v4, %v3206_v14 }
 0x44f   :  { %4108 = vmatmul.mubr.bf16.gmra.mrb[92].mxu1 %v3223_v47 }
 0x473   :  { %v4081_v48 = vpop.f32.mrb[64].mxu1 }
 0x474   :  { %v3338_v8 = vadd.f32 %v4081_v48, %v7173_v31  ;;  %v3329_v20 = vpop.f32.mrb[65].mxu1 }
 0x475   :  { %v3330_v2 = vadd.f32 %v7173_v31, %v3329_v20  ;;  %v4082_v35 = vpop.f32.mrb[66].mxu1 }
 0x476   :  { %v3341_v9 = vadd.f32 %v4082_v35, %v7173_v31  ;;  %v3332_v1 = vpop.f32.mrb[67].mxu1  ;;  %v3458_v61 = vmax.f32 %v3338_v8, 0.0 }
 0x477   :  { %v3333_v28 = vadd.f32 %v7173_v31, %v3332_v1  ;;  %v3456_v26 = vmax.f32 %v3330_v2, 0.0 }
 0x478   :  { %v3459_v33 = vmax.f32 %v3341_v9, 0.0 }
 0x479   :  { %v3457_v19 = vmax.f32 %v3333_v28, 0.0 }
 0x47a   :  { %v3489_v52 = vpack.c.bf16 %v3459_v33, %v3458_v61 }
 0x47b   :  { %v3488_v32 = vpack.c.bf16 %v3457_v19, %v3456_v26 }
 0x47d   :  { %4127 = vmatprep.mubr.bf16.mxu1 %v3488_v32 }
 0x47e   :  { %4128 = vmatmul.mubr.bf16.vlgmr.msra.gmra.mrb[96].mxu1 %v3489_v52 }
 0x483   :  { %v4085_v36 = vpop.f32.mrb[68].mxu1 }
 0x484   :  { %v3354_v44 = vadd.f32 %v4085_v36, %v7173_v31  ;;  %v3345_v16 = vpop.f32.mrb[69].mxu1 }
 0x485   :  { %v3346_v23 = vadd.f32 %v7173_v31, %v3345_v16  ;;  %v4086_v57 = vpop.f32.mrb[70].mxu1 }
 0x486   :  { %v3357_v18 = vadd.f32 %v4086_v57, %v7173_v31  ;;  %v3348_v40 = vpop.f32.mrb[71].mxu1  ;;  %v3462_v25 = vmax.f32 %v3354_v44, 0.0 }
 0x487   :  { %v3349_v37 = vadd.f32 %v7173_v31, %v3348_v40  ;;  %v3460_v63 = vmax.f32 %v3346_v23, 0.0 }
 0x488   :  { %v3463_v17 = vmax.f32 %v3357_v18, 0.0 }
 0x489   :  { %v3461_v21 = vmax.f32 %v3349_v37, 0.0 }
 0x48a   :  { %v3491_v30 = vpack.c.bf16 %v3463_v17, %v3462_v25 }
 0x48b   :  { %v3490_v59 = vpack.c.bf16 %v3461_v21, %v3460_v63 }
 0x48d   :  { %4131 = vmatprep.mubr.bf16.mxu1 %v3490_v59 }
 0x48e   :  { %4132 = vmatmul.mubr.bf16.gmra.mrb[100].mxu1 %v3491_v30 }
 0x493   :  { %v4089_v13 = vpop.f32.mrb[72].mxu1 }
 0x494   :  { %v3370_v41 = vadd.f32 %v4089_v13, %v7173_v31  ;;  %v3361_v42 = vpop.f32.mrb[73].mxu1 }
 0x495   :  { %v3362_v54 = vadd.f32 %v7173_v31, %v3361_v42  ;;  %v4090_v5 = vpop.f32.mrb[74].mxu1 }
 0x496   :  { %v3373_v60 = vadd.f32 %v4090_v5, %v7173_v31  ;;  %v3364_v7 = vpop.f32.mrb[75].mxu1  ;;  %v3466_v3 = vmax.f32 %v3370_v41, 0.0 }
 0x497   :  { %v3365_v29 = vadd.f32 %v7173_v31, %v3364_v7  ;;  %v3464_v55 = vmax.f32 %v3362_v54, 0.0 }
 0x498   :  { %v3467_v34 = vmax.f32 %v3373_v60, 0.0 }
 0x499   :  { %v3465_v6 = vmax.f32 %v3365_v29, 0.0 }
 0x49a   :  { %v3493_v51 = vpack.c.bf16 %v3467_v34, %v3466_v3 }
 0x49b   :  { %v3492_v46 = vpack.c.bf16 %v3465_v6, %v3464_v55 }
 0x49d   :  { %4135 = vmatprep.mubr.bf16.mxu1 %v3492_v46 }
 0x49e   :  { %4136 = vmatmul.mubr.bf16.gmra.mrb[104].mxu1 %v3493_v51 }
 0x4a3   :  { %v4093_v27 = vpop.f32.mrb[76].mxu1 }
 0x4a4   :  { %v3386_v12 = vadd.f32 %v4093_v27, %v7173_v31  ;;  %v3377_v53 = vpop.f32.mrb[77].mxu1 }
 0x4a5   :  { %v3378_v58 = vadd.f32 %v7173_v31, %v3377_v53  ;;  %v4094_v22 = vpop.f32.mrb[78].mxu1 }
 0x4a6   :  { %v3389_v38 = vadd.f32 %v4094_v22, %v7173_v31  ;;  %v3380_v39 = vpop.f32.mrb[79].mxu1  ;;  %v3470_v24 = vmax.f32 %v3386_v12, 0.0 }
 0x4a7   :  { %v3381_v50 = vadd.f32 %v7173_v31, %v3380_v39  ;;  %v3468_v62 = vmax.f32 %v3378_v58, 0.0 }
 0x4a8   :  { %v3471_v45 = vmax.f32 %v3389_v38, 0.0 }
 0x4a9   :  { %v3469_v15 = vmax.f32 %v3381_v50, 0.0  ;;  %v7210_v50 = vld [vmem:[%s7346_s6] ss:$0 sm:$0xff] }
 0x4aa   :  { %v3495_v10 = vpack.c.bf16 %v3471_v45, %v3470_v24 }
 0x4ab   :  { %v3494_v49 = vpack.c.bf16 %v3469_v15, %v3468_v62 }
 0x4ad   :  { %4139 = vmatprep.mubr.bf16.mxu1 %v3494_v49 }
 0x4ae   :  { %4140 = vmatmul.mubr.bf16.gmra.mrb[108].mxu1 %v3495_v10 }
 0x4b3   :  { %v4097_v56 = vpop.f32.mrb[80].mxu1 }
 0x4b4   :  { %v3402_v11 = vadd.f32 %v4097_v56, %v7173_v31  ;;  %v3393_v0 = vpop.f32.mrb[81].mxu1 }
 0x4b5   :  { %v3394_v43 = vadd.f32 %v7173_v31, %v3393_v0  ;;  %v4098_v14 = vpop.f32.mrb[82].mxu1 }
 0x4b6   :  { %v3405_v4 = vadd.f32 %v4098_v14, %v7173_v31  ;;  %v3396_v47 = vpop.f32.mrb[83].mxu1  ;;  %v3474_v8 = vmax.f32 %v3402_v11, 0.0 }
 0x4b7   :  { %v3397_v48 = vadd.f32 %v7173_v31, %v3396_v47  ;;  %v3472_v2 = vmax.f32 %v3394_v43, 0.0 }
 0x4b8   :  { %v3475_v20 = vmax.f32 %v3405_v4, 0.0 }
 0x4b9   :  { %v3473_v35 = vmax.f32 %v3397_v48, 0.0 }
 0x4ba   :  { %v3497_v9 = vpack.c.bf16 %v3475_v20, %v3474_v8 }
 0x4bb   :  { %v3496_v1 = vpack.c.bf16 %v3473_v35, %v3472_v2 }
 0x4bd   :  { %4143 = vmatprep.mubr.bf16.mxu1 %v3496_v1 }
 0x4be   :  { %4144 = vmatmul.mubr.bf16.gmra.mrb[112].mxu1 %v3497_v9 }
 0x4d2   :  { %v4101_v28 = vpop.f32.mrb[84].mxu1 }
 0x4d3   :  { %v3418_v61 = vadd.f32 %v4101_v28, %v7173_v31  ;;  %v3409_v33 = vpop.f32.mrb[85].mxu1 }
 0x4d4   :  { %v3410_v26 = vadd.f32 %v7173_v31, %v3409_v33  ;;  %v4102_v19 = vpop.f32.mrb[86].mxu1 }
 0x4d5   :  { %v3421_v52 = vadd.f32 %v4102_v19, %v7173_v31  ;;  %v3412_v32 = vpop.f32.mrb[87].mxu1  ;;  %v3478_v44 = vmax.f32 %v3418_v61, 0.0 }
 0x4d6   :  { %v3413_v36 = vadd.f32 %v7173_v31, %v3412_v32  ;;  %v3476_v23 = vmax.f32 %v3410_v26, 0.0 }
 0x4d7   :  { %v3479_v16 = vmax.f32 %v3421_v52, 0.0 }
 0x4d8   :  { %v3477_v57 = vmax.f32 %v3413_v36, 0.0 }
 0x4d9   :  { %v3499_v18 = vpack.c.bf16 %v3479_v16, %v3478_v44 }
 0x4da   :  { %v3498_v40 = vpack.c.bf16 %v3477_v57, %v3476_v23 }
 0x4dc   :  { %4147 = vmatprep.mubr.bf16.mxu1 %v3498_v40 }
 0x4dd   :  { %4148 = vmatmul.mubr.bf16.gmra.mrb[116].mxu1 %v3499_v18 }
 0x4fa   :  { %v4105_v37 = vpop.f32.mrb[88].mxu1 }
 0x4fb   :  { %v3434_v25 = vadd.f32 %v4105_v37, %v7173_v31  ;;  %v3425_v17 = vpop.f32.mrb[89].mxu1 }
 0x4fc   :  { %v3426_v63 = vadd.f32 %v7173_v31, %v3425_v17  ;;  %v4106_v21 = vpop.f32.mrb[90].mxu1 }
 0x4fd   :  { %v3437_v30 = vadd.f32 %v4106_v21, %v7173_v31  ;;  %v3428_v59 = vpop.f32.mrb[91].mxu1  ;;  %v3482_v41 = vmax.f32 %v3434_v25, 0.0 }
 0x4fe   :  { %v3429_v13 = vadd.f32 %v7173_v31, %v3428_v59  ;;  %v3480_v54 = vmax.f32 %v3426_v63, 0.0 }
 0x4ff   :  { %v3483_v42 = vmax.f32 %v3437_v30, 0.0 }
 0x500   :  { %v3481_v5 = vmax.f32 %v3429_v13, 0.0 }
 0x501   :  { %v3501_v60 = vpack.c.bf16 %v3483_v42, %v3482_v41 }
 0x502   :  { %v3500_v7 = vpack.c.bf16 %v3481_v5, %v3480_v54 }
 0x504   :  { %4151 = vmatprep.mubr.bf16.mxu1 %v3500_v7 }
 0x505   :  { %4152 = vmatmul.mubr.bf16.gmra.mrb[120].mxu1 %v3501_v60 }
 0x522   :  { %v4109_v29 = vpop.f32.mrb[92].mxu1 }
 0x523   :  { %v3450_v3 = vadd.f32 %v4109_v29, %v7173_v31  ;;  %v3441_v34 = vpop.f32.mrb[93].mxu1 }
 0x524   :  { %v3442_v55 = vadd.f32 %v7173_v31, %v3441_v34  ;;  %v4110_v6 = vpop.f32.mrb[94].mxu1 }
 0x525   :  { %v3453_v51 = vadd.f32 %v4110_v6, %v7173_v31  ;;  %v3444_v46 = vpop.f32.mrb[95].mxu1  ;;  %v3486_v12 = vmax.f32 %v3450_v3, 0.0 }
 0x526   :  { %v3445_v27 = vadd.f32 %v7173_v31, %v3444_v46  ;;  %v3484_v58 = vmax.f32 %v3442_v55, 0.0 }
 0x527   :  { %v3487_v53 = vmax.f32 %v3453_v51, 0.0 }
 0x528   :  { %v3485_v22 = vmax.f32 %v3445_v27, 0.0 }
 0x529   :  { %v3503_v38 = vpack.c.bf16 %v3487_v53, %v3486_v12 }
 0x52a   :  { %v3502_v39 = vpack.c.bf16 %v3485_v22, %v3484_v58 }
 0x52c   :  { %4155 = vmatprep.mubr.bf16.mxu1 %v3502_v39 }
 0x52d   :  { %4156 = vmatmul.mubr.bf16.gmra.mrb[124].mxu1 %v3503_v38 }
 0x551   :  { %v4129_v24 = vpop.f32.mrb[96].mxu1 }
 0x552   :  { %v3618_v45 = vadd.f32 %v4129_v24, %v7210_v50  ;;  %v3609_v62 = vpop.f32.mrb[97].mxu1 }
 0x553   :  { %v3610_v15 = vadd.f32 %v7210_v50, %v3609_v62  ;;  %v4130_v31 = vpop.f32.mrb[98].mxu1 }
 0x554   :  { %3738 = vst [vmem:[%s7347_s7 + $0x10] sm:$0xff] %v3618_v45  ;;  %v3621_v10 = vadd.f32 %v4130_v31, %v7210_v50  ;;  %v3612_v49 = vpop.f32.mrb[99].mxu1 }
 0x555   :  { %3736 = vst [vmem:[%s7347_s7] sm:$0xff] %v3610_v15  ;;  %v3613_v56 = vadd.f32 %v7210_v50, %v3612_v49 }
 0x556   :  { %3739 = vst [vmem:[%s7347_s7 + $0x18] sm:$0xff] %v3621_v10 }
 0x557   :  { %3737 = vst [vmem:[%s7347_s7 + $0x8] sm:$0xff] %v3613_v56 }
 0x561   :  { %v4133_v11 = vpop.f32.mrb[100].mxu1 }
 0x562   :  { %v3634_v0 = vadd.f32 %v4133_v11, %v7210_v50  ;;  %v3625_v43 = vpop.f32.mrb[101].mxu1 }
 0x563   :  { %v3626_v14 = vadd.f32 %v7210_v50, %v3625_v43  ;;  %v4134_v4 = vpop.f32.mrb[102].mxu1 }
 0x564   :  { %3742 = vst [vmem:[%s7347_s7 + $0x30] sm:$0xff] %v3634_v0  ;;  %v3637_v47 = vadd.f32 %v4134_v4, %v7210_v50  ;;  %v3628_v48 = vpop.f32.mrb[103].mxu1 }
 0x565   :  { %3740 = vst [vmem:[%s7347_s7 + $0x20] sm:$0xff] %v3626_v14  ;;  %v3629_v8 = vadd.f32 %v7210_v50, %v3628_v48 }
 0x566   :  { %3743 = vst [vmem:[%s7347_s7 + $0x38] sm:$0xff] %v3637_v47 }
 0x567   :  { %3741 = vst [vmem:[%s7347_s7 + $0x28] sm:$0xff] %v3629_v8 }
 0x571   :  { %v4137_v20 = vpop.f32.mrb[104].mxu1 }
 0x572   :  { %v3650_v2 = vadd.f32 %v4137_v20, %v7210_v50  ;;  %v3641_v35 = vpop.f32.mrb[105].mxu1 }
 0x573   :  { %v3642_v9 = vadd.f32 %v7210_v50, %v3641_v35  ;;  %v4138_v1 = vpop.f32.mrb[106].mxu1 }
 0x574   :  { %3746 = vst [vmem:[%s7347_s7 + $0x50] sm:$0xff] %v3650_v2  ;;  %v3653_v28 = vadd.f32 %v4138_v1, %v7210_v50  ;;  %v3644_v61 = vpop.f32.mrb[107].mxu1 }
 0x575   :  { %3744 = vst [vmem:[%s7347_s7 + $0x40] sm:$0xff] %v3642_v9  ;;  %v3645_v33 = vadd.f32 %v7210_v50, %v3644_v61 }
 0x576   :  { %3747 = vst [vmem:[%s7347_s7 + $0x58] sm:$0xff] %v3653_v28 }
 0x577   :  { %3745 = vst [vmem:[%s7347_s7 + $0x48] sm:$0xff] %v3645_v33 }
 0x581   :  { %v4141_v26 = vpop.f32.mrb[108].mxu1 }
 0x582   :  { %v3666_v19 = vadd.f32 %v4141_v26, %v7210_v50  ;;  %v3657_v52 = vpop.f32.mrb[109].mxu1 }
 0x583   :  { %v3658_v32 = vadd.f32 %v7210_v50, %v3657_v52  ;;  %v4142_v36 = vpop.f32.mrb[110].mxu1 }
 0x584   :  { %3750 = vst [vmem:[%s7347_s7 + $0x70] sm:$0xff] %v3666_v19  ;;  %v3669_v44 = vadd.f32 %v4142_v36, %v7210_v50  ;;  %v3660_v16 = vpop.f32.mrb[111].mxu1 }
 0x585   :  { %3748 = vst [vmem:[%s7347_s7 + $0x60] sm:$0xff] %v3658_v32  ;;  %v3661_v23 = vadd.f32 %v7210_v50, %v3660_v16 }
 0x586   :  { %3751 = vst [vmem:[%s7347_s7 + $0x78] sm:$0xff] %v3669_v44 }
 0x587   :  { %3749 = vst [vmem:[%s7347_s7 + $0x68] sm:$0xff] %v3661_v23 }
 0x591   :  { %v4145_v57 = vpop.f32.mrb[112].mxu1 }
 0x592   :  { %v3682_v18 = vadd.f32 %v4145_v57, %v7210_v50  ;;  %v3673_v40 = vpop.f32.mrb[113].mxu1 }
 0x593   :  { %v3674_v37 = vadd.f32 %v7210_v50, %v3673_v40  ;;  %v4146_v25 = vpop.f32.mrb[114].mxu1 }
 0x594   :  { %3754 = vst [vmem:[%s7347_s7 + $0x90] sm:$0xff] %v3682_v18  ;;  %v3685_v17 = vadd.f32 %v4146_v25, %v7210_v50  ;;  %v3676_v63 = vpop.f32.mrb[115].mxu1 }
 0x595   :  { %3752 = vst [vmem:[%s7347_s7 + $0x80] sm:$0xff] %v3674_v37  ;;  %v3677_v21 = vadd.f32 %v7210_v50, %v3676_v63 }
 0x596   :  { %3755 = vst [vmem:[%s7347_s7 + $0x98] sm:$0xff] %v3685_v17 }
 0x597   :  { %3753 = vst [vmem:[%s7347_s7 + $0x88] sm:$0xff] %v3677_v21 }
 0x5b0   :  { %v4149_v30 = vpop.f32.mrb[116].mxu1 }
 0x5b1   :  { %v3698_v59 = vadd.f32 %v4149_v30, %v7210_v50  ;;  %v3689_v13 = vpop.f32.mrb[117].mxu1 }
 0x5b2   :  { %v3690_v41 = vadd.f32 %v7210_v50, %v3689_v13  ;;  %v4150_v42 = vpop.f32.mrb[118].mxu1 }
 0x5b3   :  { %3758 = vst [vmem:[%s7347_s7 + $0xb0] sm:$0xff] %v3698_v59  ;;  %v3701_v54 = vadd.f32 %v4150_v42, %v7210_v50  ;;  %v3692_v5 = vpop.f32.mrb[119].mxu1 }
 0x5b4   :  { %3756 = vst [vmem:[%s7347_s7 + $0xa0] sm:$0xff] %v3690_v41  ;;  %v3693_v60 = vadd.f32 %v7210_v50, %v3692_v5 }
 0x5b5   :  { %3759 = vst [vmem:[%s7347_s7 + $0xb8] sm:$0xff] %v3701_v54 }
 0x5b6   :  { %3757 = vst [vmem:[%s7347_s7 + $0xa8] sm:$0xff] %v3693_v60 }
 0x5d8   :  { %v4153_v7 = vpop.f32.mrb[120].mxu1 }
 0x5d9   :  { %v3714_v29 = vadd.f32 %v4153_v7, %v7210_v50  ;;  %v3705_v3 = vpop.f32.mrb[121].mxu1 }
 0x5da   :  { %v3706_v34 = vadd.f32 %v7210_v50, %v3705_v3  ;;  %v4154_v55 = vpop.f32.mrb[122].mxu1 }
 0x5db   :  { %3762 = vst [vmem:[%s7347_s7 + $0xd0] sm:$0xff] %v3714_v29  ;;  %v3717_v6 = vadd.f32 %v4154_v55, %v7210_v50  ;;  %v3708_v51 = vpop.f32.mrb[123].mxu1 }
 0x5dc   :  { %3760 = vst [vmem:[%s7347_s7 + $0xc0] sm:$0xff] %v3706_v34  ;;  %v3709_v46 = vadd.f32 %v7210_v50, %v3708_v51 }
 0x5dd   :  { %3763 = vst [vmem:[%s7347_s7 + $0xd8] sm:$0xff] %v3717_v6 }
 0x5de   :  { %3761 = vst [vmem:[%s7347_s7 + $0xc8] sm:$0xff] %v3709_v46 }
 0x600   :  { %v4157_v27 = vpop.f32.mrb[124].mxu1 }
 0x601   :  { %v3730_v12 = vadd.f32 %v4157_v27, %v7210_v50  ;;  %v3721_v53 = vpop.f32.mrb[125].mxu1 }
 0x602   :  { %v3722_v58 = vadd.f32 %v7210_v50, %v3721_v53  ;;  %v4158_v22 = vpop.f32.mrb[126].mxu1 }
 0x603   :  { %3766 = vst [vmem:[%s7347_s7 + $0xf0] sm:$0xff] %v3730_v12  ;;  %v3733_v38 = vadd.f32 %v4158_v22, %v7210_v50  ;;  %v3724_v39 = vpop.f32.mrb[127].mxu1 }
 0x604   :  { %3764 = vst [vmem:[%s7347_s7 + $0xe0] sm:$0xff] %v3722_v58  ;;  %v3725_v24 = vadd.f32 %v7210_v50, %v3724_v39 }
 0x605   :  { %3767 = vst [vmem:[%s7347_s7 + $0xf8] sm:$0xff] %v3733_v38 }
 0x606   :  { %3765 = vst [vmem:[%s7347_s7 + $0xe8] sm:$0xff] %v3725_v24 }

</bundles_post_ra>
